<compile_context>
chip_gen: v7x
topology: tpu7x:2x2x1
jax: 0.10.0
libtpu: 0.0.40
codegen_flags: <defaults>
</compile_context>

<pallas_src>
import functools
import math

import numpy as np
import jax
import jax.numpy as jnp
from jax import lax
from jax.experimental import pallas as pl
from jax.experimental.pallas import tpu as pltpu


# ---------------------------------------------------------------------------
# in-kernel helpers
# ---------------------------------------------------------------------------
def _layernorm(x, w, b, eps=1e-5):
    mu = jnp.mean(x, axis=-1, keepdims=True)
    var = jnp.mean((x - mu) ** 2, axis=-1, keepdims=True)
    return (x - mu) * lax.rsqrt(var + eps) * w + b


def _softmax(x, axis):
    m = jnp.max(x, axis=axis, keepdims=True)
    e = jnp.exp(x - m)
    s = jnp.sum(e, axis=axis, keepdims=True)
    return e * pl.reciprocal(s, approx=True)      # EUP reciprocal, frees VPU divide


def _gelu_exact(x):
    # nn.GELU() default in PyTorch is the exact (erf) variant.
    return 0.5 * x * (1.0 + lax.erf(x * np.float32(1.0 / math.sqrt(2.0))))


# ---------------------------------------------------------------------------
# fused kernel (Bt batch images per grid step)
# ---------------------------------------------------------------------------
def _cab_kernel(x1_ref, x2_ref,
                n1w_ref, n1b_ref,
                rpw_ref, rpb_ref, anw_ref, anb_ref,
                n2w_ref, n2b_ref,
                fc1w_ref, fc1b_ref, dww_ref, dwb_ref,
                fc2w_ref, fc2b_ref,
                mx_ref,
                *, head_count, batch_tile, dim, height, width):
    Bt = batch_tile
    D = dim
    W = width
    N = height * width
    BtN = Bt * N
    D2 = 2 * D
    bf16 = jnp.bfloat16
    f32 = jnp.float32

    # ---- channel-major (Bt, D, N) tiles -> one token-major (Bt*N, D) slab ----
    # (2-D in-kernel transposes per image; no XLA-side HBM transpose pass)
    def to_tokens(ref):
        imgs = [ref[b].T for b in range(Bt)]                  # each (N, D)
        return imgs[0] if Bt == 1 else jnp.concatenate(imgs, axis=0)

    x1 = to_tokens(x1_ref)          # values branch          (BtN, D) f32
    x2 = to_tokens(x2_ref)          # keys / queries branch  (BtN, D) f32

    n1w = n1w_ref[...]
    n1b = n1b_ref[...]
    ln1 = _layernorm(x1, n1w, n1b)
    ln2 = _layernorm(x2, n1w, n1b)

    # ---- efficient cross attention (per image; contraction is over tokens) ----
    hk = D // head_count
    hv = D // head_count
    att_imgs = []
    for b in range(Bt):
        ln1_b = ln1[b * N:(b + 1) * N, :]
        ln2_b = ln2[b * N:(b + 1) * N, :]
        head_outs = []
        for i in range(head_count):
            kq = ln2_b[:, i * hk:(i + 1) * hk]                          # (N, hk)
            v = ln1_b[:, i * hv:(i + 1) * hv].astype(bf16)              # (N, hv)
            kk = _softmax(kq, axis=0).astype(bf16)       # softmax over tokens
            qq = _softmax(kq, axis=1).astype(bf16)       # softmax over head chans
            ctx = lax.dot_general(kk, v, (((0,), (0,)), ((), ())),
                                  preferred_element_type=f32)           # (hk, hv)
            head_outs.append(jnp.dot(qq, ctx.astype(bf16),
                                     preferred_element_type=f32))       # (N, hv)
        att_b = head_outs[0] if head_count == 1 else jnp.concatenate(head_outs, axis=1)
        att_imgs.append(att_b)
    att = att_imgs[0] if Bt == 1 else jnp.concatenate(att_imgs, axis=0)  # (BtN, D)

    # single full-depth reprojection matmul over all Bt*N rows
    reproj = jnp.dot(att.astype(bf16), rpw_ref[...],
                     preferred_element_type=f32) + rpb_ref[...]          # (BtN, 2D)
    attn_out = _layernorm(reproj, anw_ref[...], anb_ref[...])

    # residual concat built in-kernel from tiles already resident in VMEM
    tx = jnp.concatenate([x1, x2], axis=1) + attn_out                    # (BtN, 2D)
    ntx = _layernorm(tx, n2w_ref[...], n2b_ref[...])

    # ---- MixFFN ----
    h = jnp.dot(ntx.astype(bf16), fc1w_ref[...],
                preferred_element_type=f32) + fc1b_ref[...]              # (BtN, 4D)
    d4 = h.shape[1]

    # Depthwise 3x3 conv over each image's (H, W) grid, done on the flattened
    # token axis with circular rolls (XLU slot) instead of padded copies /
    # unaligned sublane slices.  Per-image zero padding is reproduced by:
    #   * zeroing the first / last W tokens of each image in the roll *source*
    #     for the vertical (dh = +1 / -1) taps, and
    #   * one left / right lane mask applied once per dw tap group.
    # Cross-image wrap-around of the roll only ever lands on positions that
    # one of those masks already zeroes.
    u = lax.broadcasted_iota(jnp.int32, (BtN, 1), 0)     # flattened token index
    t_img = u % N                                        # token index within image
    col = u % W                                          # column (N is a multiple of W)
    mask_l = (col >= 1).astype(f32)                      # valid when dw = -1
    mask_r = (col <= W - 2).astype(f32)                  # valid when dw = +1

    h_dn = jnp.where(t_img >= W, h, 0.0)         # source for dh = +1 taps
    h_up = jnp.where(t_img < N - W, h, 0.0)      # source for dh = -1 taps

    def shift(src, s):
        # out[u] = src[(u + s) mod BtN]   (static, non-negative roll amount)
        amt = (-s) % BtN
        return src if amt == 0 else pltpu.roll(src, shift=amt, axis=0)

    w = dww_ref[...]                             # (9, 4D) f32, tap index (dh+1)*3+(dw+1)
    g_m = (w[0:1] * shift(h_up, -(W + 1))        # dw = -1 group
           + w[3:4] * shift(h, -1)
           + w[6:7] * shift(h_dn, W - 1))
    g_c = (w[1:2] * shift(h_up, -W)              # dw =  0 group
           + w[4:5] * h
           + w[7:8] * shift(h_dn, W))
    g_p = (w[2:3] * shift(h_up, -(W - 1))        # dw = +1 group
           + w[5:6] * shift(h, 1)
           + w[8:9] * shift(h_dn, W + 1))
    conv = g_c + mask_l * g_m + mask_r * g_p + dwb_ref[...]              # (BtN, 4D)

    g = _gelu_exact(conv)
    ffn = jnp.dot(g.astype(bf16), fc2w_ref[...],
                  preferred_element_type=f32) + fc2b_ref[...]            # (BtN, 2D)

    mx = (tx + ffn).reshape(Bt, N, D2)
    # emit channel-major (NCHW-compatible) so the wrapper only reshapes
    for b in range(Bt):
        mx_ref[b] = mx[b].T                                              # (2D, N)


# ---------------------------------------------------------------------------
# glue
# ---------------------------------------------------------------------------
def _pick_batch_tile(B, N, d4, target_rows=256, vmem_act_budget=40 << 20):
    """Bt images per grid step: fill MXU rows (>=256 on v6e/v7x, >=128 on v5e)
    while keeping the f32 working set inside a conservative VMEM budget
    (v7x only has 64 MiB of VMEM)."""
    bt = min(B, max(1, -(-target_rows // N)))
    while B % bt:
        bt -= 1
    while bt > 1 and 12 * bt * N * d4 * 4 > vmem_act_budget:
        bt -= 1
        while B % bt:
            bt -= 1
    return bt


def cross_attention_block(x1_img, x2_img, params, *, head_count=1, batch_tile=None):
    """x1_img, x2_img: [B, D, H, W] (NCHW). Returns [B, 2D, H, W]."""
    B, D, H, W = x1_img.shape
    assert x2_img.shape == (B, D, H, W)
    N = H * W
    D2, D4 = 2 * D, 4 * D
    assert D % head_count == 0

    Bt = batch_tile if batch_tile is not None else _pick_batch_tile(B, N, D4)
    assert B % Bt == 0
    grid_b = B // Bt
    # NOTE(v7x): with 2 TensorCores, keep grid_b >= 2 when B allows it.

    # NCHW -> (B, D, N): free reshape, NO HBM transpose pass (transpose happens
    # in-kernel on VMEM-resident tiles).
    x1 = x1_img.reshape(B, D, N)
    x2 = x2_img.reshape(B, D, N)

    bf16 = jnp.bfloat16
    kernel = functools.partial(_cab_kernel, head_count=head_count, batch_tile=Bt,
                               dim=D, height=H, width=W)

    def full(shape):
        nd = len(shape)
        return pl.BlockSpec(shape, lambda b, _nd=nd: (0,) * _nd)

    # TODO(synk): mark the constant-index weight specs with
    # pipeline_mode=pl.Buffered(1) once the installed jax exposes it, to halve
    # their VMEM footprint on v7x.
    in_specs = [
        pl.BlockSpec((Bt, D, N), lambda b: (b, 0, 0)),    # x1 (channel-major)
        pl.BlockSpec((Bt, D, N), lambda b: (b, 0, 0)),    # x2 (channel-major)
        full((1, D)), full((1, D)),                       # norm1 w, b
        full((D, D2)), full((1, D2)),                     # reprojection (1x1 conv) w (bf16), b
        full((1, D2)), full((1, D2)),                     # attn LayerNorm w, b
        full((1, D2)), full((1, D2)),                     # norm2 w, b
        full((D2, D4)), full((1, D4)),                    # fc1 w (bf16), b
        full((9, D4)), full((1, D4)),                     # depthwise conv taps, b
        full((D4, D2)), full((1, D2)),                    # fc2 w (bf16), b
    ]
    out_spec = pl.BlockSpec((Bt, D2, N), lambda b: (b, 0, 0))

    # VMEM limit derived from the actual footprint (clamped for v7x's 64 MiB).
    est = (2 * (2 * Bt * D * N * 4)                       # x1, x2 double-buffered
           + 2 * (Bt * D2 * N * 4)                        # out double-buffered
           + 2 * 2 * (D * D2 + D2 * D4 + D4 * D2)         # bf16 weights, double-buffered
           + 2 * 4 * (9 * D4 + 2 * D + 6 * D2 + 2 * D4)   # f32 taps / biases / LN params
           + 14 * Bt * N * D4 * 4)                        # f32 working set
    vmem_limit = int(min(max(2 * est, 16 << 20), 100 << 20))

    mx = pl.pallas_call(
        kernel,
        out_shape=jax.ShapeDtypeStruct((B, D2, N), jnp.float32),
        grid_spec=pltpu.PrefetchScalarGridSpec(
            num_scalar_prefetch=0, grid=(grid_b,),
            in_specs=in_specs, out_specs=out_spec),
        compiler_params=pltpu.CompilerParams(
            dimension_semantics=("parallel",),
            vmem_limit_bytes=vmem_limit),
    )(x1, x2,
      params["n1w"], params["n1b"],
      params["rpw"].astype(bf16), params["rpb"],
      params["anw"], params["anb"],
      params["n2w"], params["n2b"],
      params["fc1w"].astype(bf16), params["fc1b"],
      params["dww"], params["dwb"],
      params["fc2w"].astype(bf16), params["fc2b"])

    return mx.reshape(B, D2, H, W)   # free reshape: output already channel-major


# ---------------------------------------------------------------------------
# deterministic parameter init (synthetic weights, shapes from the module)
# ---------------------------------------------------------------------------
def init_params(key, D):
    D2, D4 = 2 * D, 4 * D
    ks = jax.random.split(key, 14)
    f = lambda k, shape, s=0.1: s * jax.random.normal(k, shape, jnp.float32)
    p = dict(
        n1w=1.0 + f(ks[0], (1, D)),  n1b=f(ks[1], (1, D)),      # nn.LayerNorm(in_dim)
        rpw=f(ks[2], (D, D2)),       rpb=f(ks[3], (1, D2)),     # Conv2d(D, 2D, 1) as matmul
        anw=1.0 + f(ks[4], (1, D2)), anb=f(ks[5], (1, D2)),     # attn LayerNorm(2D)
        n2w=1.0 + f(ks[6], (1, D2)), n2b=f(ks[7], (1, D2)),     # nn.LayerNorm(2D)
        fc1w=f(ks[8], (D2, D4)),     fc1b=f(ks[9], (1, D4)),    # Linear(2D, 4D)
        dww33=f(ks[10], (3, 3, D4)), dwb=f(ks[11], (1, D4)),    # depthwise Conv2d(4D,4D,3)
        fc2w=f(ks[12], (D4, D2)),    fc2b=f(ks[13], (1, D2)),   # Linear(4D, 2D)
    )
    p["dww"] = p["dww33"].reshape(9, D4)   # tap-major (ky*3+kx, channel)
    return p


# ---------------------------------------------------------------------------
# pure-JAX reference (mirrors the PyTorch forward) for verification
# ---------------------------------------------------------------------------
def reference(x1_img, x2_img, params, head_count=1):
    B, D, H, W = x1_img.shape
    N, D2, D4 = H * W, 2 * D, 4 * D
    hk = hv = D // head_count
    x1 = jnp.transpose(x1_img.reshape(B, D, N), (0, 2, 1))
    x2 = jnp.transpose(x2_img.reshape(B, D, N), (0, 2, 1))
    ln = lambda x, w, b: (x - x.mean(-1, keepdims=True)) / jnp.sqrt(
        x.var(-1, keepdims=True) + 1e-5) * w + b
    n1 = ln(x1, params["n1w"], params["n1b"])
    n2 = ln(x2, params["n1w"], params["n1b"])
    heads = []
    for i in range(head_count):     # per-head-slice softmax, matching PyTorch
        kq = n2[:, :, i * hk:(i + 1) * hk]
        v = n1[:, :, i * hv:(i + 1) * hv]
        kk = jax.nn.softmax(kq, axis=1)                 # softmax over tokens
        qq = jax.nn.softmax(kq, axis=2)                 # softmax over head channels
        ctx = jnp.einsum('bnk,bnv->bkv', kk, v)
        heads.append(jnp.einsum('bnk,bkv->bnv', qq, ctx))
    att = jnp.concatenate(heads, axis=-1)
    reproj = att @ params["rpw"] + params["rpb"]
    attn_out = ln(reproj, params["anw"], params["anb"])
    tx = jnp.concatenate([x1, x2], axis=-1) + attn_out
    ntx = ln(tx, params["n2w"], params["n2b"])
    h = ntx @ params["fc1w"] + params["fc1b"]
    hs = jnp.transpose(h, (0, 2, 1)).reshape(B, D4, H, W)
    wk = jnp.transpose(params["dww33"], (2, 0, 1))[:, None, :, :]   # (C, 1, 3, 3)
    conv = lax.conv_general_dilated(hs, wk, (1, 1), ((1, 1), (1, 1)),
                                    feature_group_count=D4,
                                    dimension_numbers=('NCHW', 'OIHW', 'NCHW'))
    conv = conv + params["dwb"].reshape(1, D4, 1, 1)
    cseq = jnp.transpose(conv.reshape(B, D4, N), (0, 2, 1))
    g = 0.5 * cseq * (1.0 + lax.erf(cseq / np.float32(math.sqrt(2.0))))
    out = g @ params["fc2w"] + params["fc2b"]
    mx = tx + out
    return jnp.transpose(mx, (0, 2, 1)).reshape(B, D2, H, W)


if __name__ == "__main__":
    B, D, H, W = 2, 32, 8, 8          # in_dim = key_dim = value_dim = 32, N = 64
    key = jax.random.PRNGKey(0)
    k1, k2, kp = jax.random.split(key, 3)
    x1 = jax.random.normal(k1, (B, D, H, W), jnp.float32)
    x2 = jax.random.normal(k2, (B, D, H, W), jnp.float32)
    params = init_params(kp, D)

    out = cross_attention_block(x1, x2, params, head_count=1)
    out = jax.block_until_ready(out)
    assert out.shape == (B, 2 * D, H, W)

    ref = reference(x1, x2, params, head_count=1)
    diff = np.asarray(out) - np.asarray(ref)
    max_err = float(np.max(np.abs(diff)))
    rel_l2 = float(np.linalg.norm(diff) / np.linalg.norm(np.asarray(ref)))
    # bf16 MXU operands (f32 accumulation) + approx softmax reciprocal give
    # ~1e-2..5e-2 abs error at these activation scales vs the f32 reference.
    assert np.isfinite(max_err) and max_err < 2e-1, f"max abs err {max_err}"
    assert rel_l2 < 5e-2, f"relative L2 err {rel_l2}"
    print("KERNEL_OK")
</pallas_src>

<mosaic_0001>
module attributes {stable_mosaic.version = 11 : i64} {
  func.func @_cab_kernel(%arg0: i32, %arg1: memref<2x32x64xf32, #tpu.memory_space<vmem>>, %arg2: memref<2x32x64xf32, #tpu.memory_space<vmem>>, %arg3: memref<1x32xf32, #tpu.memory_space<vmem>>, %arg4: memref<1x32xf32, #tpu.memory_space<vmem>>, %arg5: memref<32x64xbf16, #tpu.memory_space<vmem>>, %arg6: memref<1x64xf32, #tpu.memory_space<vmem>>, %arg7: memref<1x64xf32, #tpu.memory_space<vmem>>, %arg8: memref<1x64xf32, #tpu.memory_space<vmem>>, %arg9: memref<1x64xf32, #tpu.memory_space<vmem>>, %arg10: memref<1x64xf32, #tpu.memory_space<vmem>>, %arg11: memref<64x128xbf16, #tpu.memory_space<vmem>>, %arg12: memref<1x128xf32, #tpu.memory_space<vmem>>, %arg13: memref<9x128xf32, #tpu.memory_space<vmem>>, %arg14: memref<1x128xf32, #tpu.memory_space<vmem>>, %arg15: memref<128x64xbf16, #tpu.memory_space<vmem>>, %arg16: memref<1x64xf32, #tpu.memory_space<vmem>>, %arg17: memref<2x64x64xf32, #tpu.memory_space<vmem>>) attributes {dimension_semantics = [#tpu.dimension_semantics<parallel>], iteration_bounds = array<i64: 1>, scalar_prefetch = 0 : i64, scratch_operands = 0 : i64, tpu.core_type = #tpu.core_type<tc>, window_params = [{transform_indices = @transform_0, window_bounds = array<i64: 2, 32, 64>}, {transform_indices = @transform_1, window_bounds = array<i64: 2, 32, 64>}, {pipeline_mode = #tpu.pipeline_mode<synchronous>, transform_indices = @transform_2, window_bounds = array<i64: 1, 32>}, {pipeline_mode = #tpu.pipeline_mode<synchronous>, transform_indices = @transform_3, window_bounds = array<i64: 1, 32>}, {pipeline_mode = #tpu.pipeline_mode<synchronous>, transform_indices = @transform_4, window_bounds = array<i64: 32, 64>}, {pipeline_mode = #tpu.pipeline_mode<synchronous>, transform_indices = @transform_5, window_bounds = array<i64: 1, 64>}, {pipeline_mode = #tpu.pipeline_mode<synchronous>, transform_indices = @transform_6, window_bounds = array<i64: 1, 64>}, {pipeline_mode = #tpu.pipeline_mode<synchronous>, transform_indices = @transform_7, window_bounds = array<i64: 1, 64>}, {pipeline_mode = #tpu.pipeline_mode<synchronous>, transform_indices = @transform_8, window_bounds = array<i64: 1, 64>}, {pipeline_mode = #tpu.pipeline_mode<synchronous>, transform_indices = @transform_9, window_bounds = array<i64: 1, 64>}, {pipeline_mode = #tpu.pipeline_mode<synchronous>, transform_indices = @transform_10, window_bounds = array<i64: 64, 128>}, {pipeline_mode = #tpu.pipeline_mode<synchronous>, transform_indices = @transform_11, window_bounds = array<i64: 1, 128>}, {pipeline_mode = #tpu.pipeline_mode<synchronous>, transform_indices = @transform_12, window_bounds = array<i64: 9, 128>}, {pipeline_mode = #tpu.pipeline_mode<synchronous>, transform_indices = @transform_13, window_bounds = array<i64: 1, 128>}, {pipeline_mode = #tpu.pipeline_mode<synchronous>, transform_indices = @transform_14, window_bounds = array<i64: 128, 64>}, {pipeline_mode = #tpu.pipeline_mode<synchronous>, transform_indices = @transform_15, window_bounds = array<i64: 1, 64>}, {transform_indices = @transform_16, window_bounds = array<i64: 2, 64, 64>}]} {
    %c0 = arith.constant 0 : index
    %c0_0 = arith.constant 0 : index
    %c0_1 = arith.constant 0 : index
    %0 = vector.load %arg1[%c0, %c0_0, %c0_1] : memref<2x32x64xf32, #tpu.memory_space<vmem>>, vector<1x32x64xf32>
    %1 = vector.shape_cast %0 : vector<1x32x64xf32> to vector<32x64xf32>
    %2 = tpu.transpose %1, [1, 0] : vector<32x64xf32> -> vector<64x32xf32>
    %c1 = arith.constant 1 : index
    %c0_2 = arith.constant 0 : index
    %c0_3 = arith.constant 0 : index
    %3 = vector.load %arg1[%c1, %c0_2, %c0_3] : memref<2x32x64xf32, #tpu.memory_space<vmem>>, vector<1x32x64xf32>
    %4 = vector.shape_cast %3 : vector<1x32x64xf32> to vector<32x64xf32>
    %5 = tpu.transpose %4, [1, 0] : vector<32x64xf32> -> vector<64x32xf32>
    %6 = tpu.concatenate %2, %5 in 0 : vector<64x32xf32>, vector<64x32xf32> -> vector<128x32xf32>
    %c0_4 = arith.constant 0 : index
    %c0_5 = arith.constant 0 : index
    %c0_6 = arith.constant 0 : index
    %7 = vector.load %arg2[%c0_4, %c0_5, %c0_6] : memref<2x32x64xf32, #tpu.memory_space<vmem>>, vector<1x32x64xf32>
    %8 = vector.shape_cast %7 : vector<1x32x64xf32> to vector<32x64xf32>
    %9 = tpu.transpose %8, [1, 0] : vector<32x64xf32> -> vector<64x32xf32>
    %c1_7 = arith.constant 1 : index
    %c0_8 = arith.constant 0 : index
    %c0_9 = arith.constant 0 : index
    %10 = vector.load %arg2[%c1_7, %c0_8, %c0_9] : memref<2x32x64xf32, #tpu.memory_space<vmem>>, vector<1x32x64xf32>
    %11 = vector.shape_cast %10 : vector<1x32x64xf32> to vector<32x64xf32>
    %12 = tpu.transpose %11, [1, 0] : vector<32x64xf32> -> vector<64x32xf32>
    %13 = tpu.concatenate %9, %12 in 0 : vector<64x32xf32>, vector<64x32xf32> -> vector<128x32xf32>
    %c0_10 = arith.constant 0 : index
    %c0_11 = arith.constant 0 : index
    %14 = vector.load %arg3[%c0_10, %c0_11] : memref<1x32xf32, #tpu.memory_space<vmem>>, vector<1x32xf32>
    %c0_12 = arith.constant 0 : index
    %c0_13 = arith.constant 0 : index
    %15 = vector.load %arg4[%c0_12, %c0_13] : memref<1x32xf32, #tpu.memory_space<vmem>>, vector<1x32xf32>
    %cst = arith.constant dense<0.000000e+00> : vector<128xf32>
    %16 = vector.multi_reduction <add>, %6, %cst [1] : vector<128x32xf32> to vector<128xf32>
    %17 = vector.shape_cast %16 : vector<128xf32> to vector<128x1xf32>
    %cst_14 = arith.constant 3.200000e+01 : f32
    %18 = vector.broadcast %cst_14 : f32 to vector<128x1xf32>
    %19 = arith.divf %17, %18 : vector<128x1xf32>
    %20 = vector.broadcast %19 : vector<128x1xf32> to vector<128x32xf32>
    %21 = arith.subf %6, %20 : vector<128x32xf32>
    %22 = arith.mulf %21, %21 : vector<128x32xf32>
    %cst_15 = arith.constant dense<0.000000e+00> : vector<128xf32>
    %23 = vector.multi_reduction <add>, %22, %cst_15 [1] : vector<128x32xf32> to vector<128xf32>
    %24 = vector.shape_cast %23 : vector<128xf32> to vector<128x1xf32>
    %cst_16 = arith.constant 3.200000e+01 : f32
    %25 = vector.broadcast %cst_16 : f32 to vector<128x1xf32>
    %26 = arith.divf %24, %25 : vector<128x1xf32>
    %27 = vector.broadcast %19 : vector<128x1xf32> to vector<128x32xf32>
    %28 = arith.subf %6, %27 : vector<128x32xf32>
    %cst_17 = arith.constant 9.99999974E-6 : f32
    %29 = vector.broadcast %cst_17 : f32 to vector<128x1xf32>
    %30 = arith.addf %26, %29 : vector<128x1xf32>
    %31 = math.rsqrt %30 : vector<128x1xf32>
    %32 = vector.broadcast %31 : vector<128x1xf32> to vector<128x32xf32>
    %33 = arith.mulf %28, %32 : vector<128x32xf32>
    %34 = vector.broadcast %14 : vector<1x32xf32> to vector<128x32xf32>
    %35 = arith.mulf %33, %34 : vector<128x32xf32>
    %36 = vector.broadcast %15 : vector<1x32xf32> to vector<128x32xf32>
    %37 = arith.addf %35, %36 : vector<128x32xf32>
    %cst_18 = arith.constant dense<0.000000e+00> : vector<128xf32>
    %38 = vector.multi_reduction <add>, %13, %cst_18 [1] : vector<128x32xf32> to vector<128xf32>
    %39 = vector.shape_cast %38 : vector<128xf32> to vector<128x1xf32>
    %cst_19 = arith.constant 3.200000e+01 : f32
    %40 = vector.broadcast %cst_19 : f32 to vector<128x1xf32>
    %41 = arith.divf %39, %40 : vector<128x1xf32>
    %42 = vector.broadcast %41 : vector<128x1xf32> to vector<128x32xf32>
    %43 = arith.subf %13, %42 : vector<128x32xf32>
    %44 = arith.mulf %43, %43 : vector<128x32xf32>
    %cst_20 = arith.constant dense<0.000000e+00> : vector<128xf32>
    %45 = vector.multi_reduction <add>, %44, %cst_20 [1] : vector<128x32xf32> to vector<128xf32>
    %46 = vector.shape_cast %45 : vector<128xf32> to vector<128x1xf32>
    %cst_21 = arith.constant 3.200000e+01 : f32
    %47 = vector.broadcast %cst_21 : f32 to vector<128x1xf32>
    %48 = arith.divf %46, %47 : vector<128x1xf32>
    %49 = vector.broadcast %41 : vector<128x1xf32> to vector<128x32xf32>
    %50 = arith.subf %13, %49 : vector<128x32xf32>
    %cst_22 = arith.constant 9.99999974E-6 : f32
    %51 = vector.broadcast %cst_22 : f32 to vector<128x1xf32>
    %52 = arith.addf %48, %51 : vector<128x1xf32>
    %53 = math.rsqrt %52 : vector<128x1xf32>
    %54 = vector.broadcast %53 : vector<128x1xf32> to vector<128x32xf32>
    %55 = arith.mulf %50, %54 : vector<128x32xf32>
    %56 = vector.broadcast %14 : vector<1x32xf32> to vector<128x32xf32>
    %57 = arith.mulf %55, %56 : vector<128x32xf32>
    %58 = vector.broadcast %15 : vector<1x32xf32> to vector<128x32xf32>
    %59 = arith.addf %57, %58 : vector<128x32xf32>
    %60 = vector.extract_strided_slice %37 {offsets = [0, 0], sizes = [64, 32], strides = [1, 1]} : vector<128x32xf32> to vector<64x32xf32>
    %61 = vector.extract_strided_slice %59 {offsets = [0, 0], sizes = [64, 32], strides = [1, 1]} : vector<128x32xf32> to vector<64x32xf32>
    %62 = arith.truncf %60 : vector<64x32xf32> to vector<64x32xbf16>
    %cst_23 = arith.constant dense<0xFF800000> : vector<32xf32>
    %63 = vector.multi_reduction <maximumf>, %61, %cst_23 [0] : vector<64x32xf32> to vector<32xf32>
    %64 = vector.shape_cast %63 : vector<32xf32> to vector<1x32xf32>
    %65 = vector.broadcast %64 : vector<1x32xf32> to vector<64x32xf32>
    %66 = arith.subf %61, %65 : vector<64x32xf32>
    %67 = math.exp %66 : vector<64x32xf32>
    %cst_24 = arith.constant dense<0.000000e+00> : vector<32xf32>
    %68 = vector.multi_reduction <add>, %67, %cst_24 [0] : vector<64x32xf32> to vector<32xf32>
    %69 = vector.shape_cast %68 : vector<32xf32> to vector<1x32xf32>
    %70 = tpu.reciprocal %69 {approx = true} : vector<1x32xf32> -> vector<1x32xf32>
    %71 = vector.broadcast %70 : vector<1x32xf32> to vector<64x32xf32>
    %72 = arith.mulf %67, %71 : vector<64x32xf32>
    %73 = arith.truncf %72 : vector<64x32xf32> to vector<64x32xbf16>
    %cst_25 = arith.constant dense<0xFF800000> : vector<64xf32>
    %74 = vector.multi_reduction <maximumf>, %61, %cst_25 [1] : vector<64x32xf32> to vector<64xf32>
    %75 = vector.shape_cast %74 : vector<64xf32> to vector<64x1xf32>
    %76 = vector.broadcast %75 : vector<64x1xf32> to vector<64x32xf32>
    %77 = arith.subf %61, %76 : vector<64x32xf32>
    %78 = math.exp %77 : vector<64x32xf32>
    %cst_26 = arith.constant dense<0.000000e+00> : vector<64xf32>
    %79 = vector.multi_reduction <add>, %78, %cst_26 [1] : vector<64x32xf32> to vector<64xf32>
    %80 = vector.shape_cast %79 : vector<64xf32> to vector<64x1xf32>
    %81 = tpu.reciprocal %80 {approx = true} : vector<64x1xf32> -> vector<64x1xf32>
    %82 = vector.broadcast %81 : vector<64x1xf32> to vector<64x32xf32>
    %83 = arith.mulf %78, %82 : vector<64x32xf32>
    %84 = arith.truncf %83 : vector<64x32xf32> to vector<64x32xbf16>
    %cst_27 = arith.constant dense<0.000000e+00> : vector<32x32xf32>
    %85 = tpu.matmul %73, %62, %cst_27 {dimension_numbers = #tpu.dot_dimension_numbers<[0], [0], [1], [1], [0, 1, 1, 1], [], []>} : vector<64x32xbf16>, vector<64x32xbf16>, vector<32x32xf32> -> vector<32x32xf32>
    %86 = arith.truncf %85 : vector<32x32xf32> to vector<32x32xbf16>
    %cst_28 = arith.constant dense<0.000000e+00> : vector<64x32xf32>
    %87 = tpu.matmul %84, %86, %cst_28 {dimension_numbers = #tpu.dot_dimension_numbers<[1], [0], [0], [1], [0, 0, 1, 1], [], []>} : vector<64x32xbf16>, vector<32x32xbf16>, vector<64x32xf32> -> vector<64x32xf32>
    %88 = vector.extract_strided_slice %37 {offsets = [64, 0], sizes = [64, 32], strides = [1, 1]} : vector<128x32xf32> to vector<64x32xf32>
    %89 = vector.extract_strided_slice %59 {offsets = [64, 0], sizes = [64, 32], strides = [1, 1]} : vector<128x32xf32> to vector<64x32xf32>
    %90 = arith.truncf %88 : vector<64x32xf32> to vector<64x32xbf16>
    %cst_29 = arith.constant dense<0xFF800000> : vector<32xf32>
    %91 = vector.multi_reduction <maximumf>, %89, %cst_29 [0] : vector<64x32xf32> to vector<32xf32>
    %92 = vector.shape_cast %91 : vector<32xf32> to vector<1x32xf32>
    %93 = vector.broadcast %92 : vector<1x32xf32> to vector<64x32xf32>
    %94 = arith.subf %89, %93 : vector<64x32xf32>
    %95 = math.exp %94 : vector<64x32xf32>
    %cst_30 = arith.constant dense<0.000000e+00> : vector<32xf32>
    %96 = vector.multi_reduction <add>, %95, %cst_30 [0] : vector<64x32xf32> to vector<32xf32>
    %97 = vector.shape_cast %96 : vector<32xf32> to vector<1x32xf32>
    %98 = tpu.reciprocal %97 {approx = true} : vector<1x32xf32> -> vector<1x32xf32>
    %99 = vector.broadcast %98 : vector<1x32xf32> to vector<64x32xf32>
    %100 = arith.mulf %95, %99 : vector<64x32xf32>
    %101 = arith.truncf %100 : vector<64x32xf32> to vector<64x32xbf16>
    %cst_31 = arith.constant dense<0xFF800000> : vector<64xf32>
    %102 = vector.multi_reduction <maximumf>, %89, %cst_31 [1] : vector<64x32xf32> to vector<64xf32>
    %103 = vector.shape_cast %102 : vector<64xf32> to vector<64x1xf32>
    %104 = vector.broadcast %103 : vector<64x1xf32> to vector<64x32xf32>
    %105 = arith.subf %89, %104 : vector<64x32xf32>
    %106 = math.exp %105 : vector<64x32xf32>
    %cst_32 = arith.constant dense<0.000000e+00> : vector<64xf32>
    %107 = vector.multi_reduction <add>, %106, %cst_32 [1] : vector<64x32xf32> to vector<64xf32>
    %108 = vector.shape_cast %107 : vector<64xf32> to vector<64x1xf32>
    %109 = tpu.reciprocal %108 {approx = true} : vector<64x1xf32> -> vector<64x1xf32>
    %110 = vector.broadcast %109 : vector<64x1xf32> to vector<64x32xf32>
    %111 = arith.mulf %106, %110 : vector<64x32xf32>
    %112 = arith.truncf %111 : vector<64x32xf32> to vector<64x32xbf16>
    %cst_33 = arith.constant dense<0.000000e+00> : vector<32x32xf32>
    %113 = tpu.matmul %101, %90, %cst_33 {dimension_numbers = #tpu.dot_dimension_numbers<[0], [0], [1], [1], [0, 1, 1, 1], [], []>} : vector<64x32xbf16>, vector<64x32xbf16>, vector<32x32xf32> -> vector<32x32xf32>
    %114 = arith.truncf %113 : vector<32x32xf32> to vector<32x32xbf16>
    %cst_34 = arith.constant dense<0.000000e+00> : vector<64x32xf32>
    %115 = tpu.matmul %112, %114, %cst_34 {dimension_numbers = #tpu.dot_dimension_numbers<[1], [0], [0], [1], [0, 0, 1, 1], [], []>} : vector<64x32xbf16>, vector<32x32xbf16>, vector<64x32xf32> -> vector<64x32xf32>
    %116 = tpu.concatenate %87, %115 in 0 : vector<64x32xf32>, vector<64x32xf32> -> vector<128x32xf32>
    %117 = arith.truncf %116 : vector<128x32xf32> to vector<128x32xbf16>
    %c0_35 = arith.constant 0 : index
    %c0_36 = arith.constant 0 : index
    %118 = vector.load %arg5[%c0_35, %c0_36] : memref<32x64xbf16, #tpu.memory_space<vmem>>, vector<32x64xbf16>
    %cst_37 = arith.constant dense<0.000000e+00> : vector<128x64xf32>
    %119 = tpu.matmul %117, %118, %cst_37 {dimension_numbers = #tpu.dot_dimension_numbers<[1], [0], [0], [1], [0, 0, 1, 1], [], []>} : vector<128x32xbf16>, vector<32x64xbf16>, vector<128x64xf32> -> vector<128x64xf32>
    %c0_38 = arith.constant 0 : index
    %c0_39 = arith.constant 0 : index
    %120 = vector.load %arg6[%c0_38, %c0_39] : memref<1x64xf32, #tpu.memory_space<vmem>>, vector<1x64xf32>
    %121 = vector.broadcast %120 : vector<1x64xf32> to vector<128x64xf32>
    %122 = arith.addf %119, %121 : vector<128x64xf32>
    %c0_40 = arith.constant 0 : index
    %c0_41 = arith.constant 0 : index
    %123 = vector.load %arg7[%c0_40, %c0_41] : memref<1x64xf32, #tpu.memory_space<vmem>>, vector<1x64xf32>
    %c0_42 = arith.constant 0 : index
    %c0_43 = arith.constant 0 : index
    %124 = vector.load %arg8[%c0_42, %c0_43] : memref<1x64xf32, #tpu.memory_space<vmem>>, vector<1x64xf32>
    %cst_44 = arith.constant dense<0.000000e+00> : vector<128xf32>
    %125 = vector.multi_reduction <add>, %122, %cst_44 [1] : vector<128x64xf32> to vector<128xf32>
    %126 = vector.shape_cast %125 : vector<128xf32> to vector<128x1xf32>
    %cst_45 = arith.constant 6.400000e+01 : f32
    %127 = vector.broadcast %cst_45 : f32 to vector<128x1xf32>
    %128 = arith.divf %126, %127 : vector<128x1xf32>
    %129 = vector.broadcast %128 : vector<128x1xf32> to vector<128x64xf32>
    %130 = arith.subf %122, %129 : vector<128x64xf32>
    %131 = arith.mulf %130, %130 : vector<128x64xf32>
    %cst_46 = arith.constant dense<0.000000e+00> : vector<128xf32>
    %132 = vector.multi_reduction <add>, %131, %cst_46 [1] : vector<128x64xf32> to vector<128xf32>
    %133 = vector.shape_cast %132 : vector<128xf32> to vector<128x1xf32>
    %cst_47 = arith.constant 6.400000e+01 : f32
    %134 = vector.broadcast %cst_47 : f32 to vector<128x1xf32>
    %135 = arith.divf %133, %134 : vector<128x1xf32>
    %136 = vector.broadcast %128 : vector<128x1xf32> to vector<128x64xf32>
    %137 = arith.subf %122, %136 : vector<128x64xf32>
    %cst_48 = arith.constant 9.99999974E-6 : f32
    %138 = vector.broadcast %cst_48 : f32 to vector<128x1xf32>
    %139 = arith.addf %135, %138 : vector<128x1xf32>
    %140 = math.rsqrt %139 : vector<128x1xf32>
    %141 = vector.broadcast %140 : vector<128x1xf32> to vector<128x64xf32>
    %142 = arith.mulf %137, %141 : vector<128x64xf32>
    %143 = vector.broadcast %123 : vector<1x64xf32> to vector<128x64xf32>
    %144 = arith.mulf %142, %143 : vector<128x64xf32>
    %145 = vector.broadcast %124 : vector<1x64xf32> to vector<128x64xf32>
    %146 = arith.addf %144, %145 : vector<128x64xf32>
    %147 = tpu.concatenate %6, %13 in 1 : vector<128x32xf32>, vector<128x32xf32> -> vector<128x64xf32>
    %148 = arith.addf %147, %146 : vector<128x64xf32>
    %c0_49 = arith.constant 0 : index
    %c0_50 = arith.constant 0 : index
    %149 = vector.load %arg9[%c0_49, %c0_50] : memref<1x64xf32, #tpu.memory_space<vmem>>, vector<1x64xf32>
    %c0_51 = arith.constant 0 : index
    %c0_52 = arith.constant 0 : index
    %150 = vector.load %arg10[%c0_51, %c0_52] : memref<1x64xf32, #tpu.memory_space<vmem>>, vector<1x64xf32>
    %cst_53 = arith.constant dense<0.000000e+00> : vector<128xf32>
    %151 = vector.multi_reduction <add>, %148, %cst_53 [1] : vector<128x64xf32> to vector<128xf32>
    %152 = vector.shape_cast %151 : vector<128xf32> to vector<128x1xf32>
    %cst_54 = arith.constant 6.400000e+01 : f32
    %153 = vector.broadcast %cst_54 : f32 to vector<128x1xf32>
    %154 = arith.divf %152, %153 : vector<128x1xf32>
    %155 = vector.broadcast %154 : vector<128x1xf32> to vector<128x64xf32>
    %156 = arith.subf %148, %155 : vector<128x64xf32>
    %157 = arith.mulf %156, %156 : vector<128x64xf32>
    %cst_55 = arith.constant dense<0.000000e+00> : vector<128xf32>
    %158 = vector.multi_reduction <add>, %157, %cst_55 [1] : vector<128x64xf32> to vector<128xf32>
    %159 = vector.shape_cast %158 : vector<128xf32> to vector<128x1xf32>
    %cst_56 = arith.constant 6.400000e+01 : f32
    %160 = vector.broadcast %cst_56 : f32 to vector<128x1xf32>
    %161 = arith.divf %159, %160 : vector<128x1xf32>
    %162 = vector.broadcast %154 : vector<128x1xf32> to vector<128x64xf32>
    %163 = arith.subf %148, %162 : vector<128x64xf32>
    %cst_57 = arith.constant 9.99999974E-6 : f32
    %164 = vector.broadcast %cst_57 : f32 to vector<128x1xf32>
    %165 = arith.addf %161, %164 : vector<128x1xf32>
    %166 = math.rsqrt %165 : vector<128x1xf32>
    %167 = vector.broadcast %166 : vector<128x1xf32> to vector<128x64xf32>
    %168 = arith.mulf %163, %167 : vector<128x64xf32>
    %169 = vector.broadcast %149 : vector<1x64xf32> to vector<128x64xf32>
    %170 = arith.mulf %168, %169 : vector<128x64xf32>
    %171 = vector.broadcast %150 : vector<1x64xf32> to vector<128x64xf32>
    %172 = arith.addf %170, %171 : vector<128x64xf32>
    %173 = arith.truncf %172 : vector<128x64xf32> to vector<128x64xbf16>
    %c0_58 = arith.constant 0 : index
    %c0_59 = arith.constant 0 : index
    %174 = vector.load %arg11[%c0_58, %c0_59] : memref<64x128xbf16, #tpu.memory_space<vmem>>, vector<64x128xbf16>
    %cst_60 = arith.constant dense<0.000000e+00> : vector<128x128xf32>
    %175 = tpu.matmul %173, %174, %cst_60 {dimension_numbers = #tpu.dot_dimension_numbers<[1], [0], [0], [1], [0, 0, 1, 1], [], []>} : vector<128x64xbf16>, vector<64x128xbf16>, vector<128x128xf32> -> vector<128x128xf32>
    %c0_61 = arith.constant 0 : index
    %c0_62 = arith.constant 0 : index
    %176 = vector.load %arg12[%c0_61, %c0_62] : memref<1x128xf32, #tpu.memory_space<vmem>>, vector<1x128xf32>
    %177 = vector.broadcast %176 : vector<1x128xf32> to vector<128x128xf32>
    %178 = arith.addf %175, %177 : vector<128x128xf32>
    %179 = tpu.iota {dimensions = array<i32: 0>} : vector<128x1xi32>
    %c64_i32 = arith.constant 64 : i32
    %c0_i32 = arith.constant 0 : i32
    %180 = arith.cmpi eq, %c64_i32, %c0_i32 : i32
    %c1_i32 = arith.constant 1 : i32
    %181 = arith.select %180, %c1_i32, %c64_i32 : i32
    %182 = vector.broadcast %181 : i32 to vector<128x1xi32>
    %183 = arith.remsi %179, %182 : vector<128x1xi32>
    %c0_i32_63 = arith.constant 0 : i32
    %184 = vector.broadcast %c0_i32_63 : i32 to vector<128x1xi32>
    %185 = arith.cmpi ne, %183, %184 : vector<128x1xi32>
    %c0_i32_64 = arith.constant 0 : i32
    %186 = vector.broadcast %c0_i32_64 : i32 to vector<128x1xi32>
    %187 = arith.cmpi slt, %183, %186 : vector<128x1xi32>
    %c0_i32_65 = arith.constant 0 : i32
    %188 = arith.cmpi slt, %181, %c0_i32_65 : i32
    %189 = vector.broadcast %188 : i1 to vector<128x1xi1>
    %190 = vector.broadcast %189 : vector<128x1xi1> to vector<128x1xi1>
    %191 = arith.xori %187, %190 : vector<128x1xi1>
    %192 = arith.andi %191, %185 : vector<128x1xi1>
    %193 = vector.broadcast %181 : i32 to vector<128x1xi32>
    %194 = arith.addi %183, %193 : vector<128x1xi32>
    %195 = arith.select %192, %194, %183 : vector<128x1xi1>, vector<128x1xi32>
    %c8_i32 = arith.constant 8 : i32
    %c0_i32_66 = arith.constant 0 : i32
    %196 = arith.cmpi eq, %c8_i32, %c0_i32_66 : i32
    %c1_i32_67 = arith.constant 1 : i32
    %197 = arith.select %196, %c1_i32_67, %c8_i32 : i32
    %198 = vector.broadcast %197 : i32 to vector<128x1xi32>
    %199 = arith.remsi %179, %198 : vector<128x1xi32>
    %c0_i32_68 = arith.constant 0 : i32
    %200 = vector.broadcast %c0_i32_68 : i32 to vector<128x1xi32>
    %201 = arith.cmpi ne, %199, %200 : vector<128x1xi32>
    %c0_i32_69 = arith.constant 0 : i32
    %202 = vector.broadcast %c0_i32_69 : i32 to vector<128x1xi32>
    %203 = arith.cmpi slt, %199, %202 : vector<128x1xi32>
    %c0_i32_70 = arith.constant 0 : i32
    %204 = arith.cmpi slt, %197, %c0_i32_70 : i32
    %205 = vector.broadcast %204 : i1 to vector<128x1xi1>
    %206 = vector.broadcast %205 : vector<128x1xi1> to vector<128x1xi1>
    %207 = arith.xori %203, %206 : vector<128x1xi1>
    %208 = arith.andi %207, %201 : vector<128x1xi1>
    %209 = vector.broadcast %197 : i32 to vector<128x1xi32>
    %210 = arith.addi %199, %209 : vector<128x1xi32>
    %211 = arith.select %208, %210, %199 : vector<128x1xi1>, vector<128x1xi32>
    %c1_i32_71 = arith.constant 1 : i32
    %212 = vector.broadcast %c1_i32_71 : i32 to vector<128x1xi32>
    %213 = arith.cmpi sge, %211, %212 : vector<128x1xi32>
    %214 = arith.extui %213 : vector<128x1xi1> to vector<128x1xi32>
    %215 = arith.sitofp %214 : vector<128x1xi32> to vector<128x1xf32>
    %c6_i32 = arith.constant 6 : i32
    %216 = vector.broadcast %c6_i32 : i32 to vector<128x1xi32>
    %217 = arith.cmpi sle, %211, %216 : vector<128x1xi32>
    %218 = arith.extui %217 : vector<128x1xi1> to vector<128x1xi32>
    %219 = arith.sitofp %218 : vector<128x1xi32> to vector<128x1xf32>
    %c8_i32_72 = arith.constant 8 : i32
    %220 = vector.broadcast %c8_i32_72 : i32 to vector<128x1xi32>
    %221 = arith.cmpi sge, %195, %220 : vector<128x1xi32>
    %cst_73 = arith.constant 0.000000e+00 : f32
    %222 = vector.shape_cast %221 : vector<128x1xi1> to vector<128x1xi1>
    %223 = vector.broadcast %222 : vector<128x1xi1> to vector<128x128xi1>
    %224 = vector.broadcast %cst_73 : f32 to vector<128x128xf32>
    %225 = arith.select %223, %178, %224 : vector<128x128xi1>, vector<128x128xf32>
    %c56_i32 = arith.constant 56 : i32
    %226 = vector.broadcast %c56_i32 : i32 to vector<128x1xi32>
    %227 = arith.cmpi slt, %195, %226 : vector<128x1xi32>
    %cst_74 = arith.constant 0.000000e+00 : f32
    %228 = vector.shape_cast %227 : vector<128x1xi1> to vector<128x1xi1>
    %229 = vector.broadcast %228 : vector<128x1xi1> to vector<128x128xi1>
    %230 = vector.broadcast %cst_74 : f32 to vector<128x128xf32>
    %231 = arith.select %229, %178, %230 : vector<128x128xi1>, vector<128x128xf32>
    %c0_75 = arith.constant 0 : index
    %c0_76 = arith.constant 0 : index
    %232 = vector.load %arg13[%c0_75, %c0_76] : memref<9x128xf32, #tpu.memory_space<vmem>>, vector<9x128xf32>
    %233 = vector.extract_strided_slice %232 {offsets = [0, 0], sizes = [1, 128], strides = [1, 1]} : vector<9x128xf32> to vector<1x128xf32>
    %c9_i32 = arith.constant 9 : i32
    %234 = tpu.dynamic_rotate %231 by %c9_i32 dim 0 : vector<128x128xf32>, i32 -> vector<128x128xf32>
    %235 = vector.broadcast %233 : vector<1x128xf32> to vector<128x128xf32>
    %236 = arith.mulf %235, %234 : vector<128x128xf32>
    %237 = vector.extract_strided_slice %232 {offsets = [3, 0], sizes = [1, 128], strides = [1, 1]} : vector<9x128xf32> to vector<1x128xf32>
    %c1_i32_77 = arith.constant 1 : i32
    %238 = tpu.dynamic_rotate %178 by %c1_i32_77 dim 0 : vector<128x128xf32>, i32 -> vector<128x128xf32>
    %239 = vector.broadcast %237 : vector<1x128xf32> to vector<128x128xf32>
    %240 = arith.mulf %239, %238 : vector<128x128xf32>
    %241 = arith.addf %236, %240 : vector<128x128xf32>
    %242 = vector.extract_strided_slice %232 {offsets = [6, 0], sizes = [1, 128], strides = [1, 1]} : vector<9x128xf32> to vector<1x128xf32>
    %c121_i32 = arith.constant 121 : i32
    %243 = tpu.dynamic_rotate %225 by %c121_i32 dim 0 : vector<128x128xf32>, i32 -> vector<128x128xf32>
    %244 = vector.broadcast %242 : vector<1x128xf32> to vector<128x128xf32>
    %245 = arith.mulf %244, %243 : vector<128x128xf32>
    %246 = arith.addf %241, %245 : vector<128x128xf32>
    %247 = vector.extract_strided_slice %232 {offsets = [1, 0], sizes = [1, 128], strides = [1, 1]} : vector<9x128xf32> to vector<1x128xf32>
    %c8_i32_78 = arith.constant 8 : i32
    %248 = tpu.dynamic_rotate %231 by %c8_i32_78 dim 0 : vector<128x128xf32>, i32 -> vector<128x128xf32>
    %249 = vector.broadcast %247 : vector<1x128xf32> to vector<128x128xf32>
    %250 = arith.mulf %249, %248 : vector<128x128xf32>
    %251 = vector.extract_strided_slice %232 {offsets = [4, 0], sizes = [1, 128], strides = [1, 1]} : vector<9x128xf32> to vector<1x128xf32>
    %252 = vector.broadcast %251 : vector<1x128xf32> to vector<128x128xf32>
    %253 = arith.mulf %252, %178 : vector<128x128xf32>
    %254 = arith.addf %250, %253 : vector<128x128xf32>
    %255 = vector.extract_strided_slice %232 {offsets = [7, 0], sizes = [1, 128], strides = [1, 1]} : vector<9x128xf32> to vector<1x128xf32>
    %c120_i32 = arith.constant 120 : i32
    %256 = tpu.dynamic_rotate %225 by %c120_i32 dim 0 : vector<128x128xf32>, i32 -> vector<128x128xf32>
    %257 = vector.broadcast %255 : vector<1x128xf32> to vector<128x128xf32>
    %258 = arith.mulf %257, %256 : vector<128x128xf32>
    %259 = arith.addf %254, %258 : vector<128x128xf32>
    %260 = vector.extract_strided_slice %232 {offsets = [2, 0], sizes = [1, 128], strides = [1, 1]} : vector<9x128xf32> to vector<1x128xf32>
    %c7_i32 = arith.constant 7 : i32
    %261 = tpu.dynamic_rotate %231 by %c7_i32 dim 0 : vector<128x128xf32>, i32 -> vector<128x128xf32>
    %262 = vector.broadcast %260 : vector<1x128xf32> to vector<128x128xf32>
    %263 = arith.mulf %262, %261 : vector<128x128xf32>
    %264 = vector.extract_strided_slice %232 {offsets = [5, 0], sizes = [1, 128], strides = [1, 1]} : vector<9x128xf32> to vector<1x128xf32>
    %c127_i32 = arith.constant 127 : i32
    %265 = tpu.dynamic_rotate %178 by %c127_i32 dim 0 : vector<128x128xf32>, i32 -> vector<128x128xf32>
    %266 = vector.broadcast %264 : vector<1x128xf32> to vector<128x128xf32>
    %267 = arith.mulf %266, %265 : vector<128x128xf32>
    %268 = arith.addf %263, %267 : vector<128x128xf32>
    %269 = vector.extract_strided_slice %232 {offsets = [8, 0], sizes = [1, 128], strides = [1, 1]} : vector<9x128xf32> to vector<1x128xf32>
    %c119_i32 = arith.constant 119 : i32
    %270 = tpu.dynamic_rotate %225 by %c119_i32 dim 0 : vector<128x128xf32>, i32 -> vector<128x128xf32>
    %271 = vector.broadcast %269 : vector<1x128xf32> to vector<128x128xf32>
    %272 = arith.mulf %271, %270 : vector<128x128xf32>
    %273 = arith.addf %268, %272 : vector<128x128xf32>
    %274 = vector.broadcast %215 : vector<128x1xf32> to vector<128x128xf32>
    %275 = arith.mulf %274, %246 : vector<128x128xf32>
    %276 = arith.addf %259, %275 : vector<128x128xf32>
    %277 = vector.broadcast %219 : vector<128x1xf32> to vector<128x128xf32>
    %278 = arith.mulf %277, %273 : vector<128x128xf32>
    %279 = arith.addf %276, %278 : vector<128x128xf32>
    %c0_79 = arith.constant 0 : index
    %c0_80 = arith.constant 0 : index
    %280 = vector.load %arg14[%c0_79, %c0_80] : memref<1x128xf32, #tpu.memory_space<vmem>>, vector<1x128xf32>
    %281 = vector.broadcast %280 : vector<1x128xf32> to vector<128x128xf32>
    %282 = arith.addf %279, %281 : vector<128x128xf32>
    %cst_81 = arith.constant 5.000000e-01 : f32
    %283 = vector.broadcast %cst_81 : f32 to vector<128x128xf32>
    %284 = arith.mulf %283, %282 : vector<128x128xf32>
    %cst_82 = arith.constant 0.707106769 : f32
    %285 = vector.broadcast %cst_82 : f32 to vector<128x128xf32>
    %286 = arith.mulf %282, %285 : vector<128x128xf32>
    %287 = math.erf %286 : vector<128x128xf32>
    %cst_83 = arith.constant 1.000000e+00 : f32
    %288 = vector.broadcast %cst_83 : f32 to vector<128x128xf32>
    %289 = arith.addf %288, %287 : vector<128x128xf32>
    %290 = arith.mulf %284, %289 : vector<128x128xf32>
    %291 = arith.truncf %290 : vector<128x128xf32> to vector<128x128xbf16>
    %c0_84 = arith.constant 0 : index
    %c0_85 = arith.constant 0 : index
    %292 = vector.load %arg15[%c0_84, %c0_85] : memref<128x64xbf16, #tpu.memory_space<vmem>>, vector<128x64xbf16>
    %cst_86 = arith.constant dense<0.000000e+00> : vector<128x64xf32>
    %293 = tpu.matmul %291, %292, %cst_86 {dimension_numbers = #tpu.dot_dimension_numbers<[1], [0], [0], [1], [0, 0, 1, 1], [], []>} : vector<128x128xbf16>, vector<128x64xbf16>, vector<128x64xf32> -> vector<128x64xf32>
    %c0_87 = arith.constant 0 : index
    %c0_88 = arith.constant 0 : index
    %294 = vector.load %arg16[%c0_87, %c0_88] : memref<1x64xf32, #tpu.memory_space<vmem>>, vector<1x64xf32>
    %295 = vector.broadcast %294 : vector<1x64xf32> to vector<128x64xf32>
    %296 = arith.addf %293, %295 : vector<128x64xf32>
    %297 = arith.addf %148, %296 : vector<128x64xf32>
    %298 = vector.shape_cast %297 : vector<128x64xf32> to vector<2x64x64xf32>
    %299 = vector.extract_strided_slice %298 {offsets = [0, 0, 0], sizes = [1, 64, 64], strides = [1, 1, 1]} : vector<2x64x64xf32> to vector<1x64x64xf32>
    %300 = vector.shape_cast %299 : vector<1x64x64xf32> to vector<64x64xf32>
    %301 = tpu.transpose %300, [1, 0] : vector<64x64xf32> -> vector<64x64xf32>
    %c0_89 = arith.constant 0 : index
    %c0_90 = arith.constant 0 : index
    %c0_91 = arith.constant 0 : index
    %302 = vector.load %arg17[%c0_89, %c0_90, %c0_91] : memref<2x64x64xf32, #tpu.memory_space<vmem>>, vector<1x64x64xf32>
    %303 = vector.shape_cast %302 : vector<1x64x64xf32> to vector<64x64xf32>
    %304 = vector.shape_cast %301 : vector<64x64xf32> to vector<1x64x64xf32>
    tpu.vector_store %arg17[%c0_89, %c0_90, %c0_91], %304 {strides = array<i32>} : memref<2x64x64xf32, #tpu.memory_space<vmem>>, vector<1x64x64xf32>,
    %305 = vector.extract_strided_slice %298 {offsets = [1, 0, 0], sizes = [1, 64, 64], strides = [1, 1, 1]} : vector<2x64x64xf32> to vector<1x64x64xf32>
    %306 = vector.shape_cast %305 : vector<1x64x64xf32> to vector<64x64xf32>
    %307 = tpu.transpose %306, [1, 0] : vector<64x64xf32> -> vector<64x64xf32>
    %c1_92 = arith.constant 1 : index
    %c0_93 = arith.constant 0 : index
    %c0_94 = arith.constant 0 : index
    %308 = vector.load %arg17[%c1_92, %c0_93, %c0_94] : memref<2x64x64xf32, #tpu.memory_space<vmem>>, vector<1x64x64xf32>
    %309 = vector.shape_cast %308 : vector<1x64x64xf32> to vector<64x64xf32>
    %310 = vector.shape_cast %307 : vector<64x64xf32> to vector<1x64x64xf32>
    tpu.vector_store %arg17[%c1_92, %c0_93, %c0_94], %310 {strides = array<i32>} : memref<2x64x64xf32, #tpu.memory_space<vmem>>, vector<1x64x64xf32>,
    return
  }
  func.func @transform_0(%arg0: i32) -> (i32, i32, i32) {
    %c0_i32 = arith.constant 0 : i32
    %c0_i32_0 = arith.constant 0 : i32
    %c0_i32_1 = arith.constant 0 : i32
    return %arg0, %c0_i32, %c0_i32_0 : i32, i32, i32
  }
  func.func @transform_1(%arg0: i32) -> (i32, i32, i32) {
    %c0_i32 = arith.constant 0 : i32
    %c0_i32_0 = arith.constant 0 : i32
    %c0_i32_1 = arith.constant 0 : i32
    return %arg0, %c0_i32, %c0_i32_0 : i32, i32, i32
  }
  func.func @transform_2(%arg0: i32) -> (i32, i32) {
    %c0_i32 = arith.constant 0 : i32
    %c0_i32_0 = arith.constant 0 : i32
    %c0_i32_1 = arith.constant 0 : i32
    return %c0_i32, %c0_i32_0 : i32, i32
  }
  func.func @transform_3(%arg0: i32) -> (i32, i32) {
    %c0_i32 = arith.constant 0 : i32
    %c0_i32_0 = arith.constant 0 : i32
    %c0_i32_1 = arith.constant 0 : i32
    return %c0_i32, %c0_i32_0 : i32, i32
  }
  func.func @transform_4(%arg0: i32) -> (i32, i32) {
    %c0_i32 = arith.constant 0 : i32
    %c0_i32_0 = arith.constant 0 : i32
    %c0_i32_1 = arith.constant 0 : i32
    return %c0_i32, %c0_i32_0 : i32, i32
  }
  func.func @transform_5(%arg0: i32) -> (i32, i32) {
    %c0_i32 = arith.constant 0 : i32
    %c0_i32_0 = arith.constant 0 : i32
    %c0_i32_1 = arith.constant 0 : i32
    return %c0_i32, %c0_i32_0 : i32, i32
  }
  func.func @transform_6(%arg0: i32) -> (i32, i32) {
    %c0_i32 = arith.constant 0 : i32
    %c0_i32_0 = arith.constant 0 : i32
    %c0_i32_1 = arith.constant 0 : i32
    return %c0_i32, %c0_i32_0 : i32, i32
  }
  func.func @transform_7(%arg0: i32) -> (i32, i32) {
    %c0_i32 = arith.constant 0 : i32
    %c0_i32_0 = arith.constant 0 : i32
    %c0_i32_1 = arith.constant 0 : i32
    return %c0_i32, %c0_i32_0 : i32, i32
  }
  func.func @transform_8(%arg0: i32) -> (i32, i32) {
    %c0_i32 = arith.constant 0 : i32
    %c0_i32_0 = arith.constant 0 : i32
    %c0_i32_1 = arith.constant 0 : i32
    return %c0_i32, %c0_i32_0 : i32, i32
  }
  func.func @transform_9(%arg0: i32) -> (i32, i32) {
    %c0_i32 = arith.constant 0 : i32
    %c0_i32_0 = arith.constant 0 : i32
    %c0_i32_1 = arith.constant 0 : i32
    return %c0_i32, %c0_i32_0 : i32, i32
  }
  func.func @transform_10(%arg0: i32) -> (i32, i32) {
    %c0_i32 = arith.constant 0 : i32
    %c0_i32_0 = arith.constant 0 : i32
    %c0_i32_1 = arith.constant 0 : i32
    return %c0_i32, %c0_i32_0 : i32, i32
  }
  func.func @transform_11(%arg0: i32) -> (i32, i32) {
    %c0_i32 = arith.constant 0 : i32
    %c0_i32_0 = arith.constant 0 : i32
    %c0_i32_1 = arith.constant 0 : i32
    return %c0_i32, %c0_i32_0 : i32, i32
  }
  func.func @transform_12(%arg0: i32) -> (i32, i32) {
    %c0_i32 = arith.constant 0 : i32
    %c0_i32_0 = arith.constant 0 : i32
    %c0_i32_1 = arith.constant 0 : i32
    return %c0_i32, %c0_i32_0 : i32, i32
  }
  func.func @transform_13(%arg0: i32) -> (i32, i32) {
    %c0_i32 = arith.constant 0 : i32
    %c0_i32_0 = arith.constant 0 : i32
    %c0_i32_1 = arith.constant 0 : i32
    return %c0_i32, %c0_i32_0 : i32, i32
  }
  func.func @transform_14(%arg0: i32) -> (i32, i32) {
    %c0_i32 = arith.constant 0 : i32
    %c0_i32_0 = arith.constant 0 : i32
    %c0_i32_1 = arith.constant 0 : i32
    return %c0_i32, %c0_i32_0 : i32, i32
  }
  func.func @transform_15(%arg0: i32) -> (i32, i32) {
    %c0_i32 = arith.constant 0 : i32
    %c0_i32_0 = arith.constant 0 : i32
    %c0_i32_1 = arith.constant 0 : i32
    return %c0_i32, %c0_i32_0 : i32, i32
  }
  func.func @transform_16(%arg0: i32) -> (i32, i32, i32) {
    %c0_i32 = arith.constant 0 : i32
    %c0_i32_0 = arith.constant 0 : i32
    %c0_i32_1 = arith.constant 0 : i32
    return %arg0, %c0_i32, %c0_i32_0 : i32, i32, i32
  }
}

</mosaic_0001>

<bundles_post_ra>
// kernel: tpu_custom_call.1
= control target key start
LH: loop header
LB: loop body
LE: loop exit
PB: predicated region body
PF: predicated region fallthrough
CT: control target
= control target key end

     0   :  { %s7205_s0 = inlined_call_operand.vmem [shape: f32[2,32,64], index: 0, kind: input, shape index: {}]   ;;  %s7206_s1 = inlined_call_operand.hbm [shape: f32[2,32,64], index: 1, kind: input, shape index: {}]   ;;  %s7207_s2 = inlined_call_operand.vmem [shape: f32[1,32], index: 2, kind: input, shape index: {}]   ;;  %s7208_s3 = inlined_call_operand.vmem [shape: f32[1,32], index: 3, kind: input, shape index: {}]   ;;  %s7209_s4 = inlined_call_operand.hbm [shape: bf16[32,64], index: 4, kind: input, shape index: {}]   ;;  %s7210_s5 = inlined_call_operand.hbm [shape: f32[1,64], index: 5, kind: input, shape index: {}]   ;;  %s7211_s6 = inlined_call_operand.vmem [shape: f32[1,64], index: 6, kind: input, shape index: {}]   ;;  %s7212_s7 = inlined_call_operand.vmem [shape: f32[1,64], index: 7, kind: input, shape index: {}]   ;;  %s7213_s8 = inlined_call_operand.vmem [shape: f32[1,64], index: 8, kind: input, shape index: {}]   ;;  %s7214_s9 = inlined_call_operand.hbm [shape: f32[1,64], index: 9, kind: input, shape index: {}]   ;;  %s7215_s10 = inlined_call_operand.vmem [shape: bf16[64,128], index: 10, kind: input, shape index: {}]   ;;  %s7216_s11 = inlined_call_operand.hbm [shape: f32[1,128], index: 11, kind: input, shape index: {}]   ;;  %s7217_s12 = inlined_call_operand.vmem [shape: f32[9,128], index: 12, kind: input, shape index: {}]   ;;  %s7218_s13 = inlined_call_operand.hbm [shape: f32[1,128], index: 13, kind: input, shape index: {}]   ;;  %s7219_s14 = inlined_call_operand.vmem [shape: bf16[128,64], index: 14, kind: input, shape index: {}]   ;;  %s7220_s15 = inlined_call_operand.vmem [shape: f32[1,64], index: 15, kind: input, shape index: {}]   ;;  %s7221_s16 = inlined_call_operand.hbm [shape: f32[2,64,64], index: 16, kind: output, shape index: {}]  }
   0x1   :  { %7302 = sst [smem:[#allocation125_spill]] %s7205_s0 }
   0x2   :  { %7303 = sst [smem:[#allocation126_spill]] %s7221_s16 }
   0x3   :  { %21 = vsyncpa [#allocation3], 0 }
   0x4   :  { %22 = vsyncpa [#allocation6], 0 }
   0x5   :  { %23 = vsyncpa [#allocation9], 0 }
   0x6   :  { %24 = vsyncpa [#allocation12], 0 }
   0x7   :  { %25 = vsyncpa [#allocation4], 0  ;;  %s4615_s21 = smov [#allocation5]   ;;  %s4451_s25 = scalar_lea.hbm %s7209_s4, 256 }
   0x8   :  { %s49_s22 = sshll.u32 %s4615_s21, 4  ;;  %p4452_p0 = scmp.ne.s32.totalorder %s7209_s4, %s4451_s25  ;;  %s50_s22 = int_to_ptr.vmem [resolvable:$true] %s49_s22 }
   0x9   :  { %p4455_p1 = scmp.lt.u32.totalorder %s4451_s25, %s7209_s4 }
   0xb   :  { %p4457_p2 = pnand %p4455_p1, %p4452_p0 }
   0xd   :  { %4460 = shalt.err (!%p4457_p2)
}
   0xe   :  { %s4461_s30 = scalar_lea.vmem %s50_s22, 256  ;;  %p4466_p4 = scmp.lt.s32.totalorder %s50_s22, %s50_s22 }
   0xf   :  { %p4462_p3 = scmp.ne.s32.totalorder %s50_s22, %s4461_s30  ;;  %p4467_p5 = scmp.lt.s32.totalorder %s4461_s30, %s4461_s30 }
  0x11   :  { %p4468_p6 = por %p4467_p5, %p4466_p4 }
  0x13   :  { %p4469_p7 = pnand %p4468_p6, %p4462_p3 }
  0x15   :  { %4472 = shalt.err (!%p4469_p7)
}
  0x16   :  { %s4616_s0 = smov 64   ;;  %s4617_s17 = smov 4  }
  0x17   :  { %55 = dma.hbm_to_vmem [thread:$0]  %s7209_s4, 256, %s50_s22, [#allocation6], %s4616_s0, %s4616_s0, %s4617_s17  }
  0x18   :  { %s4618_s20 = smov [#allocation8]   ;;  %s4619_s23 = smov [#allocation2]  }
  0x19   :  { %s78_s21 = sshll.u32 %s4618_s20, 4  ;;  %s33_s24 = sshll.u32 %s4619_s23, 4  ;;  %s79_s21 = int_to_ptr.vmem [resolvable:$true] %s78_s21  ;;  %s34_s24 = int_to_ptr.vmem [resolvable:$true] %s33_s24 }
  0x1a   :  { %s4473_s27 = scalar_lea.hbm %s7214_s9, 16 }
  0x1b   :  { %p4474_p8 = scmp.ne.s32.totalorder %s7214_s9, %s4473_s27  ;;  %p4477_p9 = scmp.lt.u32.totalorder %s4473_s27, %s7214_s9 }
  0x1d   :  { %p4479_p10 = pnand %p4477_p9, %p4474_p8 }
  0x1f   :  { %4482 = shalt.err (!%p4479_p10)
}
  0x20   :  { %s4483_s4 = scalar_lea.vmem %s79_s21, 16  ;;  %s4487_s22 = scalar_lea.vmem %s79_s21, 32 }
  0x21   :  { %p4484_p11 = scmp.ne.s32.totalorder %s79_s21, %s4483_s4  ;;  %p4488_p12 = scmp.lt.s32.totalorder %s79_s21, %s79_s21 }
  0x22   :  { %p4489_p13 = scmp.lt.s32.totalorder %s4487_s22, %s4483_s4 }
  0x24   :  { %p4490_p0 = por %p4489_p13, %p4488_p12 }
  0x26   :  { %p4491_p1 = pnand %p4490_p0, %p4484_p11 }
  0x28   :  { %4494 = shalt.err (!%p4491_p1)
}
  0x29   :  { %81 = dma.hbm_to_vmem [thread:$0]  %s7214_s9, 16, %s79_s21, [#allocation9]  }
  0x2a   :  { %s4495_s16 = scalar_lea.hbm %s7206_s1, 1024 }
  0x2b   :  { %p4496_p2 = scmp.ne.s32.totalorder %s7206_s1, %s4495_s16  ;;  %p4499_p3 = scmp.lt.u32.totalorder %s4495_s16, %s7206_s1 }
  0x2d   :  { %p4501_p4 = pnand %p4499_p3, %p4496_p2 }
  0x2f   :  { %4504 = shalt.err (!%p4501_p4)
}
  0x30   :  { %s4505_s27 = scalar_lea.vmem %s34_s24, 1024  ;;  %p4510_p6 = scmp.lt.s32.totalorder %s34_s24, %s34_s24 }
  0x31   :  { %p4506_p5 = scmp.ne.s32.totalorder %s34_s24, %s4505_s27  ;;  %p4511_p7 = scmp.lt.s32.totalorder %s4505_s27, %s4505_s27 }
  0x33   :  { %p4512_p8 = por %p4511_p7, %p4510_p6 }
  0x35   :  { %p4513_p9 = pnand %p4512_p8, %p4506_p5 }
  0x37   :  { %4516 = shalt.err (!%p4513_p9)
}
  0x38   :  { %s4620_s9 = smov 128   ;;  %s4621_s21 = smov 8  }
  0x39   :  { %39 = dma.hbm_to_vmem [thread:$0]  %s7206_s1, 1024, %s34_s24, [#allocation3], %s4620_s9, %s4620_s9, %s4621_s21  }
  0x3a   :  { %s4622_s30 = smov [#allocation7]   ;;  %s4623_s22 = smov [#allocation10]  }
  0x3b   :  { %s62_s4 = sshll.u32 %s4622_s30, 4  ;;  %s90_s0 = sshll.u32 %s4623_s22, 4  ;;  %s63_s4 = int_to_ptr.vmem [resolvable:$true] %s62_s4  ;;  %s91_s0 = int_to_ptr.vmem [resolvable:$true] %s90_s0 }
  0x3c   :  { %s4517_s19 = scalar_lea.hbm %s7210_s5, 16 }
  0x3d   :  { %p4518_p10 = scmp.ne.s32.totalorder %s7210_s5, %s4517_s19  ;;  %p4521_p11 = scmp.lt.u32.totalorder %s4517_s19, %s7210_s5 }
  0x3f   :  { %p4523_p12 = pnand %p4521_p11, %p4518_p10 }
  0x41   :  { %4526 = shalt.err (!%p4523_p12)
}
  0x42   :  { %s4527_s1 = scalar_lea.vmem %s63_s4, 16  ;;  %s4531_s24 = scalar_lea.vmem %s63_s4, 32 }
  0x43   :  { %p4528_p13 = scmp.ne.s32.totalorder %s63_s4, %s4527_s1  ;;  %p4532_p0 = scmp.lt.s32.totalorder %s63_s4, %s63_s4 }
  0x44   :  { %p4533_p1 = scmp.lt.s32.totalorder %s4531_s24, %s4527_s1 }
  0x46   :  { %p4534_p2 = por %p4533_p1, %p4532_p0 }
  0x48   :  { %p4535_p3 = pnand %p4534_p2, %p4528_p13 }
  0x4a   :  { %4538 = shalt.err (!%p4535_p3)
}
  0x4b   :  { %65 = dma.hbm_to_vmem [thread:$0]  %s7210_s5, 16, %s63_s4, [#allocation6]  }
  0x4c   :  { %s4539_s30 = scalar_lea.hbm %s7216_s11, 16 }
  0x4d   :  { %p4540_p4 = scmp.ne.s32.totalorder %s7216_s11, %s4539_s30  ;;  %p4543_p5 = scmp.lt.u32.totalorder %s4539_s30, %s7216_s11 }
  0x4f   :  { %p4545_p6 = pnand %p4543_p5, %p4540_p4 }
  0x51   :  { %4548 = shalt.err (!%p4545_p6)
}
  0x52   :  { %s4549_s16 = scalar_lea.vmem %s91_s0, 16  ;;  %s4553_s20 = scalar_lea.vmem %s91_s0, 32 }
  0x53   :  { %p4550_p7 = scmp.ne.s32.totalorder %s91_s0, %s4549_s16  ;;  %p4554_p8 = scmp.lt.s32.totalorder %s91_s0, %s91_s0 }
  0x54   :  { %p4555_p9 = scmp.lt.s32.totalorder %s4553_s20, %s4549_s16 }
  0x56   :  { %p4556_p10 = por %p4555_p9, %p4554_p8 }
  0x58   :  { %p4557_p11 = pnand %p4556_p10, %p4550_p7 }
  0x5a   :  { %4560 = shalt.err (!%p4557_p11)
}
  0x5b   :  { %93 = dma.hbm_to_vmem [thread:$0]  %s7216_s11, 16, %s91_s0, [#allocation9]  }
  0x5c   :  { %s4624_s23 = smov [#allocation11]   ;;  %s4561_s26 = scalar_lea.hbm %s7218_s13, 16 }
  0x5d   :  { %s102_s25 = sshll.u32 %s4624_s23, 4  ;;  %p4562_p12 = scmp.ne.s32.totalorder %s7218_s13, %s4561_s26  ;;  %s103_s25 = int_to_ptr.vmem [resolvable:$true] %s102_s25 }
  0x5e   :  { %p4565_p13 = scmp.lt.u32.totalorder %s4561_s26, %s7218_s13 }
  0x60   :  { %p4567_p0 = pnand %p4565_p13, %p4562_p12 }
  0x62   :  { %4570 = shalt.err (!%p4567_p0)
}
  0x63   :  { %s4571_s22 = scalar_lea.vmem %s103_s25, 16  ;;  %s4575_s11 = scalar_lea.vmem %s103_s25, 32 }
  0x64   :  { %p4572_p1 = scmp.ne.s32.totalorder %s103_s25, %s4571_s22  ;;  %p4576_p2 = scmp.lt.s32.totalorder %s103_s25, %s103_s25 }
  0x65   :  { %p4577_p3 = scmp.lt.s32.totalorder %s4575_s11, %s4571_s22 }
  0x67   :  { %p4578_p4 = por %p4577_p3, %p4576_p2 }
  0x69   :  { %p4579_p5 = pnand %p4578_p4, %p4572_p1 }
  0x6b   :  { %4582 = shalt.err (!%p4579_p5)
}
  0x6c   :  { %105 = dma.hbm_to_vmem [thread:$0]  %s7218_s13, 16, %s103_s25, [#allocation12]  }
  0x6d   :  { %4605 = dma.done.wait [#allocation3], 1024  }
  0x6e   :  { %4606 = vsyncadd [#allocation3], 4294966272 }
  0x6f   :  { %4607 = dma.done.wait [#allocation6], 272  }
  0x70   :  { %4608 = vsyncadd [#allocation6], 4294967024 }
  0x71   :  { %4609 = dma.done.wait [#allocation9], 32  }
  0x72   :  { %4610 = vsyncadd [#allocation9], 4294967264 }
  0x73   :  { %4611 = dma.done.wait [#allocation12], 16  }
  0x74   :  { %4612 = vsyncadd [#allocation12], 4294967280  ;;  %v239_v0 = vld [vmem:[#allocation2 + $0x20] sm:$0xff]  ;;  %v240_v2 = vld [vmem:[#allocation2 + $0x28] sm:$0xff]  ;;  %vm277_vm0 = vcmask 261120   ;;  %s7320_s19 = sld [smem:[#allocation125_spill]] }
  0x75   :  { %v202_v1 = vld [vmem:[#allocation2] sm:$0xff]  ;;  %243 = vxpose.xlu1.b32.start [1/4] (short) (narrow) %v239_v0, 64  ;;  %v203_v3 = vld [vmem:[#allocation2 + $0x8] sm:$0xff]  ;;  %v241_v4 = vld [vmem:[#allocation2 + $0x30] sm:$0xff]  ;;  %vm954_vm1 = vcmask 523264  }
  0x76   :  { %206 = vxpose.xlu0.b32.start [1/4] (short) (narrow) %v202_v1, 64  ;;  %v204_v5 = vld [vmem:[#allocation2 + $0x10] sm:$0xff]  ;;  %v242_v6 = vld [vmem:[#allocation2 + $0x38] sm:$0xff] }
  0x77   :  { %v205_v7 = vld [vmem:[#allocation2 + $0x18] sm:$0xff] }
  0x79   :  { %244 = vxpose.xlu1.b32.cont [2/4] (short) (narrow) %v240_v2, 64 }
  0x7a   :  { %207 = vxpose.xlu0.b32.cont [2/4] (short) (narrow) %v203_v3, 64  ;;  %v129_v40 = vld [vmem:[%s7320_s19] sm:$0xff]  ;;  %v130_v41 = vld [vmem:[%s7320_s19 + $0x8] sm:$0xff]  ;;  %v131_v42 = vld [vmem:[%s7320_s19 + $0x10] sm:$0xff] }
  0x7b   :  { %v132_v43 = vld [vmem:[%s7320_s19 + $0x18] sm:$0xff] }
  0x7d   :  { %245 = vxpose.xlu1.b32.cont [3/4] (short) (narrow) %v241_v4, 64 }
  0x7e   :  { %208 = vxpose.xlu0.b32.cont [3/4] (short) (narrow) %v204_v5, 64 }
  0x81   :  { %246 = vxpose.xlu1.b32.end [4/4] (short) (narrow) %v242_v6, 64 }
  0x82   :  { %209 = vxpose.xlu0.b32.end [4/4] (short) (narrow) %v205_v7, 64 }
  0xf5   :  { %v4788_v8 = vpop.trf.xlu1 }
  0xf6   :  { %7304 = vst [vmem:[#allocation19_spill] sm:$0xff] %v4788_v8  ;;  %v4790_v9 = vpop.trf.xlu0  ;;  %v555_v11 = vsel %vm277_vm0, %v4788_v8, 0.0 }
  0xf7   :  { %7305 = vst [vmem:[#allocation20_spill] sm:$0xff] %v4790_v9  ;;  %v531_v10 = vsel %vm277_vm0, %v4790_v9, 0.0 }
  0xf8   :  { %532 = vadd.xlane.f32.xlu0 %v531_v10 }
  0xf9   :  { %v4796_v12 = vpop.trf.xlu1 }
  0xfa   :  { %7306 = vst [vmem:[#allocation21_spill] sm:$0xff] %v4796_v12  ;;  %v4798_v13 = vpop.trf.xlu0  ;;  %v558_v15 = vsel %vm277_vm0, %v4796_v12, 0.0 }
  0xfb   :  { %7307 = vst [vmem:[#allocation22_spill] sm:$0xff] %v4798_v13  ;;  %v534_v14 = vsel %vm277_vm0, %v4798_v13, 0.0 }
  0xfc   :  { %556 = vadd.xlane.f32.xlu0 %v555_v11  ;;  %535 = vadd.xlane.f32.xlu1 %v534_v14 }
  0xfd   :  { %v4804_v16 = vpop.trf.xlu1 }
  0xfe   :  { %7308 = vst [vmem:[#allocation23_spill] sm:$0xff] %v4804_v16  ;;  %v4806_v17 = vpop.trf.xlu0  ;;  %v561_v18 = vsel %vm277_vm0, %v4804_v16, 0.0 }
  0xff   :  { %7309 = vst [vmem:[#allocation24_spill] sm:$0xff] %v4806_v17  ;;  %v537_v19 = vsel %vm277_vm0, %v4806_v17, 0.0 }
 0x100   :  { %562 = vadd.xlane.f32.xlu0 %v561_v18  ;;  %559 = vadd.xlane.f32.xlu1 %v558_v15 }
 0x101   :  { %v4814_v21 = vpop.trf.xlu1 }
 0x102   :  { %v4812_v20 = vpop.trf.xlu0  ;;  %7311 = vst [vmem:[#allocation26_spill] sm:$0xff] %v4814_v21  ;;  %v564_v26 = vsel %vm277_vm0, %v4814_v21, 0.0 }
 0x103   :  { %7310 = vst [vmem:[#allocation25_spill] sm:$0xff] %v4812_v20  ;;  %v540_v22 = vsel %vm277_vm0, %v4812_v20, 0.0 }
 0x104   :  { %538 = vadd.xlane.f32.xlu1 %v537_v19 }
 0x105   :  { %v4820_v24 = vpop.trf.xlu1 }
 0x106   :  { %v4818_v23 = vpop.trf.xlu0  ;;  %7313 = vst [vmem:[#allocation28_spill] sm:$0xff] %v4820_v24  ;;  %v567_v27 = vsel %vm277_vm0, %v4820_v24, 0.0 }
 0x107   :  { %7312 = vst [vmem:[#allocation27_spill] sm:$0xff] %v4818_v23  ;;  %v543_v25 = vsel %vm277_vm0, %v4818_v23, 0.0 }
 0x108   :  { %541 = vadd.xlane.f32.xlu1 %v540_v22  ;;  %544 = vadd.xlane.f32.xlu0 %v543_v25 }
 0x109   :  { %v4830_v29 = vpop.trf.xlu1 }
 0x10a   :  { %v4828_v28 = vpop.trf.xlu0  ;;  %7315 = vst [vmem:[#allocation30_spill] sm:$0xff] %v4830_v29  ;;  %v570_v34 = vsel %vm277_vm0, %v4830_v29, 0.0 }
 0x10b   :  { %7314 = vst [vmem:[#allocation29_spill] sm:$0xff] %v4828_v28  ;;  %v546_v30 = vsel %vm277_vm0, %v4828_v28, 0.0 }
 0x10c   :  { %565 = vadd.xlane.f32.xlu1 %v564_v26  ;;  %568 = vadd.xlane.f32.xlu0 %v567_v27 }
 0x10d   :  { %v4836_v32 = vpop.trf.xlu1 }
 0x10e   :  { %v4834_v31 = vpop.trf.xlu0  ;;  %7317 = vst [vmem:[#allocation32_spill] sm:$0xff] %v4836_v32  ;;  %v573_v35 = vsel %vm277_vm0, %v4836_v32, 0.0 }
 0x10f   :  { %7316 = vst [vmem:[#allocation31_spill] sm:$0xff] %v4834_v31  ;;  %v549_v33 = vsel %vm277_vm0, %v4834_v31, 0.0 }
 0x110   :  { %547 = vadd.xlane.f32.xlu1 %v546_v30  ;;  %550 = vadd.xlane.f32.xlu0 %v549_v33 }
 0x111   :  { %v4848_v38 = vpop.trf.xlu1 }
 0x112   :  { %v4844_v36 = vpop.trf.xlu0  ;;  %7319 = vst [vmem:[#allocation34_spill] sm:$0xff] %v4848_v38  ;;  %v576_v39 = vsel %vm277_vm0, %v4848_v38, 0.0 }
 0x113   :  { %7318 = vst [vmem:[#allocation33_spill] sm:$0xff] %v4844_v36  ;;  %v552_v37 = vsel %vm277_vm0, %v4844_v36, 0.0 }
 0x114   :  { %571 = vadd.xlane.f32.xlu1 %v570_v34  ;;  %574 = vadd.xlane.f32.xlu0 %v573_v35 }
 0x118   :  { %553 = vadd.xlane.f32.xlu1 %v552_v37 }
 0x11c   :  { %577 = vadd.xlane.f32.xlu1 %v576_v39 }
 0x141   :  { %133 = vxpose.xlu0.b32.start [1/4] (short) (narrow) %v129_v40, 64 }
 0x145   :  { %134 = vxpose.xlu0.b32.cont [2/4] (short) (narrow) %v130_v41, 64 }
 0x149   :  { %135 = vxpose.xlu0.b32.cont [3/4] (short) (narrow) %v131_v42, 64 }
 0x14d   :  { %136 = vxpose.xlu0.b32.end [4/4] (short) (narrow) %v132_v43, 64 }
 0x185   :  { %v533_v44 = vpop.xlane.xlu0 %532 }
 0x186   :  { %v579_v45 = vmul.f32 0.03125, %v533_v44 }
 0x188   :  { %v4865_v46 = vsub.f32 %v4790_v9, %v579_v45 }
 0x189   :  { %v536_v47 = vpop.xlane.xlu1 %535  ;;  %v557_v48 = vpop.xlane.xlu0 %556 }
 0x18a   :  { %v580_v49 = vmul.f32 0.03125, %v536_v47  ;;  %v587_v50 = vmul.f32 0.03125, %v557_v48  ;;  %v611_v51 = vmul.f32 %v4865_v46, %v4865_v46 }
 0x18c   :  { %v4870_v52 = vsub.f32 %v4798_v13, %v580_v49  ;;  %v4873_v53 = vsub.f32 %v4788_v8, %v587_v50  ;;  %v627_v54 = vsel %vm277_vm0, %v611_v51, 0.0 }
 0x18d   :  { %v4876_v55 = vpop.xlane.xlu1 %559  ;;  %628 = vadd.xlane.f32.xlu1 %v627_v54  ;;  %v563_v56 = vpop.xlane.xlu0 %562 }
 0x18e   :  { %v589_v57 = vmul.f32 0.03125, %v563_v56  ;;  %v612_v58 = vmul.f32 %v4870_v52, %v4870_v52  ;;  %v619_v59 = vmul.f32 %v4873_v53, %v4873_v53 }
 0x190   :  { %v4883_v60 = vsub.f32 %v4804_v16, %v589_v57  ;;  %v630_v61 = vsel %vm277_vm0, %v612_v58, 0.0  ;;  %v651_v62 = vsel %vm277_vm0, %v619_v59, 0.0 }
 0x191   :  { %v539_v63 = vpop.xlane.xlu1 %538  ;;  %631 = vadd.xlane.f32.xlu1 %v630_v61  ;;  %652 = vadd.xlane.f32.xlu0 %v651_v62 }
 0x192   :  { %v581_v0 = vmul.f32 0.03125, %v539_v63  ;;  %v621_v1 = vmul.f32 %v4883_v60, %v4883_v60 }
 0x194   :  { %v4890_v2 = vsub.f32 %v4806_v17, %v581_v0  ;;  %v657_v3 = vsel %vm277_vm0, %v621_v1, 0.0 }
 0x195   :  { %v542_v4 = vpop.xlane.xlu1 %541  ;;  %v545_v5 = vpop.xlane.xlu0 %544  ;;  %658 = vadd.xlane.f32.xlu0 %v657_v3 }
 0x196   :  { %v582_v6 = vmul.f32 0.03125, %v542_v4  ;;  %v583_v7 = vmul.f32 0.03125, %v545_v5  ;;  %v613_v10 = vmul.f32 %v4890_v2, %v4890_v2 }
 0x198   :  { %v4896_v11 = vsub.f32 %v4812_v20, %v582_v6  ;;  %v4899_v14 = vsub.f32 %v4818_v23, %v583_v7  ;;  %v633_v15 = vsel %vm277_vm0, %v613_v10, 0.0 }
 0x199   :  { %v566_v18 = vpop.xlane.xlu1 %565  ;;  %634 = vadd.xlane.f32.xlu1 %v633_v15  ;;  %v569_v19 = vpop.xlane.xlu0 %568 }
 0x19a   :  { %v590_v22 = vmul.f32 0.03125, %v566_v18  ;;  %v591_v25 = vmul.f32 0.03125, %v569_v19  ;;  %v614_v26 = vmul.f32 %v4896_v11, %v4896_v11  ;;  %v615_v34 = vmul.f32 %v4899_v14, %v4899_v14 }
 0x19c   :  { %v4905_v27 = vsub.f32 %v4814_v21, %v590_v22  ;;  %v4908_v30 = vsub.f32 %v4820_v24, %v591_v25  ;;  %v636_v33 = vsel %vm277_vm0, %v614_v26, 0.0  ;;  %v639_v45 = vsel %vm277_vm0, %v615_v34, 0.0 }
 0x19d   :  { %v548_v35 = vpop.xlane.xlu1 %547  ;;  %637 = vadd.xlane.f32.xlu1 %v636_v33  ;;  %v551_v37 = vpop.xlane.xlu0 %550 }
 0x19e   :  { %v584_v39 = vmul.f32 0.03125, %v548_v35  ;;  %v585_v40 = vmul.f32 0.03125, %v551_v37  ;;  %v622_v41 = vmul.f32 %v4905_v27, %v4905_v27  ;;  %v623_v42 = vmul.f32 %v4908_v30, %v4908_v30 }
 0x1a0   :  { %v4918_v43 = vsub.f32 %v4828_v28, %v584_v39  ;;  %v4921_v44 = vsub.f32 %v4834_v31, %v585_v40  ;;  %v660_v47 = vsel %vm277_vm0, %v622_v41, 0.0  ;;  %v663_v56 = vsel %vm277_vm0, %v623_v42, 0.0 }
 0x1a1   :  { %v572_v48 = vpop.xlane.xlu1 %571  ;;  %640 = vadd.xlane.f32.xlu1 %v639_v45  ;;  %v575_v49 = vpop.xlane.xlu0 %574  ;;  %661 = vadd.xlane.f32.xlu0 %v660_v47 }
 0x1a2   :  { %v592_v50 = vmul.f32 0.03125, %v572_v48  ;;  %v593_v51 = vmul.f32 0.03125, %v575_v49  ;;  %v616_v54 = vmul.f32 %v4918_v43, %v4918_v43  ;;  %v617_v61 = vmul.f32 %v4921_v44, %v4921_v44  ;;  %v3888_v49 = vld [vmem:[%s7320_s19 + $0x20] sm:$0xff] }
 0x1a4   :  { %v4929_v57 = vsub.f32 %v4830_v29, %v592_v50  ;;  %v4932_v58 = vsub.f32 %v4836_v32, %v593_v51  ;;  %v642_v59 = vsel %vm277_vm0, %v616_v54, 0.0  ;;  %v645_v3 = vsel %vm277_vm0, %v617_v61, 0.0  ;;  %v3889_v50 = vld [vmem:[%s7320_s19 + $0x28] sm:$0xff]  ;;  %v3890_v51 = vld [vmem:[%s7320_s19 + $0x30] sm:$0xff]  ;;  %v3891_v54 = vld [vmem:[%s7320_s19 + $0x38] sm:$0xff] }
 0x1a5   :  { %v554_v62 = vpop.xlane.xlu1 %553  ;;  %643 = vadd.xlane.f32.xlu1 %v642_v59  ;;  %664 = vadd.xlane.f32.xlu0 %v663_v56  ;;  %v588_v56 = vmul.f32 0.03125, %v4876_v55 }
 0x1a6   :  { %v586_v63 = vmul.f32 0.03125, %v554_v62  ;;  %v624_v0 = vmul.f32 %v4929_v57, %v4929_v57  ;;  %v625_v5 = vmul.f32 %v4932_v58, %v4932_v58 }
 0x1a7   :  { %v4994_v59 = vsub.f32 %v4796_v12, %v588_v56 }
 0x1a8   :  { %v4940_v1 = vsub.f32 %v4844_v36, %v586_v63  ;;  %v666_v4 = vsel %vm277_vm0, %v624_v0, 0.0  ;;  %v669_v19 = vsel %vm277_vm0, %v625_v5, 0.0 }
 0x1a9   :  { %v578_v6 = vpop.xlane.xlu1 %577  ;;  %646 = vadd.xlane.f32.xlu1 %v645_v3  ;;  %667 = vadd.xlane.f32.xlu0 %v666_v4  ;;  %v620_v61 = vmul.f32 %v4994_v59, %v4994_v59 }
 0x1aa   :  { %v594_v7 = vmul.f32 0.03125, %v578_v6  ;;  %v618_v10 = vmul.f32 %v4940_v1, %v4940_v1 }
 0x1ab   :  { %v654_v62 = vsel %vm277_vm0, %v620_v61, 0.0 }
 0x1ac   :  { %v4949_v15 = vsub.f32 %v4848_v38, %v594_v7  ;;  %v648_v18 = vsel %vm277_vm0, %v618_v10, 0.0 }
 0x1ad   :  { %649 = vadd.xlane.f32.xlu1 %v648_v18  ;;  %670 = vadd.xlane.f32.xlu0 %v669_v19 }
 0x1ae   :  { %v626_v22 = vmul.f32 %v4949_v15, %v4949_v15 }
 0x1b0   :  { %v672_v25 = vsel %vm277_vm0, %v626_v22, 0.0 }
 0x1b1   :  { %673 = vadd.xlane.f32.xlu0 %v672_v25 }
 0x1c1   :  { %v4956_v26 = vpop.trf.xlu0 }
 0x1c2   :  { %7321 = vst [vmem:[#allocation35_spill] sm:$0xff] %v4956_v26  ;;  %v278_v33 = vsel %vm277_vm0, %v4956_v26, 0.0 }
 0x1c3   :  { %279 = vadd.xlane.f32.xlu0 %v278_v33 }
 0x1c5   :  { %v4960_v34 = vpop.trf.xlu0 }
 0x1c6   :  { %7322 = vst [vmem:[#allocation36_spill] sm:$0xff] %v4960_v34  ;;  %v281_v35 = vsel %vm277_vm0, %v4960_v34, 0.0 }
 0x1c7   :  { %282 = vadd.xlane.f32.xlu0 %v281_v35 }
 0x1c9   :  { %v4964_v37 = vpop.trf.xlu0 }
 0x1ca   :  { %7323 = vst [vmem:[#allocation37_spill] sm:$0xff] %v4964_v37  ;;  %v284_v39 = vsel %vm277_vm0, %v4964_v37, 0.0 }
 0x1cb   :  { %285 = vadd.xlane.f32.xlu0 %v284_v39 }
 0x1cd   :  { %v4968_v40 = vpop.trf.xlu0 }
 0x1ce   :  { %7324 = vst [vmem:[#allocation38_spill] sm:$0xff] %v4968_v40  ;;  %v287_v63 = vsel %vm277_vm0, %v4968_v40, 0.0 }
 0x1d1   :  { %v4970_v41 = vpop.trf.xlu0 }
 0x1d2   :  { %7325 = vst [vmem:[#allocation39_spill] sm:$0xff] %v4970_v41  ;;  %v290_v42 = vsel %vm277_vm0, %v4970_v41, 0.0 }
 0x1d3   :  { %291 = vadd.xlane.f32.xlu0 %v290_v42 }
 0x1d5   :  { %v4974_v45 = vpop.trf.xlu0 }
 0x1d6   :  { %7326 = vst [vmem:[#allocation40_spill] sm:$0xff] %v4974_v45  ;;  %v293_v0 = vsel %vm277_vm0, %v4974_v45, 0.0 }
 0x1d9   :  { %v4976_v47 = vpop.trf.xlu0 }
 0x1da   :  { %7327 = vst [vmem:[#allocation41_spill] sm:$0xff] %v4976_v47  ;;  %v296_v48 = vsel %vm277_vm0, %v4976_v47, 0.0 }
 0x1db   :  { %297 = vadd.xlane.f32.xlu0 %v296_v48 }
 0x1dd   :  { %v5003_v3 = vpop.trf.xlu0 }
 0x1de   :  { %7328 = vst [vmem:[#allocation42_spill] sm:$0xff] %v5003_v3  ;;  %v299_v55 = vsel %vm277_vm0, %v5003_v3, 0.0 }
 0x1e0   :  { %170 = vxpose.xlu1.b32.start [1/4] (short) (narrow) %v3888_v49, 64 }
 0x1e4   :  { %171 = vxpose.xlu1.b32.cont [2/4] (short) (narrow) %v3889_v50, 64 }
 0x1e8   :  { %172 = vxpose.xlu1.b32.cont [3/4] (short) (narrow) %v3890_v51, 64 }
 0x1ec   :  { %173 = vxpose.xlu1.b32.end [4/4] (short) (narrow) %v3891_v54, 64 }
 0x21a   :  { %v5007_v4 = vpop.xlane.xlu1 %628 }
 0x21e   :  { %v5009_v5 = vpop.xlane.xlu1 %631  ;;  %v5013_v7 = vpop.xlane.xlu0 %652 }
 0x222   :  { %v5017_v18 = vpop.xlane.xlu0 %658 }
 0x223   :  { %655 = vadd.xlane.f32.xlu1 %v654_v62 }
 0x226   :  { %v5011_v6 = vpop.xlane.xlu1 %634 }
 0x227   :  { %288 = vadd.xlane.f32.xlu1 %v287_v63  ;;  %v677_v28 = vmul.f32 0.03125, %v5011_v6 }
 0x22a   :  { %v5015_v10 = vpop.xlane.xlu1 %637 }
 0x22b   :  { %294 = vadd.xlane.f32.xlu1 %v293_v0 }
 0x22e   :  { %v5019_v19 = vpop.xlane.xlu1 %640  ;;  %v5021_v22 = vpop.xlane.xlu0 %661 }
 0x22f   :  { %300 = vadd.xlane.f32.xlu1 %v299_v55  ;;  %v686_v6 = vmul.f32 0.03125, %v5021_v22 }
 0x232   :  { %v5023_v25 = vpop.xlane.xlu1 %643  ;;  %v5025_v33 = vpop.xlane.xlu0 %664 }
 0x236   :  { %v5027_v35 = vpop.xlane.xlu1 %646  ;;  %v5029_v39 = vpop.xlane.xlu0 %667 }
 0x23a   :  { %v650_v42 = vpop.xlane.xlu1 %649  ;;  %v5031_v48 = vpop.xlane.xlu0 %670 }
 0x23e   :  { %v5037_v51 = vpop.xlane.xlu0 %673 }
 0x250   :  { %v280_v61 = vpop.xlane.xlu0 %279 }
 0x254   :  { %v283_v0 = vpop.xlane.xlu0 %282 }
 0x255   :  { %v328_v24 = vmul.f32 0.03125, %v283_v0 }
 0x260   :  { %v5033_v49 = vpop.trf.xlu1 }
 0x261   :  { %7329 = vst [vmem:[#allocation43_spill] sm:$0xff] %v5033_v49  ;;  %v302_v50 = vsel %vm277_vm0, %v5033_v49, 0.0 }
 0x262   :  { %303 = vadd.xlane.f32.xlu0 %v302_v50  ;;  %v327_v50 = vmul.f32 0.03125, %v280_v61 }
 0x264   :  { %v5039_v54 = vpop.trf.xlu1  ;;  %v5056_v21 = vsub.f32 %v4956_v26, %v327_v50 }
 0x265   :  { %7330 = vst [vmem:[#allocation44_spill] sm:$0xff] %v5039_v54  ;;  %v305_v56 = vsel %vm277_vm0, %v5039_v54, 0.0 }
 0x266   :  { %306 = vadd.xlane.f32.xlu1 %v305_v56  ;;  %v286_v56 = vpop.xlane.xlu0 %285 }
 0x267   :  { %v329_v16 = vmul.f32 0.03125, %v286_v56 }
 0x268   :  { %v5043_v62 = vpop.trf.xlu1 }
 0x269   :  { %7331 = vst [vmem:[#allocation45_spill] sm:$0xff] %v5043_v62  ;;  %v308_v63 = vsel %vm277_vm0, %v5043_v62, 0.0  ;;  %v5070_v50 = vsub.f32 %v4964_v37, %v329_v16 }
 0x26a   :  { %309 = vadd.xlane.f32.xlu0 %v308_v63  ;;  %v292_v8 = vpop.xlane.xlu0 %291 }
 0x26b   :  { %v331_v0 = vmul.f32 0.03125, %v292_v8  ;;  %v361_v8 = vmul.f32 %v5070_v50, %v5070_v50 }
 0x26c   :  { %v5047_v55 = vpop.trf.xlu1 }
 0x26d   :  { %7332 = vst [vmem:[#allocation46_spill] sm:$0xff] %v5047_v55  ;;  %v311_v38 = vsel %vm277_vm0, %v5047_v55, 0.0  ;;  %v381_v37 = vsel %vm277_vm0, %v361_v8, 0.0  ;;  %v682_v8 = vmul.f32 0.03125, %v650_v42  ;;  %v687_v42 = vmul.f32 0.03125, %v5025_v33 }
 0x26e   :  { %312 = vadd.xlane.f32.xlu1 %v311_v38  ;;  %v5063_v38 = vsub.f32 %v4960_v34, %v328_v24  ;;  %v298_v26 = vpop.xlane.xlu0 %297  ;;  %v5080_v34 = vsub.f32 %v4970_v41, %v331_v0 }
 0x26f   :  { %v333_v31 = vmul.f32 0.03125, %v298_v26 }
 0x270   :  { %v5051_v29 = vpop.trf.xlu1  ;;  %v360_v24 = vmul.f32 %v5063_v38, %v5063_v38  ;;  %v363_v0 = vmul.f32 %v5080_v34, %v5080_v34 }
 0x271   :  { %7333 = vst [vmem:[#allocation47_spill] sm:$0xff] %v5051_v29  ;;  %v314_v32 = vsel %vm277_vm0, %v5051_v29, 0.0 }
 0x272   :  { %315 = vadd.xlane.f32.xlu0 %v314_v32  ;;  %v359_v32 = vmul.f32 %v5056_v21, %v5056_v21  ;;  %v387_v26 = vsel %vm277_vm0, %v363_v0, 0.0  ;;  %v681_v0 = vmul.f32 0.03125, %v5027_v35  ;;  %v685_v35 = vmul.f32 0.03125, %v5017_v18 }
 0x274   :  { %v5058_v63 = vpop.trf.xlu1 }
 0x275   :  { %7334 = vst [vmem:[#allocation48_spill] sm:$0xff] %v5058_v63  ;;  %v317_v12 = vsel %vm277_vm0, %v5058_v63, 0.0 }
 0x276   :  { %318 = vadd.xlane.f32.xlu1 %v317_v12  ;;  %v375_v12 = vsel %vm277_vm0, %v359_v32, 0.0  ;;  %v378_v32 = vsel %vm277_vm0, %v360_v24, 0.0  ;;  %v676_v24 = vmul.f32 0.03125, %v5009_v5  ;;  %v693_v5 = vadd.f32 1e-05, %v677_v28 }
 0x277   :  { %v701_v28 = vadd.f32 1e-05, %v685_v35 }
 0x278   :  { %v5065_v61 = vpop.trf.xlu1 }
 0x279   :  { %7335 = vst [vmem:[#allocation49_spill] sm:$0xff] %v5065_v61  ;;  %v320_v56 = vsel %vm277_vm0, %v5065_v61, 0.0 }
 0x27a   :  { %321 = vadd.xlane.f32.xlu0 %v320_v56  ;;  %v5087_v56 = vsub.f32 %v4976_v47, %v333_v31  ;;  %v675_v31 = vmul.f32 0.03125, %v5007_v4  ;;  %v697_v4 = vadd.f32 1e-05, %v681_v0 }
 0x27c   :  { %v5074_v36 = vpop.trf.xlu1  ;;  %v365_v41 = vmul.f32 %v5087_v56, %v5087_v56  ;;  %v691_v47 = vadd.f32 1e-05, %v675_v31 }
 0x27d   :  { %7336 = vst [vmem:[#allocation50_spill] sm:$0xff] %v5074_v36  ;;  %v323_v16 = vsel %vm277_vm0, %v5074_v36, 0.0 }
 0x27e   :  { %324 = vadd.xlane.f32.xlu1 %v323_v16  ;;  %376 = vadd.xlane.f32.xlu0 %v375_v12  ;;  %v393_v12 = vsel %vm277_vm0, %v365_v41, 0.0  ;;  %v678_v16 = vmul.f32 0.03125, %v5015_v10  ;;  %v698_v41 = vadd.f32 1e-05, %v682_v8  ;;  %4191 = vrsqrt.f32 %v691_v47 }
 0x280   :  { %v694_v23 = vadd.f32 1e-05, %v678_v16  ;;  %v702_v16 = vadd.f32 1e-05, %v686_v6 }
 0x282   :  { %379 = vadd.xlane.f32.xlu1 %v378_v32  ;;  %382 = vadd.xlane.f32.xlu0 %v381_v37  ;;  %v680_v32 = vmul.f32 0.03125, %v5023_v25  ;;  %v692_v37 = vadd.f32 1e-05, %v676_v24  ;;  %v683_v25 = vmul.f32 0.03125, %v5013_v7  ;;  %v688_v7 = vmul.f32 0.03125, %v5029_v39 }
 0x284   :  { %4193 = vrsqrt.f32 %v692_v37  ;;  %v699_v47 = vadd.f32 1e-05, %v683_v25  ;;  %v703_v37 = vadd.f32 1e-05, %v687_v42  ;;  %v704_v33 = vadd.f32 1e-05, %v688_v7 }
 0x285   :  { %4195 = vrsqrt.f32 %v694_v23  ;;  %v689_v23 = vmul.f32 0.03125, %v5031_v48 }
 0x286   :  { %388 = vadd.xlane.f32.xlu0 %v387_v26  ;;  %v679_v26 = vmul.f32 0.03125, %v5019_v19  ;;  %4197 = vrsqrt.f32 %v698_v41  ;;  %v690_v19 = vmul.f32 0.03125, %v5037_v51 }
 0x287   :  { %v705_v22 = vadd.f32 1e-05, %v689_v23 }
 0x288   :  { %v695_v10 = vadd.f32 1e-05, %v679_v26  ;;  %v4192_v31 = vpop.eup %4191 }
 0x28a   :  { %394 = vadd.xlane.f32.xlu0 %v393_v12  ;;  %v696_v12 = vadd.f32 1e-05, %v680_v32  ;;  %v706_v32 = vadd.f32 1e-05, %v690_v19 }
 0x28c   :  { %4199 = vrsqrt.f32 %v696_v12 }
 0x28d   :  { %4201 = vrsqrt.f32 %v697_v4 }
 0x28e   :  { %4203 = vrsqrt.f32 %v693_v5  ;;  %v4194_v24 = vpop.eup %4193  ;;  %v5118_v5 = vld [vmem:[%s7207_s2] ss:$0 sm:$0xff] }
 0x28f   :  { %4205 = vrsqrt.f32 %v695_v10  ;;  %v4196_v8 = vpop.eup %4195  ;;  %v723_v10 = vmul.f32 %v4192_v31, %v4865_v46  ;;  %v724_v25 = vmul.f32 %v4194_v24, %v4870_v52  ;;  %v5131_v46 = vld [vmem:[%s7208_s3] ss:$0 sm:$0xff]  ;;  %s4625_s3 = smov 32  }
 0x290   :  { %v4198_v18 = vpop.eup %4197  ;;  %4207 = vrsqrt.f32 %v699_v47  ;;  %v726_v12 = vmul.f32 %v4196_v8, %v4896_v11 }
 0x291   :  { %4209 = vrsqrt.f32 %v701_v28  ;;  %v730_v41 = vmul.f32 %v4198_v18, %v4940_v1  ;;  %v739_v52 = vmul.f32 %v5118_v5, %v723_v10 }
 0x292   :  { %4211 = vrsqrt.f32 %v702_v16 }
 0x293   :  { %4213 = vrsqrt.f32 %v706_v32  ;;  %v746_v11 = vmul.f32 %v5118_v5, %v730_v41 }
 0x294   :  { %4215 = vrsqrt.f32 %v703_v37 }
 0x295   :  { %4217 = vrsqrt.f32 %v705_v22  ;;  %v5138_v28 = vadd.f32 %v5131_v46, %v746_v11 }
 0x296   :  { %v4200_v0 = vpop.eup %4199  ;;  %4219 = vrsqrt.f32 %v704_v33 }
 0x297   :  { %v4202_v51 = vpop.eup %4201  ;;  %v728_v39 = vmul.f32 %v4200_v0, %v4918_v43  ;;  %v742_v43 = vmul.f32 %v5118_v5, %v726_v12  ;;  %7337 = vst [vmem:[#allocation51_spill] sm:$0xff] %v5138_v28  ;;  %v5150_v0 = vadd.f32 %v5131_v46, %v739_v52 }
 0x298   :  { %v4204_v26 = vpop.eup %4203  ;;  %v729_v4 = vmul.f32 %v4202_v51, %v4921_v44 }
 0x299   :  { %v4206_v48 = vpop.eup %4205  ;;  %v725_v1 = vmul.f32 %v4204_v26, %v4890_v2  ;;  %v744_v44 = vmul.f32 %v5118_v5, %v728_v39  ;;  %v740_v2 = vmul.f32 %v5118_v5, %v724_v25  ;;  %v5141_v8 = vadd.f32 %v5131_v46, %v742_v43 }
 0x29a   :  { %v727_v35 = vmul.f32 %v4206_v48, %v4899_v14  ;;  %v745_v6 = vmul.f32 %v5118_v5, %v729_v4  ;;  %v4208_v19 = vpop.eup %4207  ;;  %v5163_v48 = vsel %vm277_vm0, %v5138_v28, -inf }
 0x29b   :  { %v741_v14 = vmul.f32 %v5118_v5, %v725_v1  ;;  %v4210_v42 = vpop.eup %4209  ;;  %7338 = vst [vmem:[#allocation52_spill] sm:$0xff] %v5141_v8  ;;  %v5144_v7 = vadd.f32 %v5131_v46, %v744_v44  ;;  %v5153_v22 = vadd.f32 %v5131_v46, %v740_v2  ;;  %7344 = vst [vmem:[#allocation58_spill] sm:$0xff] %v5163_v48 }
 0x29c   :  { %v743_v31 = vmul.f32 %v5118_v5, %v727_v35  ;;  %v4212_v24 = vpop.eup %4211  ;;  %v5147_v32 = vadd.f32 %v5131_v46, %v745_v6  ;;  %v731_v39 = vmul.f32 %v4208_v19, %v4873_v53  ;;  %v733_v4 = vmul.f32 %v4210_v42, %v4883_v60 }
 0x29d   :  { %v4214_v16 = vpop.eup %4213  ;;  %7339 = vst [vmem:[#allocation53_spill] sm:$0xff] %v5144_v7  ;;  %7341 = vst [vmem:[#allocation55_spill] sm:$0xff] %v5153_v22  ;;  %v5156_v51 = vadd.f32 %v5131_v46, %v741_v14  ;;  %v734_v10 = vmul.f32 %v4212_v24, %v4905_v27  ;;  %v5171_v35 = vsel %vm277_vm0, %v5141_v8, -inf  ;;  %v5175_v11 = vsel %vm277_vm0, %v5144_v7, -inf }
 0x29e   :  { %7340 = vst [vmem:[#allocation54_spill] sm:$0xff] %v5147_v32  ;;  %v4216_v37 = vpop.eup %4215  ;;  %v5159_v41 = vadd.f32 %v5131_v46, %v743_v31  ;;  %v738_v25 = vmul.f32 %v4214_v16, %v4949_v15  ;;  %v5179_v43 = vsel %vm277_vm0, %v5147_v32, -inf  ;;  %v5186_v60 = vsel %vm277_vm0, %v5153_v22, -inf }
 0x29f   :  { %7342 = vst [vmem:[#allocation56_spill] sm:$0xff] %v5156_v51  ;;  %v4218_v33 = vpop.eup %4217  ;;  %v735_v27 = vmul.f32 %v4216_v37, %v4908_v30  ;;  %v786_v15 = vmax.f32 %v5171_v35, %v5163_v48  ;;  %v5194_v19 = vsel %vm277_vm0, %v5156_v51, -inf  ;;  %v782_v30 = vmax.f32 %v5186_v60, %v5175_v11 }
 0x2a0   :  { %7343 = vst [vmem:[#allocation57_spill] sm:$0xff] %v5159_v41  ;;  %v4220_v1 = vpop.eup %4219  ;;  %v737_v44 = vmul.f32 %v4218_v33, %v4932_v58  ;;  %v5198_v52 = vsel %vm277_vm0, %v5159_v41, -inf  ;;  %v754_v42 = vmul.f32 %v5118_v5, %v738_v25  ;;  %v5210_v31 = vsel %vm277_vm0, %v5150_v0, -inf }
 0x2a1   :  { %v736_v58 = vmul.f32 %v4220_v1, %v4929_v57  ;;  %v751_v37 = vmul.f32 %v5118_v5, %v735_v27  ;;  %v749_v1 = vmul.f32 %v5118_v5, %v733_v4 }
 0x2a2   :  { %v753_v57 = vmul.f32 %v5118_v5, %v737_v44 }
 0x2a4   :  { %v5240_v4 = vadd.f32 %v5131_v46, %v753_v57 }
 0x2a6   :  { %7349 = vst [vmem:[#allocation63_spill] sm:$0xff] %v5240_v4 }
 0x2b0   :  { %v656_v47 = vpop.xlane.xlu1 %655 }
 0x2b1   :  { %v684_v23 = vmul.f32 0.03125, %v656_v47  ;;  %v784_v47 = vmax.f32 %v5194_v19, %v5179_v43 }
 0x2b3   :  { %v700_v18 = vadd.f32 1e-05, %v684_v23  ;;  %v750_v23 = vmul.f32 %v5118_v5, %v734_v10 }
 0x2b4   :  { %v289_v26 = vpop.xlane.xlu1 %288 }
 0x2b5   :  { %4221 = vrsqrt.f32 %v700_v18  ;;  %v330_v12 = vmul.f32 0.03125, %v289_v26  ;;  %v780_v18 = vmax.f32 %v5210_v31, %v5198_v52  ;;  %v788_v26 = vmax.f32 %v784_v47, %v786_v15 }
 0x2b6   :  { %v5230_v15 = vadd.f32 %v5131_v46, %v750_v23  ;;  %v5237_v47 = vadd.f32 %v5131_v46, %v751_v37  ;;  %v5249_v23 = vadd.f32 %v5131_v46, %v749_v1 }
 0x2b7   :  { %v5182_v53 = vsub.f32 %v4968_v40, %v330_v12  ;;  %v747_v12 = vmul.f32 %v5118_v5, %v731_v39 }
 0x2b8   :  { %v295_v6 = vpop.xlane.xlu1 %294  ;;  %7346 = vst [vmem:[#allocation60_spill] sm:$0xff] %v5230_v15  ;;  %7348 = vst [vmem:[#allocation62_spill] sm:$0xff] %v5237_v47 }
 0x2b9   :  { %v332_v2 = vmul.f32 0.03125, %v295_v6  ;;  %v362_v14 = vmul.f32 %v5182_v53, %v5182_v53  ;;  %v787_v6 = vmax.f32 %v780_v18, %v782_v30  ;;  %7351 = vst [vmem:[#allocation65_spill] sm:$0xff] %v5249_v23 }
 0x2bb   :  { %v5214_v24 = vsub.f32 %v4974_v45, %v332_v2  ;;  %v384_v16 = vsel %vm277_vm0, %v362_v14, 0.0  ;;  %v752_v2 = vmul.f32 %v5118_v5, %v736_v58  ;;  %v5227_v14 = vadd.f32 %v5131_v46, %v754_v42 }
 0x2bc   :  { %v301_v33 = vpop.xlane.xlu1 %300  ;;  %385 = vadd.xlane.f32.xlu1 %v384_v16  ;;  %v789_v16 = vmax.f32 %v787_v6, %v788_v26  ;;  %v5244_v58 = vadd.f32 %v5131_v46, %v747_v12 }
 0x2bd   :  { %v334_v25 = vmul.f32 0.03125, %v301_v33  ;;  %v364_v10 = vmul.f32 %v5214_v24, %v5214_v24  ;;  %7345 = vst [vmem:[#allocation59_spill] sm:$0xff] %v5227_v14  ;;  %v5252_v18 = vadd.f32 %v5131_v46, %v752_v2  ;;  %v5256_v37 = vsel %vm277_vm0, %v5227_v14, -inf }
 0x2be   :  { %7350 = vst [vmem:[#allocation64_spill] sm:$0xff] %v5244_v58  ;;  %7353 = vst [vmem:[#allocation67_spill] sm:$0xff] %v5256_v37  ;;  %v5266_v33 = vsel %vm277_vm0, %v5237_v47, -inf  ;;  %v790_v12 = vrot.slane %v789_v16, 4  ;;  %v5279_v6 = vsel %vm277_vm0, %v5244_v58, -inf  ;;  %v5283_v2 = vsel %vm277_vm0, %v5249_v23, -inf }
 0x2bf   :  { %v4222_v27 = vpop.eup %4221  ;;  %v5233_v44 = vsub.f32 %v5003_v3, %v334_v25  ;;  %v390_v39 = vsel %vm277_vm0, %v364_v10, 0.0  ;;  %7352 = vst [vmem:[#allocation66_spill] sm:$0xff] %v5252_v18  ;;  %7355 = vst [vmem:[#allocation69_spill] sm:$0xff] %v5266_v33  ;;  %v5270_v25 = vsel %vm277_vm0, %v5240_v4, -inf }
 0x2c0   :  { %v732_v30 = vmul.f32 %v4222_v27, %v4994_v59  ;;  %391 = vadd.xlane.f32.xlu1 %v390_v39  ;;  %v5261_v59 = vsel %vm277_vm0, %v5230_v15, -inf  ;;  %7356 = vst [vmem:[#allocation70_spill] sm:$0xff] %v5270_v25  ;;  %7358 = vst [vmem:[#allocation72_spill] sm:$0xff] %v5279_v6  ;;  %v5287_v27 = vsel %vm277_vm0, %v5252_v18, -inf }
 0x2c1   :  { %7347 = vst [vmem:[#allocation61_spill] sm:$0xff] %v5233_v44  ;;  %v366_v42 = vmul.f32 %v5233_v44, %v5233_v44  ;;  %7354 = vst [vmem:[#allocation68_spill] sm:$0xff] %v5261_v59  ;;  %v1104_v1 = vmax.f32 %v5261_v59, %v5256_v37 }
 0x2c2   :  { %v748_v26 = vmul.f32 %v5118_v5, %v732_v30  ;;  %v1098_v30 = vmax.f32 %v5279_v6, %v5266_v33 }
 0x2c3   :  { %v396_v57 = vsel %vm277_vm0, %v366_v42, 0.0  ;;  %v1102_v42 = vmax.f32 %v5283_v2, %v5270_v25 }
 0x2c4   :  { %v5273_v10 = vadd.f32 %v5131_v46, %v748_v26  ;;  %397 = vadd.xlane.f32.xlu1 %v396_v57  ;;  %v791_v57 = vmax.f32 %v789_v16, %v790_v12 }
 0x2c5   :  { %v1106_v3 = vmax.f32 %v1102_v42, %v1104_v1 }
 0x2c6   :  { %7357 = vst [vmem:[#allocation71_spill] sm:$0xff] %v5273_v10  ;;  %v5291_v39 = vsel %vm277_vm0, %v5273_v10, -inf  ;;  %v792_v20 = vrot.slane %v791_v57, 2 }
 0x2c7   :  { %v1100_v26 = vmax.f32 %v5291_v39, %v5287_v27 }
 0x2c8   :  { %v793_v13 = vmax.f32 %v791_v57, %v792_v20 }
 0x2c9   :  { %v1105_v45 = vmax.f32 %v1098_v30, %v1100_v26 }
 0x2ca   :  { %v794_v59 = vrot.slane %v793_v13, 1 }
 0x2cb   :  { %v1107_v40 = vmax.f32 %v1105_v45, %v1106_v3 }
 0x2cc   :  { %v5299_v44 = vmax.f32 %v793_v13, %v794_v59 }
 0x2cd   :  { %v1108_v17 = vrot.slane %v1107_v40, 4 }
 0x2ce   :  { %v796_v25 = vsub.f32 %v5150_v0, %v5299_v44  ;;  %v797_v16 = vsub.f32 %v5153_v22, %v5299_v44  ;;  %v799_v3 = vsub.f32 %v5141_v8, %v5299_v44  ;;  %v800_v59 = vsub.f32 %v5159_v41, %v5299_v44 }
 0x2cf   :  { %v1109_v9 = vmax.f32 %v1107_v40, %v1108_v17  ;;  %v801_v30 = vsub.f32 %v5144_v7, %v5299_v44 }
 0x2d0   :  { %v804_v12 = vmul.f32 1.442695, %v796_v25  ;;  %v806_v17 = vmul.f32 1.442695, %v797_v16  ;;  %v812_v26 = vmul.f32 1.442695, %v800_v59 }
 0x2d1   :  { %v1110_v37 = vrot.slane %v1109_v9, 2 }
 0x2d2   :  { %4223 = vpow2.f32 %v804_v12 }
 0x2d3   :  { %v1111_v48 = vmax.f32 %v1109_v9, %v1110_v37  ;;  %v798_v9 = vsub.f32 %v5156_v51, %v5299_v44  ;;  %4225 = vpow2.f32 %v806_v17 }
 0x2d5   :  { %v1112_v33 = vrot.slane %v1111_v48, 1 }
 0x2d7   :  { %v5301_v6 = vmax.f32 %v1111_v48, %v1112_v33  ;;  %v808_v48 = vmul.f32 1.442695, %v798_v9  ;;  %v810_v33 = vmul.f32 1.442695, %v799_v3  ;;  %v814_v9 = vmul.f32 1.442695, %v801_v30 }
 0x2d9   :  { %v1114_v45 = vsub.f32 %v5244_v58, %v5301_v6  ;;  %v1115_v20 = vsub.f32 %v5273_v10, %v5301_v6  ;;  %v1116_v37 = vsub.f32 %v5249_v23, %v5301_v6  ;;  %v1117_v25 = vsub.f32 %v5230_v15, %v5301_v6 }
 0x2da   :  { %v1118_v12 = vsub.f32 %v5237_v47, %v5301_v6 }
 0x2db   :  { %v1122_v13 = vmul.f32 1.442695, %v1114_v45  ;;  %v1124_v40 = vmul.f32 1.442695, %v1115_v20  ;;  %v1126_v1 = vmul.f32 1.442695, %v1116_v37  ;;  %v802_v20 = vsub.f32 %v5147_v32, %v5299_v44 }
 0x2dc   :  { %v5323_v42 = vpop.eup %4223  ;;  %v1128_v45 = vmul.f32 1.442695, %v1117_v25  ;;  %v1130_v25 = vmul.f32 1.442695, %v1118_v12 }
 0x2dd   :  { %4227 = vpow2.f32 %v1122_v13  ;;  %v5325_v57 = vpop.eup %4225  ;;  %v820_v3 = vsel %vm277_vm0, %v5323_v42, 0.0 }
 0x2de   :  { %4229 = vpow2.f32 %v1124_v40 }
 0x2df   :  { %4231 = vpow2.f32 %v808_v48  ;;  %v821_v48 = vsel %vm277_vm0, %v5325_v57, 0.0 }
 0x2e0   :  { %4233 = vpow2.f32 %v810_v33  ;;  %v1119_v33 = vsub.f32 %v5252_v18, %v5301_v6  ;;  %v1120_v18 = vsub.f32 %v5240_v4, %v5301_v6 }
 0x2e1   :  { %4235 = vpow2.f32 %v1126_v1 }
 0x2e2   :  { %4237 = vpow2.f32 %v812_v26  ;;  %v803_v26 = vsub.f32 %v5138_v28, %v5299_v44  ;;  %v1132_v44 = vmul.f32 1.442695, %v1119_v33  ;;  %v1134_v4 = vmul.f32 1.442695, %v1120_v18 }
 0x2e3   :  { %4239 = vpow2.f32 %v1128_v45 }
 0x2e4   :  { %4241 = vpow2.f32 %v814_v9 }
 0x2e5   :  { %4243 = vpow2.f32 %v1130_v25 }
 0x2e7   :  { %v5331_v13 = vpop.eup %4227 }
 0x2e8   :  { %v5340_v37 = vpop.eup %4229  ;;  %v1138_v12 = vsel %vm277_vm0, %v5331_v13, 0.0 }
 0x2e9   :  { %v1139_v45 = vsel %vm277_vm0, %v5340_v37, 0.0 }
 0x2ef   :  { %v304_v16 = vpop.xlane.xlu0 %303 }
 0x2f0   :  { %v335_v17 = vmul.f32 0.03125, %v304_v16  ;;  %v5346_v16 = vpop.eup %4231 }
 0x2f2   :  { %v5334_v40 = vsub.f32 %v5033_v49, %v335_v17  ;;  %v816_v17 = vmul.f32 1.442695, %v802_v20  ;;  %v822_v49 = vadd.f32 %v821_v48, %v820_v3  ;;  %v5360_v20 = vpop.eup %4233  ;;  %v823_v48 = vsel %vm277_vm0, %v5346_v16, 0.0 }
 0x2f3   :  { %v307_v59 = vpop.xlane.xlu1 %306 }
 0x2f4   :  { %v336_v1 = vmul.f32 0.03125, %v307_v59  ;;  %v367_v30 = vmul.f32 %v5334_v40, %v5334_v40  ;;  %4245 = vpow2.f32 %v816_v17 }
 0x2f5   :  { %4247 = vpow2.f32 %v1132_v44 }
 0x2f6   :  { %v5351_v47 = vsub.f32 %v5039_v54, %v336_v1  ;;  %v399_v15 = vsel %vm277_vm0, %v367_v30, 0.0  ;;  %v5366_v1 = vpop.eup %4235  ;;  %v824_v30 = vadd.f32 %v823_v48, %v822_v49  ;;  %v1140_v54 = vadd.f32 %v1139_v45, %v1138_v12 }
 0x2f7   :  { %400 = vadd.xlane.f32.xlu0 %v399_v15  ;;  %v310_v59 = vpop.xlane.xlu0 %309  ;;  %v818_v15 = vmul.f32 1.442695, %v803_v26  ;;  %v5374_v10 = vpop.eup %4237  ;;  %v825_v26 = vsel %vm277_vm0, %v5360_v20, 0.0  ;;  %v1141_v12 = vsel %vm277_vm0, %v5366_v1, 0.0 }
 0x2f8   :  { %v337_v9 = vmul.f32 0.03125, %v310_v59  ;;  %v368_v3 = vmul.f32 %v5351_v47, %v5351_v47  ;;  %v1121_v59 = vsub.f32 %v5227_v14, %v5301_v6  ;;  %v5382_v17 = vpop.eup %4239  ;;  %v826_v45 = vadd.f32 %v825_v26, %v824_v30 }
 0x2f9   :  { %4249 = vpow2.f32 %v818_v15  ;;  %v5388_v44 = vpop.eup %4241  ;;  %v827_v30 = vsel %vm277_vm0, %v5374_v10, 0.0 }
 0x2fa   :  { %v5369_v23 = vsub.f32 %v5043_v62, %v337_v9  ;;  %v402_v25 = vsel %vm277_vm0, %v368_v3, 0.0  ;;  %v1142_v9 = vadd.f32 %v1141_v12, %v1140_v54  ;;  %4251 = vpow2.f32 %v1134_v4 }
 0x2fb   :  { %v313_v33 = vpop.xlane.xlu1 %312  ;;  %403 = vadd.xlane.f32.xlu1 %v402_v25  ;;  %v1136_v48 = vmul.f32 1.442695, %v1121_v59  ;;  %v1143_v54 = vsel %vm277_vm0, %v5382_v17, 0.0  ;;  %v828_v15 = vadd.f32 %v827_v30, %v826_v45 }
 0x2fc   :  { %v338_v58 = vmul.f32 0.03125, %v313_v33  ;;  %v369_v49 = vmul.f32 %v5369_v23, %v5369_v23 }
 0x2fd   :  { %4253 = vpow2.f32 %v1136_v48 }
 0x2fe   :  { %v5385_v6 = vsub.f32 %v5047_v55, %v338_v58  ;;  %v405_v18 = vsel %vm277_vm0, %v369_v49, 0.0  ;;  %v5396_v58 = vpop.eup %4243  ;;  %v1144_v49 = vadd.f32 %v1143_v54, %v1142_v9  ;;  %v829_v55 = vsel %vm277_vm0, %v5388_v44, 0.0 }
 0x2ff   :  { %406 = vadd.xlane.f32.xlu0 %v405_v18  ;;  %v316_v3 = vpop.xlane.xlu0 %315  ;;  %v5402_v12 = vpop.eup %4245  ;;  %v1145_v45 = vsel %vm277_vm0, %v5396_v58, 0.0 }
 0x300   :  { %v339_v25 = vmul.f32 0.03125, %v316_v3  ;;  %v370_v33 = vmul.f32 %v5385_v6, %v5385_v6  ;;  %v5410_v9 = vpop.eup %4247  ;;  %v1146_v30 = vadd.f32 %v1145_v45, %v1144_v49  ;;  %v831_v62 = vsel %vm277_vm0, %v5402_v12, 0.0 }
 0x302   :  { %v5399_v26 = vsub.f32 %v5051_v29, %v339_v25  ;;  %v408_v4 = vsel %vm277_vm0, %v370_v33, 0.0  ;;  %v830_v25 = vadd.f32 %v829_v55, %v828_v15  ;;  %v1147_v55 = vsel %vm277_vm0, %v5410_v9, 0.0 }
 0x303   :  { %v319_v59 = vpop.xlane.xlu1 %318  ;;  %409 = vadd.xlane.f32.xlu1 %v408_v4  ;;  %v5416_v4 = vpop.eup %4249 }
 0x304   :  { %v340_v18 = vmul.f32 0.03125, %v319_v59  ;;  %v371_v3 = vmul.f32 %v5399_v26, %v5399_v26  ;;  %v5424_v15 = vpop.eup %4251  ;;  %v832_v49 = vadd.f32 %v831_v62, %v830_v25 }
 0x305   :  { %v1149_v62 = vsel %vm277_vm0, %v5424_v15, 0.0 }
 0x306   :  { %v5413_v33 = vsub.f32 %v5058_v63, %v340_v18  ;;  %v411_v48 = vsel %vm277_vm0, %v371_v3, 0.0  ;;  %v1148_v18 = vadd.f32 %v1147_v55, %v1146_v30 }
 0x307   :  { %412 = vadd.xlane.f32.xlu0 %v411_v48  ;;  %v322_v54 = vpop.xlane.xlu0 %321  ;;  %v833_v48 = vsel %vm277_vm0, %v5416_v4, 0.0  ;;  %v5436_v25 = vpop.eup %4253 }
 0x308   :  { %v341_v59 = vmul.f32 0.03125, %v322_v54  ;;  %v372_v29 = vmul.f32 %v5413_v33, %v5413_v33  ;;  %v834_v30 = vadd.f32 %v833_v48, %v832_v49  ;;  %v1151_v7 = vsel %vm277_vm0, %v5436_v25, 0.0 }
 0x30a   :  { %v5427_v3 = vsub.f32 %v5065_v61, %v341_v59  ;;  %v414_v45 = vsel %vm277_vm0, %v372_v29, 0.0  ;;  %v1150_v59 = vadd.f32 %v1149_v62, %v1148_v18  ;;  %v835_v41 = vrot.slane %v834_v30, 4 }
 0x30b   :  { %v325_v54 = vpop.xlane.xlu1 %324  ;;  %415 = vadd.xlane.f32.xlu1 %v414_v45  ;;  %v377_v63 = vpop.xlane.xlu0 %376 }
 0x30c   :  { %v342_v14 = vmul.f32 0.03125, %v325_v54  ;;  %v423_v28 = vmul.f32 0.03125, %v377_v63  ;;  %v373_v32 = vmul.f32 %v5427_v3, %v5427_v3  ;;  %v1152_v8 = vadd.f32 %v1151_v7, %v1150_v59 }
 0x30e   :  { %v5439_v29 = vsub.f32 %v5074_v36, %v342_v14  ;;  %v439_v55 = vadd.f32 1e-05, %v423_v28  ;;  %v417_v61 = vsel %vm277_vm0, %v373_v32, 0.0  ;;  %v836_v28 = vadd.f32 %v835_v41, %v834_v30 }
 0x30f   :  { %v380_v45 = vpop.xlane.xlu1 %379  ;;  %418 = vadd.xlane.f32.xlu0 %v417_v61  ;;  %v1153_v14 = vrot.slane %v1152_v8, 4 }
 0x310   :  { %4255 = vrsqrt.f32 %v439_v55  ;;  %v424_v63 = vmul.f32 0.03125, %v380_v45  ;;  %v374_v54 = vmul.f32 %v5439_v29, %v5439_v29  ;;  %v837_v32 = vrot.slane %v836_v28, 2 }
 0x311   :  { %v1154_v48 = vadd.f32 %v1153_v14, %v1152_v8 }
 0x312   :  { %v440_v49 = vadd.f32 1e-05, %v424_v63  ;;  %v420_v18 = vsel %vm277_vm0, %v374_v54, 0.0  ;;  %v838_v55 = vadd.f32 %v837_v32, %v836_v28  ;;  %v383_v28 = vpop.xlane.xlu0 %382 }
 0x313   :  { %421 = vadd.xlane.f32.xlu1 %v420_v18  ;;  %v1155_v45 = vrot.slane %v1154_v48, 2 }
 0x314   :  { %4257 = vrsqrt.f32 %v440_v49  ;;  %v839_v59 = vrot.slane %v838_v55, 1 }
 0x315   :  { %v1156_v63 = vadd.f32 %v1155_v45, %v1154_v48 }
 0x316   :  { %v840_v8 = vadd.f32 %v839_v59, %v838_v55  ;;  %v425_v59 = vmul.f32 0.03125, %v383_v28 }
 0x317   :  { %v1157_v49 = vrot.slane %v1156_v63, 1 }
 0x318   :  { %4259 = vrcp.f32 %v840_v8 }
 0x31a   :  { %v4256_v61 = vpop.eup %4255 }
 0x31b   :  { %v471_v62 = vmul.f32 %v4256_v61, %v5056_v21  ;;  %v1158_v21 = vadd.f32 %v1157_v49, %v1156_v63 }
 0x31d   :  { %v493_v22 = vmul.f32 %v5118_v5, %v471_v62  ;;  %4261 = vrcp.f32 %v1158_v21 }
 0x31e   :  { %v4258_v36 = vpop.eup %4257 }
 0x31f   :  { %v472_v51 = vmul.f32 %v4258_v36, %v5063_v38  ;;  %v515_v54 = vadd.f32 %v5131_v46, %v493_v22 }
 0x321   :  { %v494_v7 = vmul.f32 %v5118_v5, %v472_v51 }
 0x322   :  { %v4260_v18 = vpop.eup %4259 }
 0x323   :  { %v516_v41 = vadd.f32 %v5131_v46, %v494_v7  ;;  %v842_v36 = vmul.f32 %v4260_v18, %v5323_v42  ;;  %v843_v38 = vmul.f32 %v4260_v18, %v5325_v57  ;;  %v844_v14 = vmul.f32 %v4260_v18, %v5346_v16  ;;  %v389_v16 = vpop.xlane.xlu0 %388 }
 0x324   :  { %v845_v61 = vmul.f32 %v4260_v18, %v5360_v20  ;;  %v846_v62 = vmul.f32 %v4260_v18, %v5374_v10  ;;  %v847_v55 = vmul.f32 %v4260_v18, %v5388_v44 }
 0x325   :  { %v771_v30 = vpack.c.bf16 %v516_v41, %v515_v54  ;;  %v850_v22 = vpack.c.bf16 %v843_v38, %v842_v36  ;;  %v441_v54 = vadd.f32 1e-05, %v425_v59  ;;  %v427_v41 = vmul.f32 0.03125, %v389_v16 }
 0x326   :  { %v851_v42 = vpack.c.bf16 %v845_v61, %v844_v14  ;;  %v852_v63 = vpack.c.bf16 %v847_v55, %v846_v62 }
 0x327   :  { %4039 = vmatprep.subr.bf16.mxu0 %v771_v30  ;;  %v4262_v51 = vpop.eup %4261  ;;  %4263 = vrsqrt.f32 %v441_v54  ;;  %v7362_v54 = vld [vmem:[#allocation68_spill] sm:$0xff] }
 0x328   :  { %4040 = vmatpush3.bf16.msra.mxu0 %v771_v30  ;;  %v1160_v32 = vmul.f32 %v4262_v51, %v5331_v13  ;;  %v1161_v48 = vmul.f32 %v4262_v51, %v5340_v37  ;;  %v1162_v57 = vmul.f32 %v4262_v51, %v5366_v1  ;;  %v1163_v7 = vmul.f32 %v4262_v51, %v5382_v17  ;;  %v395_v1 = vpop.xlane.xlu0 %394 }
 0x329   :  { %v848_v13 = vmul.f32 %v4260_v18, %v5402_v12  ;;  %v849_v37 = vmul.f32 %v4260_v18, %v5416_v4  ;;  %v1164_v10 = vmul.f32 %v4262_v51, %v5396_v58  ;;  %v1165_v44 = vmul.f32 %v4262_v51, %v5410_v9 }
 0x32a   :  { %v1168_v45 = vpack.c.bf16 %v1161_v48, %v1160_v32  ;;  %v1169_v20 = vpack.c.bf16 %v1163_v7, %v1162_v57  ;;  %v1166_v8 = vmul.f32 %v4262_v51, %v5424_v15  ;;  %v1167_v49 = vmul.f32 %v4262_v51, %v5436_v25 }
 0x32b   :  { %v1170_v17 = vpack.c.bf16 %v1165_v44, %v1164_v10  ;;  %v853_v30 = vpack.c.bf16 %v849_v37, %v848_v13  ;;  %v443_v12 = vadd.f32 1e-05, %v427_v41  ;;  %v429_v4 = vmul.f32 0.03125, %v395_v1  ;;  %v7359_v37 = vld [vmem:[#allocation61_spill] sm:$0xff]  ;;  %v7361_v10 = vld [vmem:[#allocation72_spill] sm:$0xff]  ;;  %v7364_v1 = vld [vmem:[#allocation70_spill] sm:$0xff] }
 0x32c   :  { %v1171_v18 = vpack.c.bf16 %v1167_v49, %v1166_v8  ;;  %v7363_v41 = vld [vmem:[#allocation69_spill] sm:$0xff] }
 0x32d   :  { %4265 = vrsqrt.f32 %v443_v12  ;;  %v445_v9 = vadd.f32 1e-05, %v429_v4 }
 0x331   :  { %v4264_v15 = vpop.eup %4263 }
 0x332   :  { %v473_v32 = vmul.f32 %v4264_v15, %v5070_v50 }
 0x334   :  { %v495_v62 = vmul.f32 %v5118_v5, %v473_v32 }
 0x336   :  { %v517_v50 = vadd.f32 %v5131_v46, %v495_v62 }
 0x337   :  { %v4266_v48 = vpop.eup %4265 }
 0x338   :  { %v475_v55 = vmul.f32 %v4266_v48, %v5080_v34 }
 0x33c   :  { %938 = vxpose.xlu0.c.b16.start [1/4] (short) (narrow) %v850_v22, 32 }
 0x340   :  { %1256 = vxpose.xlu1.c.b16.start [1/4] (short) (narrow) %v1168_v45, 32  ;;  %939 = vxpose.xlu0.c.b16.cont [2/4] (short) (narrow) %v851_v42, 32 }
 0x344   :  { %1257 = vxpose.xlu1.c.b16.cont [2/4] (short) (narrow) %v1169_v20, 32  ;;  %940 = vxpose.xlu0.c.b16.cont [3/4] (short) (narrow) %v852_v63, 32  ;;  %v7360_v63 = vld [vmem:[#allocation58_spill] sm:$0xff] }
 0x348   :  { %1258 = vxpose.xlu1.c.b16.cont [3/4] (short) (narrow) %v1170_v17, 32  ;;  %941 = vxpose.xlu0.c.b16.end [4/4] (short) (narrow) %v853_v30, 32  ;;  %v7365_v17 = vld [vmem:[#allocation67_spill] sm:$0xff] }
 0x349   :  { %v386_v21 = vpop.xlane.xlu1 %385 }
 0x34a   :  { %v426_v58 = vmul.f32 0.03125, %v386_v21 }
 0x34c   :  { %v442_v36 = vadd.f32 1e-05, %v426_v58  ;;  %1259 = vxpose.xlu1.c.b16.end [4/4] (short) (narrow) %v1171_v18, 32 }
 0x34d   :  { %v392_v38 = vpop.xlane.xlu1 %391 }
 0x34e   :  { %4267 = vrsqrt.f32 %v442_v36  ;;  %v428_v28 = vmul.f32 0.03125, %v392_v38 }
 0x34f   :  { %4269 = vrsqrt.f32 %v445_v9 }
 0x350   :  { %v444_v14 = vadd.f32 1e-05, %v428_v28 }
 0x351   :  { %v398_v22 = vpop.xlane.xlu1 %397 }
 0x352   :  { %4271 = vrsqrt.f32 %v444_v14  ;;  %v430_v25 = vmul.f32 0.03125, %v398_v22 }
 0x354   :  { %v446_v51 = vadd.f32 1e-05, %v430_v25 }
 0x355   :  { %854 = vmax.xlane.f32.xlu0 %v5210_v31  ;;  %v497_v31 = vmul.f32 %v5118_v5, %v475_v55 }
 0x356   :  { %4273 = vrsqrt.f32 %v446_v51 }
 0x357   :  { %v519_v13 = vadd.f32 %v5131_v46, %v497_v31 }
 0x358   :  { %v4268_v61 = vpop.eup %4267 }
 0x359   :  { %856 = vmax.xlane.f32.xlu1 %v5186_v60  ;;  %858 = vmax.xlane.f32.xlu0 %v5194_v19  ;;  %v474_v45 = vmul.f32 %v4268_v61, %v5182_v53  ;;  %v4270_v42 = vpop.eup %4269 }
 0x35a   :  { %v477_v19 = vmul.f32 %v4270_v42, %v5087_v56 }
 0x35b   :  { %v496_v57 = vmul.f32 %v5118_v5, %v474_v45 }
 0x35c   :  { %v4272_v7 = vpop.eup %4271  ;;  %v499_v20 = vmul.f32 %v5118_v5, %v477_v19 }
 0x35d   :  { %860 = vmax.xlane.f32.xlu1 %v5171_v35  ;;  %862 = vmax.xlane.f32.xlu0 %v5198_v52  ;;  %v518_v34 = vadd.f32 %v5131_v46, %v496_v57  ;;  %v476_v60 = vmul.f32 %v4272_v7, %v5214_v24 }
 0x35e   :  { %v521_v44 = vadd.f32 %v5131_v46, %v499_v20 }
 0x35f   :  { %v772_v59 = vpack.c.bf16 %v518_v34, %v517_v50  ;;  %v498_v53 = vmul.f32 %v5118_v5, %v476_v60 }
 0x360   :  { %v4274_v16 = vpop.eup %4273 }
 0x361   :  { %864 = vmax.xlane.f32.xlu1 %v5175_v11  ;;  %866 = vmax.xlane.f32.xlu0 %v5179_v43  ;;  %v520_v35 = vadd.f32 %v5131_v46, %v498_v53  ;;  %v478_v52 = vmul.f32 %v4274_v16, %v7359_v37 }
 0x362   :  { %4041 = vmatprep.subr.bf16.mxu0 %v772_v59 }
 0x363   :  { %4042 = vmatpush3.bf16.msra.mxu0 %v772_v59  ;;  %v773_v24 = vpack.c.bf16 %v520_v35, %v519_v13  ;;  %v500_v56 = vmul.f32 %v5118_v5, %v478_v52 }
 0x365   :  { %868 = vmax.xlane.f32.xlu1 %v7360_v63  ;;  %1172 = vmax.xlane.f32.xlu0 %v7361_v10  ;;  %v522_v11 = vadd.f32 %v5131_v46, %v500_v56 }
 0x366   :  { %4043 = vmatprep.subr.bf16.mxu0 %v773_v24 }
 0x367   :  { %4044 = vmatpush3.bf16.msra.mxu0 %v773_v24  ;;  %v774_v43 = vpack.c.bf16 %v522_v11, %v521_v44 }
 0x369   :  { %1174 = vmax.xlane.f32.xlu1 %v5291_v39  ;;  %1176 = vmax.xlane.f32.xlu0 %v5283_v2 }
 0x36a   :  { %4045 = vmatprep.subr.bf16.mxu0 %v774_v43 }
 0x36b   :  { %4046 = vmatpush3.bf16.msra.mxu0 %v774_v43 }
 0x36d   :  { %1178 = vmax.xlane.f32.xlu1 %v7362_v54  ;;  %1180 = vmax.xlane.f32.xlu0 %v7363_v41 }
 0x371   :  { %1182 = vmax.xlane.f32.xlu1 %v5287_v27  ;;  %1184 = vmax.xlane.f32.xlu0 %v7364_v1 }
 0x375   :  { %1186 = vmax.xlane.f32.xlu1 %v7365_v17 }
 0x384   :  { %v401_v30 = vpop.xlane.xlu0 %400 }
 0x385   :  { %v431_v8 = vmul.f32 0.03125, %v401_v30 }
 0x387   :  { %v447_v49 = vadd.f32 1e-05, %v431_v8 }
 0x388   :  { %v404_v12 = vpop.xlane.xlu1 %403 }
 0x389   :  { %4275 = vrsqrt.f32 %v447_v49  ;;  %v432_v39 = vmul.f32 0.03125, %v404_v12 }
 0x38b   :  { %v448_v4 = vadd.f32 1e-05, %v432_v39 }
 0x38c   :  { %v407_v2 = vpop.xlane.xlu0 %406 }
 0x38d   :  { %4277 = vrsqrt.f32 %v448_v4  ;;  %v433_v21 = vmul.f32 0.03125, %v407_v2 }
 0x38f   :  { %v449_v58 = vadd.f32 1e-05, %v433_v21 }
 0x390   :  { %v410_v18 = vpop.xlane.xlu1 %409 }
 0x391   :  { %4279 = vrsqrt.f32 %v449_v58  ;;  %v434_v9 = vmul.f32 0.03125, %v410_v18  ;;  %v7366_v58 = vld [vmem:[#allocation55_spill] sm:$0xff] }
 0x393   :  { %v4276_v36 = vpop.eup %4275  ;;  %v450_v27 = vadd.f32 1e-05, %v434_v9 }
 0x394   :  { %v413_v38 = vpop.xlane.xlu0 %412  ;;  %v479_v28 = vmul.f32 %v4276_v36, %v5334_v40 }
 0x395   :  { %4281 = vrsqrt.f32 %v450_v27  ;;  %v435_v14 = vmul.f32 0.03125, %v413_v38 }
 0x396   :  { %v501_v32 = vmul.f32 %v5118_v5, %v479_v28  ;;  %v7368_v28 = vld [vmem:[#allocation52_spill] sm:$0xff] }
 0x397   :  { %v4278_v15 = vpop.eup %4277  ;;  %v451_v22 = vadd.f32 1e-05, %v435_v14 }
 0x398   :  { %v416_v25 = vpop.xlane.xlu1 %415  ;;  %v480_v51 = vmul.f32 %v4278_v15, %v5351_v47  ;;  %v523_v42 = vadd.f32 %v5131_v46, %v501_v32  ;;  %v7369_v15 = vld [vmem:[#allocation57_spill] sm:$0xff] }
 0x399   :  { %4283 = vrsqrt.f32 %v451_v22  ;;  %v436_v48 = vmul.f32 0.03125, %v416_v25 }
 0x39a   :  { %v502_v61 = vmul.f32 %v5118_v5, %v480_v51 }
 0x39b   :  { %v4280_v62 = vpop.eup %4279  ;;  %v452_v55 = vadd.f32 1e-05, %v436_v48  ;;  %v7370_v48 = vld [vmem:[#allocation53_spill] sm:$0xff] }
 0x39c   :  { %v419_v45 = vpop.xlane.xlu0 %418  ;;  %v524_v40 = vadd.f32 %v5131_v46, %v502_v61  ;;  %v481_v57 = vmul.f32 %v4280_v62, %v5369_v23  ;;  %v7371_v62 = vld [vmem:[#allocation54_spill] sm:$0xff] }
 0x39d   :  { %4285 = vrsqrt.f32 %v452_v55  ;;  %v437_v7 = vmul.f32 0.03125, %v419_v45 }
 0x39e   :  { %v1089_v50 = vpack.c.bf16 %v524_v40, %v523_v42  ;;  %v503_v19 = vmul.f32 %v5118_v5, %v481_v57 }
 0x39f   :  { %v4282_v31 = vpop.eup %4281  ;;  %v453_v47 = vadd.f32 1e-05, %v437_v7 }
 0x3a0   :  { %v422_v34 = vpop.xlane.xlu1 %421  ;;  %4063 = vmatprep.subr.bf16.mxu1 %v1089_v50  ;;  %v482_v60 = vmul.f32 %v4282_v31, %v5385_v6  ;;  %v525_v35 = vadd.f32 %v5131_v46, %v503_v19  ;;  %v7372_v31 = vld [vmem:[#allocation51_spill] sm:$0xff] }
 0x3a1   :  { %4287 = vrsqrt.f32 %v453_v47  ;;  %v438_v59 = vmul.f32 0.03125, %v422_v34  ;;  %4064 = vmatpush3.bf16.msra.mxu1 %v1089_v50  ;;  %v7373_v34 = vld [vmem:[#allocation64_spill] sm:$0xff] }
 0x3a2   :  { %v504_v53 = vmul.f32 %v5118_v5, %v482_v60  ;;  %v946_v16 = vpop.trf.xlu0 }
 0x3a3   :  { %v4284_v13 = vpop.eup %4283  ;;  %v454_v23 = vadd.f32 1e-05, %v438_v59  ;;  %4047 = vmatprep.mubr.msk.bf16.mxu0 %vm954_vm1, %v946_v16 }
 0x3a4   :  { %v526_v37 = vadd.f32 %v5131_v46, %v504_v53  ;;  %v483_v52 = vmul.f32 %v4284_v13, %v5399_v26 }
 0x3a5   :  { %4289 = vrsqrt.f32 %v454_v23 }
 0x3a6   :  { %v1090_v6 = vpack.c.bf16 %v526_v37, %v525_v35  ;;  %v947_v20 = vpop.trf.xlu0  ;;  %v1264_v24 = vpop.trf.xlu1  ;;  %v505_v10 = vmul.f32 %v5118_v5, %v483_v52  ;;  %v7374_v37 = vld [vmem:[#allocation71_spill] sm:$0xff] }
 0x3a7   :  { %v4286_v56 = vpop.eup %4285  ;;  %4048 = vmatmul.mubr.msk.bf16.vlgmr.msra.gmra.mrb[0].mxu0 %vm954_vm1, %v947_v20  ;;  %4071 = vmatprep.mubr.msk.bf16.mxu1 %vm954_vm1, %v1264_v24 }
 0x3a8   :  { %4065 = vmatprep.subr.bf16.mxu1 %v1090_v6  ;;  %v484_v63 = vmul.f32 %v4286_v56, %v5413_v33  ;;  %v527_v26 = vadd.f32 %v5131_v46, %v505_v10 }
 0x3a9   :  { %4066 = vmatpush3.bf16.msra.mxu1 %v1090_v6  ;;  %v7375_v6 = vld [vmem:[#allocation65_spill] sm:$0xff] }
 0x3aa   :  { %v506_v44 = vmul.f32 %v5118_v5, %v484_v63  ;;  %v1265_v39 = vpop.trf.xlu1 }
 0x3ab   :  { %v4288_v11 = vpop.eup %4287 }
 0x3ac   :  { %v528_v43 = vadd.f32 %v5131_v46, %v506_v44  ;;  %v485_v54 = vmul.f32 %v4288_v11, %v5427_v3 }
 0x3ae   :  { %v1091_v41 = vpack.c.bf16 %v528_v43, %v527_v26  ;;  %v507_v30 = vmul.f32 %v5118_v5, %v485_v54  ;;  %v7376_v54 = vld [vmem:[#allocation60_spill] sm:$0xff] }
 0x3af   :  { %v4290_v1 = vpop.eup %4289 }
 0x3b0   :  { %4067 = vmatprep.subr.bf16.mxu1 %v1091_v41  ;;  %v486_v17 = vmul.f32 %v4290_v1, %v5439_v29  ;;  %v529_v8 = vadd.f32 %v5131_v46, %v507_v30  ;;  %v7377_v1 = vld [vmem:[#allocation62_spill] sm:$0xff] }
 0x3b1   :  { %4068 = vmatpush3.bf16.msra.mxu1 %v1091_v41 }
 0x3b2   :  { %v508_v33 = vmul.f32 %v5118_v5, %v486_v17  ;;  %v7367_v5 = vld [vmem:[#allocation56_spill] sm:$0xff] }
 0x3b4   :  { %v530_v49 = vadd.f32 %v5131_v46, %v508_v33 }
 0x3b6   :  { %v1092_v12 = vpack.c.bf16 %v530_v49, %v529_v8 }
 0x3b8   :  { %4069 = vmatprep.subr.bf16.mxu1 %v1092_v12 }
 0x3b9   :  { %4070 = vmatpush3.bf16.msra.mxu1 %v1092_v12 }
 0x3bc   :  { %4072 = vmatmul.mubr.msk.bf16.vlgmr.msra.gmra.mrb[0].mxu1 %vm954_vm1, %v1265_v39 }
 0x3e2   :  { %v855_v3 = vpop.xlane.xlu0 %854 }
 0x3e3   :  { %v870_v4 = vsub.f32 %v5150_v0, %v855_v3 }
 0x3e5   :  { %v878_v2 = vmul.f32 1.442695, %v870_v4 }
 0x3e6   :  { %v857_v29 = vpop.xlane.xlu1 %856  ;;  %v859_v21 = vpop.xlane.xlu0 %858 }
 0x3e7   :  { %4291 = vpow2.f32 %v878_v2  ;;  %v871_v18 = vsub.f32 %v7366_v58, %v857_v29  ;;  %v872_v9 = vsub.f32 %v7367_v5, %v859_v21  ;;  %v7378_v2 = vld [vmem:[#allocation66_spill] sm:$0xff]  ;;  %v7379_v21 = vld [vmem:[#allocation63_spill] sm:$0xff] }
 0x3e9   :  { %v880_v36 = vmul.f32 1.442695, %v871_v18  ;;  %v882_v27 = vmul.f32 1.442695, %v872_v9 }
 0x3ea   :  { %v861_v46 = vpop.xlane.xlu1 %860  ;;  %v863_v38 = vpop.xlane.xlu0 %862 }
 0x3eb   :  { %4293 = vpow2.f32 %v880_v36  ;;  %v873_v14 = vsub.f32 %v7368_v28, %v861_v46  ;;  %v874_v22 = vsub.f32 %v7369_v15, %v863_v38  ;;  %v7380_v28 = vld [vmem:[#allocation59_spill] sm:$0xff] }
 0x3ec   :  { %4295 = vpow2.f32 %v882_v27 }
 0x3ed   :  { %v884_v25 = vmul.f32 1.442695, %v873_v14  ;;  %v886_v0 = vmul.f32 1.442695, %v874_v22 }
 0x3ee   :  { %v865_v51 = vpop.xlane.xlu1 %864  ;;  %v867_v32 = vpop.xlane.xlu0 %866 }
 0x3ef   :  { %4297 = vpow2.f32 %v884_v25  ;;  %v875_v61 = vsub.f32 %v7370_v48, %v865_v51  ;;  %v876_v55 = vsub.f32 %v7371_v62, %v867_v32 }
 0x3f0   :  { %4299 = vpow2.f32 %v886_v0 }
 0x3f1   :  { %v5538_v45 = vpop.eup %4291  ;;  %v888_v42 = vmul.f32 1.442695, %v875_v61  ;;  %v890_v40 = vmul.f32 1.442695, %v876_v55 }
 0x3f2   :  { %v869_v57 = vpop.xlane.xlu1 %868  ;;  %v1173_v7 = vpop.xlane.xlu0 %1172  ;;  %v894_v50 = vsel %vm277_vm0, %v5538_v45, 0.0 }
 0x3f3   :  { %4301 = vpow2.f32 %v888_v42  ;;  %v877_v47 = vsub.f32 %v7372_v31, %v869_v57  ;;  %v1188_v60 = vsub.f32 %v7373_v34, %v1173_v7  ;;  %895 = vadd.xlane.f32.xlu0 %v894_v50  ;;  %v7382_v34 = vld [vmem:[#allocation20_spill] sm:$0xff] }
 0x3f4   :  { %4303 = vpow2.f32 %v890_v40 }
 0x3f5   :  { %v5544_v19 = vpop.eup %4293  ;;  %v892_v59 = vmul.f32 1.442695, %v877_v47  ;;  %v1196_v53 = vmul.f32 1.442695, %v1188_v60  ;;  %v7381_v47 = vld [vmem:[#allocation22_spill] sm:$0xff]  ;;  %v7383_v60 = vld [vmem:[#allocation24_spill] sm:$0xff] }
 0x3f6   :  { %v5546_v16 = vpop.eup %4295  ;;  %v1175_v13 = vpop.xlane.xlu1 %1174  ;;  %v897_v35 = vsel %vm277_vm0, %v5544_v19, 0.0 }
 0x3f7   :  { %v1177_v23 = vpop.xlane.xlu0 %1176  ;;  %4305 = vpow2.f32 %v892_v59  ;;  %v1189_v52 = vsub.f32 %v7374_v37, %v1175_v13  ;;  %898 = vadd.xlane.f32.xlu1 %v897_v35  ;;  %v900_v24 = vsel %vm277_vm0, %v5546_v16, 0.0  ;;  %v7384_v59 = vld [vmem:[#allocation25_spill] sm:$0xff]  ;;  %v7389_v37 = vld [vmem:[#allocation19_spill] sm:$0xff] }
 0x3f8   :  { %v1190_v20 = vsub.f32 %v7375_v6, %v1177_v23  ;;  %4307 = vpow2.f32 %v1196_v53  ;;  %901 = vadd.xlane.f32.xlu0 %v900_v24  ;;  %v7385_v53 = vld [vmem:[#allocation27_spill] sm:$0xff]  ;;  %v7386_v13 = vld [vmem:[#allocation29_spill] sm:$0xff] }
 0x3f9   :  { %v5554_v56 = vpop.eup %4297  ;;  %v1198_v63 = vmul.f32 1.442695, %v1189_v52  ;;  %v7387_v23 = vld [vmem:[#allocation31_spill] sm:$0xff]  ;;  %v7388_v35 = vld [vmem:[#allocation33_spill] sm:$0xff] }
 0x3fa   :  { %v1200_v10 = vmul.f32 1.442695, %v1190_v20  ;;  %v5556_v44 = vpop.eup %4299  ;;  %v1179_v11 = vpop.xlane.xlu1 %1178  ;;  %v903_v43 = vsel %vm277_vm0, %v5554_v56, 0.0  ;;  %v7390_v52 = vld [vmem:[#allocation21_spill] sm:$0xff]  ;;  %v7391_v6 = vld [vmem:[#allocation23_spill] sm:$0xff]  ;;  %v4177_v20 = vld [vmem:[#allocation5] sm:$0xff]  }
 0x3fb   :  { %v1181_v26 = vpop.xlane.xlu0 %1180  ;;  %4309 = vpow2.f32 %v1198_v63  ;;  %v1191_v41 = vsub.f32 %v7376_v54, %v1179_v11  ;;  %904 = vadd.xlane.f32.xlu1 %v903_v43  ;;  %v906_v30 = vsel %vm277_vm0, %v5556_v44, 0.0  ;;  %4087 = vmatprep.subr.bf16.mxu1 %v4177_v20 }
 0x3fc   :  { %v1192_v17 = vsub.f32 %v7377_v1, %v1181_v26  ;;  %4311 = vpow2.f32 %v1200_v10  ;;  %907 = vadd.xlane.f32.xlu0 %v906_v30  ;;  %4088 = vmatpush3.bf16.msra.mxu1 %v4177_v20 }
 0x3fd   :  { %v5564_v33 = vpop.eup %4301  ;;  %v1202_v8 = vmul.f32 1.442695, %v1191_v41 }
 0x3fe   :  { %v1204_v49 = vmul.f32 1.442695, %v1192_v17  ;;  %v5566_v12 = vpop.eup %4303  ;;  %v1183_v39 = vpop.xlane.xlu1 %1182  ;;  %v909_v4 = vsel %vm277_vm0, %v5564_v33, 0.0 }
 0x3ff   :  { %v1185_v3 = vpop.xlane.xlu0 %1184  ;;  %4313 = vpow2.f32 %v1202_v8  ;;  %v1193_v29 = vsub.f32 %v7378_v2, %v1183_v39  ;;  %910 = vadd.xlane.f32.xlu1 %v909_v4  ;;  %v912_v18 = vsel %vm277_vm0, %v5566_v12, 0.0 }
 0x400   :  { %v1194_v58 = vsub.f32 %v7379_v21, %v1185_v3  ;;  %4315 = vpow2.f32 %v1204_v49  ;;  %913 = vadd.xlane.f32.xlu0 %v912_v18 }
 0x401   :  { %v5574_v5 = vpop.eup %4305  ;;  %v1206_v9 = vmul.f32 1.442695, %v1193_v29 }
 0x402   :  { %v1208_v36 = vmul.f32 1.442695, %v1194_v58  ;;  %v5576_v27 = vpop.eup %4307  ;;  %v1187_v46 = vpop.xlane.xlu1 %1186  ;;  %v915_v38 = vsel %vm277_vm0, %v5574_v5, 0.0 }
 0x403   :  { %4317 = vpow2.f32 %v1206_v9  ;;  %v1195_v14 = vsub.f32 %v7380_v28, %v1187_v46  ;;  %916 = vadd.xlane.f32.xlu1 %v915_v38  ;;  %v1212_v15 = vsel %vm277_vm0, %v5576_v27, 0.0 }
 0x404   :  { %4319 = vpow2.f32 %v1208_v36  ;;  %1213 = vadd.xlane.f32.xlu0 %v1212_v15 }
 0x405   :  { %v5583_v22 = vpop.eup %4309  ;;  %v1210_v25 = vmul.f32 1.442695, %v1195_v14 }
 0x406   :  { %v5585_v0 = vpop.eup %4311  ;;  %v1215_v51 = vsel %vm277_vm0, %v5583_v22, 0.0 }
 0x407   :  { %4321 = vpow2.f32 %v1210_v25  ;;  %1216 = vadd.xlane.f32.xlu1 %v1215_v51  ;;  %v1218_v32 = vsel %vm277_vm0, %v5585_v0, 0.0 }
 0x408   :  { %1219 = vadd.xlane.f32.xlu0 %v1218_v32 }
 0x409   :  { %v5591_v48 = vpop.eup %4313 }
 0x40a   :  { %v5593_v61 = vpop.eup %4315  ;;  %v1221_v62 = vsel %vm277_vm0, %v5591_v48, 0.0 }
 0x40b   :  { %1222 = vadd.xlane.f32.xlu1 %v1221_v62  ;;  %v1224_v55 = vsel %vm277_vm0, %v5593_v61, 0.0 }
 0x40c   :  { %1225 = vadd.xlane.f32.xlu0 %v1224_v55 }
 0x40d   :  { %v5599_v42 = vpop.eup %4317 }
 0x40e   :  { %v5601_v40 = vpop.eup %4319  ;;  %v1227_v57 = vsel %vm277_vm0, %v5599_v42, 0.0 }
 0x40f   :  { %1228 = vadd.xlane.f32.xlu1 %v1227_v57  ;;  %v1230_v7 = vsel %vm277_vm0, %v5601_v40, 0.0 }
 0x410   :  { %1231 = vadd.xlane.f32.xlu0 %v1230_v7 }
 0x411   :  { %v5607_v50 = vpop.eup %4321 }
 0x412   :  { %v1233_v31 = vsel %vm277_vm0, %v5607_v50, 0.0 }
 0x413   :  { %1234 = vadd.xlane.f32.xlu1 %v1233_v31 }
 0x424   :  { %1831 = vrot.lane.b32.xlu1 %v7381_v47, %s4625_s3 }
 0x426   :  { %1829 = vrot.lane.b32.xlu0 %v7382_v34, %s4625_s3 }
 0x428   :  { %1833 = vrot.lane.b32.xlu1 %v7383_v60, %s4625_s3 }
 0x42a   :  { %1835 = vrot.lane.b32.xlu0 %v7384_v59, %s4625_s3 }
 0x42c   :  { %1837 = vrot.lane.b32.xlu1 %v7385_v53, %s4625_s3 }
 0x42e   :  { %1839 = vrot.lane.b32.xlu0 %v7386_v13, %s4625_s3 }
 0x430   :  { %1841 = vrot.lane.b32.xlu1 %v7387_v23, %s4625_s3 }
 0x432   :  { %1843 = vrot.lane.b32.xlu0 %v7388_v35, %s4625_s3 }
 0x434   :  { %1845 = vrot.lane.b32.xlu1 %v7389_v37, %s4625_s3 }
 0x436   :  { %1847 = vrot.lane.b32.xlu0 %v7390_v52, %s4625_s3 }
 0x438   :  { %1849 = vrot.lane.b32.xlu1 %v7391_v6, %s4625_s3 }
 0x47a   :  { %v4049_v24 = vpop.f32.mrb[0].mxu0 }
 0x47b   :  { %v995_v63 = vpop.f32.mrb[1].mxu0 }
 0x47c   :  { %v4050_v10 = vpop.f32.mrb[2].mxu0 }
 0x47d   :  { %v1011_v11 = vpack.c.bf16 %v4050_v10, %v4049_v24  ;;  %v998_v26 = vpop.f32.mrb[3].mxu0 }
 0x47e   :  { %v1010_v43 = vpack.c.bf16 %v998_v26, %v995_v63 }
 0x480   :  { %v896_v54 = vpop.xlane.xlu0 %895  ;;  %4051 = vmatprep.subr.bf16.mxu0 %v1010_v43 }
 0x481   :  { %4052 = vmatpush3.bf16.msra.mxu0 %v1010_v43  ;;  %4323 = vrcp.f32 %v896_v54 }
 0x482   :  { %4053 = vmatprep.subr.bf16.mxu0 %v1011_v11 }
 0x484   :  { %v899_v41 = vpop.xlane.xlu1 %898 }
 0x485   :  { %4325 = vrcp.f32 %v899_v41  ;;  %v902_v1 = vpop.xlane.xlu0 %901  ;;  %4054 = vmatpush3.bf16.msra.mxu0 %v1011_v11 }
 0x486   :  { %4327 = vrcp.f32 %v902_v1  ;;  %v4178_v1 = vld [vmem:[#allocation5 + $0x8] sm:$0xff]  }
 0x487   :  { %4089 = vmatprep.subr.bf16.mxu1 %v4178_v1 }
 0x488   :  { %v905_v17 = vpop.xlane.xlu1 %904  ;;  %4090 = vmatpush3.bf16.msra.mxu1 %v4178_v1 }
 0x489   :  { %4329 = vrcp.f32 %v905_v17  ;;  %v908_v30 = vpop.xlane.xlu0 %907 }
 0x48a   :  { %4331 = vrcp.f32 %v908_v30 }
 0x48b   :  { %v4324_v49 = vpop.eup %4323 }
 0x48c   :  { %v911_v8 = vpop.xlane.xlu1 %910  ;;  %v926_v21 = vmul.f32 %v4324_v49, %v5538_v45 }
 0x48d   :  { %4333 = vrcp.f32 %v911_v8  ;;  %v914_v39 = vpop.xlane.xlu0 %913 }
 0x48e   :  { %4335 = vrcp.f32 %v914_v39 }
 0x48f   :  { %v4326_v3 = vpop.eup %4325  ;;  %v4073_v4 = vpop.f32.mrb[0].mxu1 }
 0x490   :  { %v917_v2 = vpop.xlane.xlu1 %916  ;;  %v1312_v29 = vpop.f32.mrb[1].mxu1  ;;  %v927_v58 = vmul.f32 %v4326_v3, %v5544_v19 }
 0x491   :  { %v4328_v18 = vpop.eup %4327  ;;  %4337 = vrcp.f32 %v917_v2  ;;  %v1214_v9 = vpop.xlane.xlu0 %1213 }
 0x492   :  { %v4074_v36 = vpop.f32.mrb[2].mxu1  ;;  %v934_v28 = vpack.c.bf16 %v927_v58, %v926_v21  ;;  %4339 = vrcp.f32 %v1214_v9  ;;  %v928_v25 = vmul.f32 %v4328_v18, %v5546_v16 }
 0x493   :  { %v1328_v46 = vpack.c.bf16 %v4074_v36, %v4073_v4  ;;  %v1315_v38 = vpop.f32.mrb[3].mxu1  ;;  %v4330_v14 = vpop.eup %4329 }
 0x494   :  { %v1327_v15 = vpack.c.bf16 %v1315_v38, %v1312_v29  ;;  %v929_v51 = vmul.f32 %v4330_v14, %v5554_v56  ;;  %v1217_v32 = vpop.xlane.xlu1 %1216  ;;  %4055 = vmatprep.mubr.msk.bf16.mxu0 %vm277_vm0, %v934_v28  ;;  %v4332_v45 = vpop.eup %4331 }
 0x495   :  { %4341 = vrcp.f32 %v1217_v32  ;;  %v1220_v19 = vpop.xlane.xlu0 %1219  ;;  %v930_v7 = vmul.f32 %v4332_v45, %v5556_v44 }
 0x496   :  { %4075 = vmatprep.subr.bf16.mxu0 %v1327_v15  ;;  %v935_v62 = vpack.c.bf16 %v929_v51, %v928_v25  ;;  %4343 = vrcp.f32 %v1220_v19  ;;  %v3906_v51 = vld [vmem:[#allocation7] ss:$0 sm:$0xff] }
 0x497   :  { %v4334_v55 = vpop.eup %4333 }
 0x498   :  { %v1223_v57 = vpop.xlane.xlu1 %1222  ;;  %4056 = vmatmul.mubr.msk.bf16.vlgmr.msra.gmra.mrb[4].mxu0 %vm277_vm0, %v935_v62  ;;  %v931_v31 = vmul.f32 %v4334_v55, %v5564_v33  ;;  %v4336_v16 = vpop.eup %4335 }
 0x499   :  { %4345 = vrcp.f32 %v1223_v57  ;;  %4076 = vmatpush3.bf16.msra.mxu0 %v1327_v15  ;;  %v1226_v56 = vpop.xlane.xlu0 %1225  ;;  %v932_v59 = vmul.f32 %v4336_v16, %v5566_v12 }
 0x49a   :  { %4077 = vmatprep.subr.bf16.mxu0 %v1328_v46  ;;  %v936_v47 = vpack.c.bf16 %v931_v31, %v930_v7  ;;  %4347 = vrcp.f32 %v1226_v56 }
 0x49b   :  { %v4338_v34 = vpop.eup %4337 }
 0x49c   :  { %v1229_v60 = vpop.xlane.xlu1 %1228  ;;  %4059 = vmatprep.mubr.msk.bf16.mxu0 %vm277_vm0, %v936_v47  ;;  %v933_v53 = vmul.f32 %v4338_v34, %v5574_v5  ;;  %v4340_v13 = vpop.eup %4339 }
 0x49d   :  { %4349 = vrcp.f32 %v1229_v60  ;;  %4078 = vmatpush3.bf16.msra.mxu0 %v1328_v46  ;;  %v1232_v44 = vpop.xlane.xlu0 %1231  ;;  %v1244_v37 = vmul.f32 %v4340_v13, %v5576_v27 }
 0x49e   :  { %v937_v33 = vpack.c.bf16 %v933_v53, %v932_v59  ;;  %4351 = vrcp.f32 %v1232_v44 }
 0x49f   :  { %v4342_v23 = vpop.eup %4341 }
 0x4a0   :  { %v1235_v35 = vpop.xlane.xlu1 %1234  ;;  %4060 = vmatmul.mubr.msk.bf16.gmra.mrb[8].mxu0 %vm277_vm0, %v937_v33  ;;  %v1245_v52 = vmul.f32 %v4342_v23, %v5583_v22  ;;  %v4344_v6 = vpop.eup %4343 }
 0x4a1   :  { %4353 = vrcp.f32 %v1235_v35  ;;  %v1246_v5 = vmul.f32 %v4344_v6, %v5585_v0 }
 0x4a2   :  { %v1252_v20 = vpack.c.bf16 %v1245_v52, %v1244_v37 }
 0x4a3   :  { %v4346_v12 = vpop.eup %4345 }
 0x4a4   :  { %v1247_v24 = vmul.f32 %v4346_v12, %v5591_v48  ;;  %4079 = vmatprep.mubr.msk.bf16.mxu0 %vm277_vm0, %v1252_v20  ;;  %v4348_v63 = vpop.eup %4347 }
 0x4a5   :  { %v1248_v26 = vmul.f32 %v4348_v63, %v5593_v61 }
 0x4a6   :  { %v1253_v10 = vpack.c.bf16 %v1247_v24, %v1246_v5 }
 0x4a7   :  { %v4350_v11 = vpop.eup %4349 }
 0x4a8   :  { %4080 = vmatmul.mubr.msk.bf16.vlgmr.msra.gmra.mrb[12].mxu0 %vm277_vm0, %v1253_v10  ;;  %v1249_v27 = vmul.f32 %v4350_v11, %v5599_v42  ;;  %v4352_v22 = vpop.eup %4351 }
 0x4a9   :  { %v1250_v0 = vmul.f32 %v4352_v22, %v5601_v40 }
 0x4aa   :  { %v1254_v43 = vpack.c.bf16 %v1249_v27, %v1248_v26 }
 0x4ab   :  { %v4354_v54 = vpop.eup %4353 }
 0x4ac   :  { %4083 = vmatprep.mubr.msk.bf16.mxu0 %vm277_vm0, %v1254_v43  ;;  %v1251_v48 = vmul.f32 %v4354_v54, %v5607_v50 }
 0x4ae   :  { %v1255_v41 = vpack.c.bf16 %v1251_v48, %v1250_v0 }
 0x4b0   :  { %4084 = vmatmul.mubr.msk.bf16.gmra.mrb[16].mxu0 %vm277_vm0, %v1255_v41 }
 0x56b   :  { %v4057_v17 = vpop.f32.mrb[4].mxu0 }
 0x56c   :  { %v1058_v30 = vpop.f32.mrb[5].mxu0 }
 0x56d   :  { %v4058_v61 = vpop.f32.mrb[6].mxu0 }
 0x56e   :  { %v1407_v8 = vpack.c.bf16 %v4058_v61, %v4057_v17  ;;  %v1061_v42 = vpop.f32.mrb[7].mxu0 }
 0x56f   :  { %v1406_v49 = vpack.c.bf16 %v1061_v42, %v1058_v30 }
 0x571   :  { %4091 = vmatprep.mubr.msk.bf16.mxu1 %vm277_vm0, %v1406_v49 }
 0x572   :  { %4092 = vmatmul.mubr.msk.bf16.vlgmr.msra.gmra.mrb[4].mxu1 %vm277_vm0, %v1407_v8 }
 0x573   :  { %v4061_v39 = vpop.f32.mrb[8].mxu0 }
 0x574   :  { %v1074_v40 = vpop.f32.mrb[9].mxu0 }
 0x575   :  { %v4062_v3 = vpop.f32.mrb[10].mxu0 }
 0x576   :  { %v1409_v50 = vpack.c.bf16 %v4062_v3, %v4061_v39  ;;  %v1077_v4 = vpop.f32.mrb[11].mxu0 }
 0x577   :  { %v1408_v2 = vpack.c.bf16 %v1077_v4, %v1074_v40  ;;  %v7393_v4 = vld [vmem:[#allocation26_spill] sm:$0xff] }
 0x579   :  { %4095 = vmatprep.mubr.msk.bf16.mxu1 %vm277_vm0, %v1408_v2  ;;  %v5733_v2 = vpop.permute.xlu1 %1831 }
 0x57a   :  { %4096 = vmatmul.mubr.msk.bf16.gmra.mrb[8].mxu1 %vm277_vm0, %v1409_v50  ;;  %v7392_v50 = vld [vmem:[#allocation28_spill] sm:$0xff] }
 0x57b   :  { %v4081_v29 = vpop.f32.mrb[12].mxu0 }
 0x57c   :  { %v1375_v21 = vpop.f32.mrb[13].mxu0 }
 0x57d   :  { %v4082_v58 = vpop.f32.mrb[14].mxu0 }
 0x57e   :  { %v1411_v18 = vpack.c.bf16 %v4082_v58, %v4081_v29  ;;  %v1378_v9 = vpop.f32.mrb[15].mxu0  ;;  %v5735_v29 = vpop.permute.xlu0 %1829 }
 0x57f   :  { %v1410_v36 = vpack.c.bf16 %v1378_v9, %v1375_v21  ;;  %v5737_v21 = vpop.permute.xlu1 %1833 }
 0x581   :  { %4099 = vmatprep.mubr.msk.bf16.mxu1 %vm277_vm0, %v1410_v36 }
 0x582   :  { %4100 = vmatmul.mubr.msk.bf16.gmra.mrb[12].mxu1 %vm277_vm0, %v1411_v18  ;;  %v5739_v58 = vpop.permute.xlu0 %1835 }
 0x583   :  { %v4085_v46 = vpop.f32.mrb[16].mxu0  ;;  %v5741_v18 = vpop.permute.xlu1 %1837 }
 0x584   :  { %v1391_v38 = vpop.f32.mrb[17].mxu0 }
 0x585   :  { %v4086_v28 = vpop.f32.mrb[18].mxu0 }
 0x586   :  { %v1413_v14 = vpack.c.bf16 %v4086_v28, %v4085_v46  ;;  %v1394_v15 = vpop.f32.mrb[19].mxu0  ;;  %v5743_v9 = vpop.permute.xlu0 %1839 }
 0x587   :  { %v1412_v25 = vpack.c.bf16 %v1394_v15, %v1391_v38  ;;  %v5745_v36 = vpop.permute.xlu1 %1841 }
 0x589   :  { %4103 = vmatprep.mubr.msk.bf16.mxu1 %vm277_vm0, %v1412_v25 }
 0x58a   :  { %4104 = vmatmul.mubr.msk.bf16.gmra.mrb[16].mxu1 %vm277_vm0, %v1413_v14  ;;  %v5747_v46 = vpop.permute.xlu0 %1843 }
 0x58b   :  { %v5749_v38 = vpop.permute.xlu1 %1845 }
 0x58e   :  { %v5751_v28 = vpop.permute.xlu0 %1847 }
 0x58f   :  { %v5753_v14 = vpop.permute.xlu1 %1849 }
 0x645   :  { %v4093_v32 = vpop.f32.mrb[4].mxu1 }
 0x646   :  { %v5665_v45 = vadd.f32 %v4093_v32, %v3906_v51  ;;  %v1495_v19 = vpop.f32.mrb[5].mxu1 }
 0x647   :  { %v4094_v62 = vpop.f32.mrb[6].mxu1  ;;  %v5667_v55 = vadd.f32 %v3906_v51, %v1495_v19 }
 0x648   :  { %v5669_v57 = vadd.f32 %v4094_v62, %v3906_v51  ;;  %v1498_v7 = vpop.f32.mrb[7].mxu1  ;;  %v1566_v31 = vsel %vm954_vm1, %v5665_v45, 0.0 }
 0x649   :  { %1567 = vadd.xlane.f32.xlu0 %v1566_v31  ;;  %v5673_v16 = vadd.f32 %v3906_v51, %v1498_v7  ;;  %v1560_v47 = vsel %vm954_vm1, %v5667_v55, 0.0 }
 0x64a   :  { %v1569_v56 = vsel %vm954_vm1, %v5669_v57, 0.0 }
 0x64b   :  { %1570 = vadd.xlane.f32.xlu1 %v1569_v56  ;;  %v1563_v53 = vsel %vm954_vm1, %v5673_v16, 0.0 }
 0x64d   :  { %1561 = vadd.xlane.f32.xlu0 %v1560_v47  ;;  %v4097_v34 = vpop.f32.mrb[8].mxu1 }
 0x64e   :  { %v5679_v60 = vadd.f32 %v4097_v34, %v3906_v51  ;;  %v1511_v59 = vpop.f32.mrb[9].mxu1 }
 0x64f   :  { %1564 = vadd.xlane.f32.xlu1 %v1563_v53  ;;  %v4098_v13 = vpop.f32.mrb[10].mxu1  ;;  %v5683_v44 = vadd.f32 %v3906_v51, %v1511_v59 }
 0x650   :  { %v5685_v33 = vadd.f32 %v4098_v13, %v3906_v51  ;;  %v1514_v23 = vpop.f32.mrb[11].mxu1  ;;  %v1578_v35 = vsel %vm954_vm1, %v5679_v60, 0.0 }
 0x651   :  { %1579 = vadd.xlane.f32.xlu0 %v1578_v35  ;;  %v5689_v37 = vadd.f32 %v3906_v51, %v1514_v23  ;;  %v1572_v6 = vsel %vm954_vm1, %v5683_v44, 0.0 }
 0x652   :  { %v1581_v52 = vsel %vm954_vm1, %v5685_v33, 0.0 }
 0x653   :  { %1582 = vadd.xlane.f32.xlu1 %v1581_v52  ;;  %v1575_v24 = vsel %vm954_vm1, %v5689_v37, 0.0 }
 0x655   :  { %1573 = vadd.xlane.f32.xlu0 %v1572_v6  ;;  %v4101_v20 = vpop.f32.mrb[12].mxu1 }
 0x656   :  { %v5695_v12 = vadd.f32 %v4101_v20, %v3906_v51  ;;  %v1527_v5 = vpop.f32.mrb[13].mxu1 }
 0x657   :  { %1576 = vadd.xlane.f32.xlu1 %v1575_v24  ;;  %v4102_v63 = vpop.f32.mrb[14].mxu1  ;;  %v5699_v10 = vadd.f32 %v3906_v51, %v1527_v5 }
 0x658   :  { %v5701_v11 = vadd.f32 %v4102_v63, %v3906_v51  ;;  %v1530_v26 = vpop.f32.mrb[15].mxu1  ;;  %v1590_v27 = vsel %vm954_vm1, %v5695_v12, 0.0 }
 0x659   :  { %1591 = vadd.xlane.f32.xlu0 %v1590_v27  ;;  %v5705_v22 = vadd.f32 %v3906_v51, %v1530_v26  ;;  %v1584_v54 = vsel %vm954_vm1, %v5699_v10, 0.0 }
 0x65a   :  { %v1593_v43 = vsel %vm954_vm1, %v5701_v11, 0.0 }
 0x65b   :  { %1594 = vadd.xlane.f32.xlu1 %v1593_v43  ;;  %v1587_v1 = vsel %vm954_vm1, %v5705_v22, 0.0 }
 0x65d   :  { %1585 = vadd.xlane.f32.xlu0 %v1584_v54  ;;  %v4105_v0 = vpop.f32.mrb[16].mxu1 }
 0x65e   :  { %v5711_v48 = vadd.f32 %v4105_v0, %v3906_v51  ;;  %v1543_v41 = vpop.f32.mrb[17].mxu1 }
 0x65f   :  { %1588 = vadd.xlane.f32.xlu1 %v1587_v1  ;;  %v4106_v17 = vpop.f32.mrb[18].mxu1  ;;  %v5715_v30 = vadd.f32 %v3906_v51, %v1543_v41 }
 0x660   :  { %v5717_v61 = vadd.f32 %v4106_v17, %v3906_v51  ;;  %v1546_v8 = vpop.f32.mrb[19].mxu1  ;;  %v1602_v42 = vsel %vm954_vm1, %v5711_v48, 0.0 }
 0x661   :  { %1603 = vadd.xlane.f32.xlu0 %v1602_v42  ;;  %v5721_v49 = vadd.f32 %v3906_v51, %v1546_v8  ;;  %v1596_v40 = vsel %vm954_vm1, %v5715_v30, 0.0 }
 0x662   :  { %v1605_v39 = vsel %vm954_vm1, %v5717_v61, 0.0 }
 0x663   :  { %1606 = vadd.xlane.f32.xlu1 %v1605_v39  ;;  %v1599_v3 = vsel %vm954_vm1, %v5721_v49, 0.0 }
 0x665   :  { %1597 = vadd.xlane.f32.xlu0 %v1596_v40 }
 0x667   :  { %1600 = vadd.xlane.f32.xlu1 %v1599_v3 }
 0x678   :  { %1853 = vrot.lane.b32.xlu1 %v7392_v50, %s4625_s3 }
 0x67b   :  { %1851 = vrot.lane.b32.xlu0 %v7393_v4, %s4625_s3 }
 0x6d6   :  { %v1568_v15 = vpop.xlane.xlu0 %1567 }
 0x6d7   :  { %v1611_v25 = vmul.f32 0.015625, %v1568_v15 }
 0x6d8   :  { %v1571_v51 = vpop.xlane.xlu1 %1570 }
 0x6d9   :  { %v5756_v32 = vsub.f32 %v5665_v45, %v1611_v25  ;;  %v1612_v19 = vmul.f32 0.015625, %v1571_v51 }
 0x6da   :  { %v1562_v62 = vpop.xlane.xlu0 %1561 }
 0x6db   :  { %v5759_v7 = vsub.f32 %v5669_v57, %v1612_v19  ;;  %v1609_v31 = vmul.f32 0.015625, %v1562_v62  ;;  %v1643_v56 = vmul.f32 %v5756_v32, %v5756_v32 }
 0x6dc   :  { %v1565_v47 = vpop.xlane.xlu1 %1564 }
 0x6dd   :  { %v5764_v34 = vsub.f32 %v5667_v55, %v1609_v31  ;;  %v1610_v59 = vmul.f32 0.015625, %v1565_v47  ;;  %v1663_v53 = vsel %vm954_vm1, %v1643_v56, 0.0  ;;  %v1644_v45 = vmul.f32 %v5759_v7, %v5759_v7 }
 0x6de   :  { %1664 = vadd.xlane.f32.xlu0 %v1663_v53  ;;  %v1580_v13 = vpop.xlane.xlu0 %1579 }
 0x6df   :  { %v5770_v23 = vsub.f32 %v5673_v16, %v1610_v59  ;;  %v1615_v57 = vmul.f32 0.015625, %v1580_v13  ;;  %v1666_v35 = vsel %vm954_vm1, %v1644_v45, 0.0  ;;  %v1641_v52 = vmul.f32 %v5764_v34, %v5764_v34 }
 0x6e0   :  { %v1583_v6 = vpop.xlane.xlu1 %1582  ;;  %1667 = vadd.xlane.f32.xlu1 %v1666_v35 }
 0x6e1   :  { %v5776_v55 = vsub.f32 %v5679_v60, %v1615_v57  ;;  %v1616_v20 = vmul.f32 0.015625, %v1583_v6  ;;  %v1657_v5 = vsel %vm954_vm1, %v1641_v52, 0.0  ;;  %v1642_v24 = vmul.f32 %v5770_v23, %v5770_v23 }
 0x6e2   :  { %1658 = vadd.xlane.f32.xlu0 %v1657_v5  ;;  %v1574_v16 = vpop.xlane.xlu0 %1573 }
 0x6e3   :  { %v5782_v63 = vsub.f32 %v5685_v33, %v1616_v20  ;;  %v1613_v26 = vmul.f32 0.015625, %v1574_v16  ;;  %v1660_v27 = vsel %vm954_vm1, %v1642_v24, 0.0  ;;  %v1647_v43 = vmul.f32 %v5776_v55, %v5776_v55 }
 0x6e4   :  { %v1577_v54 = vpop.xlane.xlu1 %1576  ;;  %1661 = vadd.xlane.f32.xlu1 %v1660_v27 }
 0x6e5   :  { %v5788_v60 = vsub.f32 %v5683_v44, %v1613_v26  ;;  %v1614_v0 = vmul.f32 0.015625, %v1577_v54  ;;  %v1675_v41 = vsel %vm954_vm1, %v1647_v43, 0.0  ;;  %v1648_v1 = vmul.f32 %v5782_v63, %v5782_v63 }
 0x6e6   :  { %1676 = vadd.xlane.f32.xlu0 %v1675_v41  ;;  %v1592_v33 = vpop.xlane.xlu0 %1591 }
 0x6e7   :  { %v5794_v17 = vsub.f32 %v5689_v37, %v1614_v0  ;;  %v1619_v8 = vmul.f32 0.015625, %v1592_v33  ;;  %v1678_v42 = vsel %vm954_vm1, %v1648_v1, 0.0  ;;  %v1645_v39 = vmul.f32 %v5788_v60, %v5788_v60 }
 0x6e8   :  { %v1595_v40 = vpop.xlane.xlu1 %1594  ;;  %1679 = vadd.xlane.f32.xlu1 %v1678_v42  ;;  %v7396_v42 = vld [vmem:[#allocation34_spill] sm:$0xff] }
 0x6e9   :  { %v5800_v44 = vsub.f32 %v5695_v12, %v1619_v8  ;;  %v1620_v3 = vmul.f32 0.015625, %v1595_v40  ;;  %v1669_v50 = vsel %vm954_vm1, %v1645_v39, 0.0  ;;  %v1646_v4 = vmul.f32 %v5794_v17, %v5794_v17  ;;  %v7394_v8 = vld [vmem:[#allocation32_spill] sm:$0xff] }
 0x6ea   :  { %1670 = vadd.xlane.f32.xlu0 %v1669_v50  ;;  %v1586_v37 = vpop.xlane.xlu0 %1585 }
 0x6eb   :  { %v5806_v15 = vsub.f32 %v5701_v11, %v1620_v3  ;;  %v1617_v25 = vmul.f32 0.015625, %v1586_v37  ;;  %v1672_v51 = vsel %vm954_vm1, %v1646_v4, 0.0  ;;  %v1651_v19 = vmul.f32 %v5800_v44, %v5800_v44 }
 0x6ec   :  { %v1589_v62 = vpop.xlane.xlu1 %1588  ;;  %1673 = vadd.xlane.f32.xlu1 %v1672_v51 }
 0x6ed   :  { %v5812_v12 = vsub.f32 %v5699_v10, %v1617_v25  ;;  %v1618_v31 = vmul.f32 0.015625, %v1589_v62  ;;  %v1687_v56 = vsel %vm954_vm1, %v1651_v19, 0.0  ;;  %v1652_v47 = vmul.f32 %v5806_v15, %v5806_v15 }
 0x6ee   :  { %1688 = vadd.xlane.f32.xlu0 %v1687_v56  ;;  %v1604_v11 = vpop.xlane.xlu0 %1603 }
 0x6ef   :  { %v5818_v59 = vsub.f32 %v5705_v22, %v1618_v31  ;;  %v1623_v53 = vmul.f32 0.015625, %v1604_v11  ;;  %v1690_v45 = vsel %vm954_vm1, %v1652_v47, 0.0  ;;  %v1649_v13 = vmul.f32 %v5812_v12, %v5812_v12 }
 0x6f0   :  { %v1607_v57 = vpop.xlane.xlu1 %1606  ;;  %1691 = vadd.xlane.f32.xlu1 %v1690_v45 }
 0x6f1   :  { %v5824_v10 = vsub.f32 %v5711_v48, %v1623_v53  ;;  %v1624_v35 = vmul.f32 0.015625, %v1607_v57  ;;  %v1681_v52 = vsel %vm954_vm1, %v1649_v13, 0.0  ;;  %v1650_v6 = vmul.f32 %v5818_v59, %v5818_v59 }
 0x6f2   :  { %1682 = vadd.xlane.f32.xlu0 %v1681_v52  ;;  %v1598_v22 = vpop.xlane.xlu0 %1597 }
 0x6f3   :  { %v5830_v20 = vsub.f32 %v5717_v61, %v1624_v35  ;;  %v1621_v5 = vmul.f32 0.015625, %v1598_v22  ;;  %v1684_v24 = vsel %vm954_vm1, %v1650_v6, 0.0  ;;  %v1655_v16 = vmul.f32 %v5824_v10, %v5824_v10 }
 0x6f4   :  { %1685 = vadd.xlane.f32.xlu1 %v1684_v24  ;;  %v1601_v48 = vpop.xlane.xlu1 %1600 }
 0x6f5   :  { %v5836_v26 = vsub.f32 %v5715_v30, %v1621_v5  ;;  %v1622_v27 = vmul.f32 0.015625, %v1601_v48  ;;  %v1699_v43 = vsel %vm954_vm1, %v1655_v16, 0.0  ;;  %v1656_v54 = vmul.f32 %v5830_v20, %v5830_v20 }
 0x6f6   :  { %1700 = vadd.xlane.f32.xlu0 %v1699_v43  ;;  %v5857_v39 = vpop.permute.xlu0 %1851 }
 0x6f7   :  { %v5842_v61 = vsub.f32 %v5721_v49, %v1622_v27  ;;  %v1702_v0 = vsel %vm954_vm1, %v1656_v54, 0.0  ;;  %v1653_v41 = vmul.f32 %v5836_v26, %v5836_v26  ;;  %v7395_v49 = vld [vmem:[#allocation30_spill] sm:$0xff] }
 0x6f8   :  { %1703 = vadd.xlane.f32.xlu1 %v1702_v0  ;;  %v5859_v40 = vpop.permute.xlu1 %1853 }
 0x6f9   :  { %v1693_v1 = vsel %vm954_vm1, %v1653_v41, 0.0  ;;  %v1654_v30 = vmul.f32 %v5842_v61, %v5842_v61 }
 0x6fa   :  { %1694 = vadd.xlane.f32.xlu0 %v1693_v1 }
 0x6fb   :  { %v1696_v33 = vsel %vm954_vm1, %v1654_v30, 0.0 }
 0x6fc   :  { %1697 = vadd.xlane.f32.xlu1 %v1696_v33 }
 0x70d   :  { %1857 = vrot.lane.b32.xlu1 %v7394_v8, %s4625_s3 }
 0x710   :  { %1855 = vrot.lane.b32.xlu0 %v7395_v49, %s4625_s3 }
 0x714   :  { %1859 = vrot.lane.b32.xlu0 %v7396_v42, %s4625_s3  ;;  %v5866_v42 = vld [vmem:[%s7211_s6] ss:$0 sm:$0xff] }
 0x76b   :  { %v1665_v3 = vpop.xlane.xlu0 %1664 }
 0x76c   :  { %v1707_v50 = vmul.f32 0.015625, %v1665_v3 }
 0x76d   :  { %v1668_v4 = vpop.xlane.xlu1 %1667 }
 0x76e   :  { %v1723_v37 = vadd.f32 1e-05, %v1707_v50  ;;  %v1708_v25 = vmul.f32 0.015625, %v1668_v4 }
 0x76f   :  { %v1659_v51 = vpop.xlane.xlu0 %1658 }
 0x770   :  { %4355 = vrsqrt.f32 %v1723_v37  ;;  %v1724_v19 = vadd.f32 1e-05, %v1708_v25  ;;  %v1705_v62 = vmul.f32 0.015625, %v1659_v51  ;;  %v7397_v25 = vld [vmem:[#allocation35_spill] sm:$0xff] }
 0x771   :  { %v1662_v31 = vpop.xlane.xlu1 %1661 }
 0x772   :  { %4357 = vrsqrt.f32 %v1724_v19  ;;  %v1721_v56 = vadd.f32 1e-05, %v1705_v62  ;;  %v1706_v47 = vmul.f32 0.015625, %v1662_v31  ;;  %v7398_v19 = vld [vmem:[#allocation36_spill] sm:$0xff] }
 0x773   :  { %v1677_v11 = vpop.xlane.xlu0 %1676  ;;  %v1878_v62 = vsel %vm277_vm0, %v7398_v19, %v5733_v2  ;;  %v7399_v2 = vld [vmem:[#allocation38_spill] sm:$0xff] }
 0x774   :  { %4359 = vrsqrt.f32 %v1721_v56  ;;  %v1722_v53 = vadd.f32 1e-05, %v1706_v47  ;;  %v1711_v45 = vmul.f32 0.015625, %v1677_v11  ;;  %v5879_v56 = vld [vmem:[%s7212_s7] ss:$0 sm:$0xff] }
 0x775   :  { %v1680_v13 = vpop.xlane.xlu1 %1679 }
 0x776   :  { %4361 = vrsqrt.f32 %v1722_v53  ;;  %v1727_v57 = vadd.f32 1e-05, %v1711_v45  ;;  %v1712_v35 = vmul.f32 0.015625, %v1680_v13 }
 0x777   :  { %v1671_v52 = vpop.xlane.xlu0 %1670 }
 0x778   :  { %4363 = vrsqrt.f32 %v1727_v57  ;;  %v1728_v6 = vadd.f32 1e-05, %v1712_v35  ;;  %v1709_v22 = vmul.f32 0.015625, %v1671_v52  ;;  %v1880_v57 = vsel %vm277_vm0, %v7399_v2, %v5739_v58  ;;  %v7400_v35 = vld [vmem:[#allocation37_spill] sm:$0xff] }
 0x779   :  { %v1674_v5 = vpop.xlane.xlu1 %1673  ;;  %v1879_v52 = vsel %vm277_vm0, %v7400_v35, %v5737_v21 }
 0x77a   :  { %v4356_v24 = vpop.eup %4355  ;;  %4365 = vrsqrt.f32 %v1728_v6  ;;  %v1725_v16 = vadd.f32 1e-05, %v1709_v22  ;;  %v1710_v48 = vmul.f32 0.015625, %v1674_v5 }
 0x77b   :  { %v1689_v27 = vpop.xlane.xlu0 %1688  ;;  %v1755_v30 = vmul.f32 %v4356_v24, %v5756_v32 }
 0x77c   :  { %v4358_v43 = vpop.eup %4357  ;;  %4367 = vrsqrt.f32 %v1725_v16  ;;  %v1726_v54 = vadd.f32 1e-05, %v1710_v48  ;;  %v1715_v0 = vmul.f32 0.015625, %v1689_v27 }
 0x77d   :  { %v1692_v41 = vpop.xlane.xlu1 %1691  ;;  %v1756_v1 = vmul.f32 %v4358_v43, %v5759_v7  ;;  %v1877_v7 = vsel %vm277_vm0, %v7397_v25, %v5735_v29  ;;  %v1777_v11 = vmul.f32 %v5866_v42, %v1755_v30 }
 0x77e   :  { %v4360_v33 = vpop.eup %4359  ;;  %4369 = vrsqrt.f32 %v1726_v54  ;;  %v1731_v8 = vadd.f32 1e-05, %v1715_v0  ;;  %v1716_v49 = vmul.f32 0.015625, %v1692_v41 }
 0x77f   :  { %v1683_v3 = vpop.xlane.xlu0 %1682  ;;  %v1753_v50 = vmul.f32 %v4360_v33, %v5764_v34  ;;  %v1778_v4 = vmul.f32 %v5866_v42, %v1756_v1  ;;  %v1799_v54 = vadd.f32 %v5879_v56, %v1777_v11 }
 0x780   :  { %v4362_v37 = vpop.eup %4361  ;;  %4371 = vrsqrt.f32 %v1731_v8  ;;  %v1732_v32 = vadd.f32 1e-05, %v1716_v49  ;;  %v1713_v51 = vmul.f32 0.015625, %v1683_v3 }
 0x781   :  { %v1686_v31 = vpop.xlane.xlu1 %1685  ;;  %v1775_v34 = vmul.f32 %v5866_v42, %v1753_v50  ;;  %v1754_v47 = vmul.f32 %v4362_v37, %v5770_v23  ;;  %v1800_v13 = vadd.f32 %v5879_v56, %v1778_v4 }
 0x782   :  { %v4364_v29 = vpop.eup %4363  ;;  %4373 = vrsqrt.f32 %v1732_v32  ;;  %v1729_v53 = vadd.f32 1e-05, %v1713_v51  ;;  %v1714_v45 = vmul.f32 0.015625, %v1686_v31  ;;  %v5910_v32 = vadd.f32 %v1879_v52, %v1799_v54 }
 0x783   :  { %v1701_v6 = vpop.xlane.xlu0 %1700  ;;  %v1797_v22 = vadd.f32 %v5879_v56, %v1775_v34  ;;  %v1776_v23 = vmul.f32 %v5866_v42, %v1754_v47  ;;  %v1759_v48 = vmul.f32 %v4364_v29, %v5776_v55  ;;  %v5899_v30 = vadd.f32 %v1880_v57, %v1800_v13 }
 0x784   :  { %v4366_v5 = vpop.eup %4365  ;;  %4375 = vrsqrt.f32 %v1729_v53  ;;  %v1730_v24 = vadd.f32 1e-05, %v1714_v45  ;;  %v1719_v16 = vmul.f32 0.015625, %v1701_v6  ;;  %7404 = vst [vmem:[#allocation68_spill] sm:$0xff] %v5910_v32  ;;  %v1917_v57 = vsel %vm954_vm1, %v5910_v32, 0.0 }
 0x785   :  { %v1704_v27 = vpop.xlane.xlu1 %1703  ;;  %v5894_v43 = vadd.f32 %v1877_v7, %v1797_v22  ;;  %v1798_v58 = vadd.f32 %v5879_v56, %v1776_v23  ;;  %v1760_v21 = vmul.f32 %v4366_v5, %v5782_v63  ;;  %7402 = vst [vmem:[#allocation58_spill] sm:$0xff] %v5899_v30  ;;  %v1781_v3 = vmul.f32 %v5866_v42, %v1759_v48  ;;  %v7407_v23 = vld [vmem:[#allocation40_spill] sm:$0xff] }
 0x786   :  { %v4368_v0 = vpop.eup %4367  ;;  %4377 = vrsqrt.f32 %v1730_v24  ;;  %v1735_v41 = vadd.f32 1e-05, %v1719_v16  ;;  %v1720_v1 = vmul.f32 0.015625, %v1704_v27  ;;  %v1920_v11 = vsel %vm954_vm1, %v5899_v30, 0.0  ;;  %v7408_v24 = vld [vmem:[#allocation42_spill] sm:$0xff]  ;;  %v7409_v16 = vld [vmem:[#allocation41_spill] sm:$0xff] }
 0x787   :  { %7401 = vst [vmem:[#allocation61_spill] sm:$0xff] %v5894_v43  ;;  %v1695_v33 = vpop.xlane.xlu0 %1694  ;;  %v1911_v8 = vsel %vm954_vm1, %v5894_v43, 0.0  ;;  %v5903_v55 = vadd.f32 %v1878_v62, %v1798_v58  ;;  %v1757_v49 = vmul.f32 %v4368_v0, %v5788_v60  ;;  %v1782_v37 = vmul.f32 %v5866_v42, %v1760_v21  ;;  %v7405_v62 = vld [vmem:[#allocation39_spill] sm:$0xff] }
 0x788   :  { %v4370_v50 = vpop.eup %4369  ;;  %4379 = vrsqrt.f32 %v1735_v41  ;;  %v1736_v4 = vadd.f32 1e-05, %v1720_v1  ;;  %v1717_v63 = vmul.f32 0.015625, %v1695_v33  ;;  %1912 = vadd.xlane.f32.xlu1 %v1911_v8  ;;  %v1881_v31 = vsel %vm277_vm0, %v7405_v62, %v5741_v18  ;;  %v7413_v33 = vld [vmem:[#allocation43_spill] sm:$0xff]  ;;  %v7416_v62 = vld [vmem:[#allocation45_spill] sm:$0xff] }
 0x789   :  { %7403 = vst [vmem:[#allocation72_spill] sm:$0xff] %v5903_v55  ;;  %v1698_v25 = vpop.xlane.xlu1 %1697  ;;  %v1914_v7 = vsel %vm954_vm1, %v5903_v55, 0.0  ;;  %v1758_v51 = vmul.f32 %v4370_v50, %v5794_v17  ;;  %v1779_v19 = vmul.f32 %v5866_v42, %v1757_v49  ;;  %v1803_v17 = vadd.f32 %v5879_v56, %v1781_v3 }
 0x78a   :  { %v4372_v60 = vpop.eup %4371  ;;  %4381 = vrsqrt.f32 %v1736_v4  ;;  %v1733_v34 = vadd.f32 1e-05, %v1717_v63  ;;  %v1718_v47 = vmul.f32 0.015625, %v1698_v25  ;;  %1915 = vadd.xlane.f32.xlu0 %v1914_v7  ;;  %v1804_v2 = vadd.f32 %v5879_v56, %v1782_v37 }
 0x78b   :  { %v1780_v29 = vmul.f32 %v5866_v42, %v1758_v51  ;;  %v1801_v53 = vadd.f32 %v5879_v56, %v1779_v19  ;;  %v1763_v18 = vmul.f32 %v4372_v60, %v5800_v44  ;;  %v1882_v5 = vsel %vm277_vm0, %v7407_v23, %v5743_v9  ;;  %v7415_v60 = vld [vmem:[#allocation44_spill] sm:$0xff] }
 0x78c   :  { %v4374_v45 = vpop.eup %4373  ;;  %4383 = vrsqrt.f32 %v1733_v34  ;;  %v1734_v13 = vadd.f32 1e-05, %v1718_v47  ;;  %1921 = vadd.xlane.f32.xlu1 %v1920_v11  ;;  %v1884_v44 = vsel %vm277_vm0, %v7408_v24, %v5747_v46  ;;  %v1883_v48 = vsel %vm277_vm0, %v7409_v16, %v5745_v36  ;;  %v1856_v47 = vpop.permute.xlu0 %1855  ;;  %v7422_v16 = vld [vmem:[#allocation48_spill] sm:$0xff] }
 0x78d   :  { %v1802_v35 = vadd.f32 %v5879_v56, %v1780_v29  ;;  %v5927_v52 = vadd.f32 %v1881_v31, %v1801_v53  ;;  %v1764_v6 = vmul.f32 %v4374_v45, %v5806_v15  ;;  %v5942_v54 = vadd.f32 %v1884_v44, %v1804_v2  ;;  %v1858_v23 = vpop.permute.xlu1 %1857 }
 0x78e   :  { %v4376_v22 = vpop.eup %4375  ;;  %4385 = vrsqrt.f32 %v1734_v13  ;;  %1918 = vadd.xlane.f32.xlu0 %v1917_v57  ;;  %v5944_v21 = vadd.f32 %v1883_v48, %v1803_v17  ;;  %v1785_v0 = vmul.f32 %v5866_v42, %v1763_v18  ;;  %v1885_v8 = vsel %vm277_vm0, %v7413_v33, %v5749_v38 }
 0x78f   :  { %7406 = vst [vmem:[#allocation69_spill] sm:$0xff] %v5927_v52  ;;  %v5939_v27 = vadd.f32 %v1882_v5, %v1802_v35  ;;  %v1761_v58 = vmul.f32 %v4376_v22, %v5812_v12  ;;  %7411 = vst [vmem:[#allocation67_spill] sm:$0xff] %v5942_v54  ;;  %v1786_v9 = vmul.f32 %v5866_v42, %v1764_v6  ;;  %v1923_v41 = vsel %vm954_vm1, %v5927_v52, 0.0  ;;  %v7421_v35 = vld [vmem:[#allocation47_spill] sm:$0xff] }
 0x790   :  { %v4378_v15 = vpop.eup %4377  ;;  %7412 = vst [vmem:[#allocation55_spill] sm:$0xff] %v5944_v21  ;;  %v1929_v63 = vsel %vm954_vm1, %v5944_v21, 0.0  ;;  %v1807_v37 = vadd.f32 %v5879_v56, %v1785_v0  ;;  %v1932_v7 = vsel %vm954_vm1, %v5942_v54, 0.0  ;;  %v1887_v31 = vsel %vm277_vm0, %v7416_v62, %v5753_v14  ;;  %v1860_v44 = vpop.permute.xlu0 %1859  ;;  %v7426_v0 = vld [vmem:[#allocation50_spill] sm:$0xff] }
 0x791   :  { %7410 = vst [vmem:[#allocation70_spill] sm:$0xff] %v5939_v27  ;;  %v1926_v46 = vsel %vm954_vm1, %v5939_v27, 0.0  ;;  %v1762_v36 = vmul.f32 %v4378_v15, %v5818_v59  ;;  %v1783_v1 = vmul.f32 %v5866_v42, %v1761_v58  ;;  %v1808_v59 = vadd.f32 %v5879_v56, %v1786_v9  ;;  %v7425_v15 = vld [vmem:[#allocation49_spill] sm:$0xff] }
 0x792   :  { %v4380_v12 = vpop.eup %4379  ;;  %1927 = vadd.xlane.f32.xlu1 %v1926_v46  ;;  %1924 = vadd.xlane.f32.xlu0 %v1923_v41  ;;  %v5984_v45 = vadd.f32 %v1887_v31, %v1807_v37  ;;  %v1890_v48 = vsel %vm277_vm0, %v7422_v16, %v1856_v47  ;;  %v1891_v9 = vsel %vm277_vm0, %v7425_v15, %v1858_v23 }
 0x793   :  { %v1784_v49 = vmul.f32 %v5866_v42, %v1762_v36  ;;  %v1805_v3 = vadd.f32 %v5879_v56, %v1783_v1  ;;  %v1767_v4 = vmul.f32 %v4380_v12, %v5824_v10  ;;  %v1886_v10 = vsel %vm277_vm0, %v7415_v60, %v5751_v28 }
 0x794   :  { %v4382_v50 = vpop.eup %4381  ;;  %7420 = vst [vmem:[#allocation53_spill] sm:$0xff] %v5984_v45  ;;  %v1892_v46 = vsel %vm277_vm0, %v7426_v0, %v1860_v44 }
 0x795   :  { %v1768_v25 = vmul.f32 %v4382_v50, %v5830_v20  ;;  %v1806_v38 = vadd.f32 %v5879_v56, %v1784_v49  ;;  %v5968_v51 = vadd.f32 %v1885_v8, %v1805_v3  ;;  %v7417_v20 = vld [vmem:[#allocation46_spill] sm:$0xff]  ;;  %v1789_v53 = vmul.f32 %v5866_v42, %v1767_v4 }
 0x796   :  { %v4384_v19 = vpop.eup %4383  ;;  %1933 = vadd.xlane.f32.xlu1 %v1932_v7  ;;  %1930 = vadd.xlane.f32.xlu0 %v1929_v63  ;;  %v1888_v34 = vsel %vm277_vm0, %v7417_v20, %v5857_v39 }
 0x797   :  { %7414 = vst [vmem:[#allocation56_spill] sm:$0xff] %v5968_v51  ;;  %v5979_v11 = vadd.f32 %v1886_v10, %v1806_v38  ;;  %v5982_v17 = vadd.f32 %v1888_v34, %v1808_v59  ;;  %v1765_v28 = vmul.f32 %v4384_v19, %v5836_v26  ;;  %v1790_v14 = vmul.f32 %v5866_v42, %v1768_v25 }
 0x798   :  { %v4386_v29 = vpop.eup %4385  ;;  %v1935_v39 = vsel %vm954_vm1, %v5968_v51, 0.0  ;;  %v1889_v26 = vsel %vm277_vm0, %v7421_v35, %v5859_v40  ;;  %v1811_v5 = vadd.f32 %v5879_v56, %v1789_v53 }
 0x799   :  { %7418 = vst [vmem:[#allocation52_spill] sm:$0xff] %v5979_v11  ;;  %7419 = vst [vmem:[#allocation57_spill] sm:$0xff] %v5982_v17  ;;  %v1766_v13 = vmul.f32 %v4386_v29, %v5842_v61  ;;  %v1938_v2 = vsel %vm954_vm1, %v5979_v11, 0.0  ;;  %v1787_v18 = vmul.f32 %v5866_v42, %v1765_v28  ;;  %v1941_v61 = vsel %vm954_vm1, %v5984_v45, 0.0 }
 0x79a   :  { %1939 = vadd.xlane.f32.xlu1 %v1938_v2  ;;  %1936 = vadd.xlane.f32.xlu0 %v1935_v39  ;;  %v1812_v24 = vadd.f32 %v5879_v56, %v1790_v14 }
 0x79b   :  { %v1788_v57 = vmul.f32 %v5866_v42, %v1766_v13  ;;  %v1809_v6 = vadd.f32 %v5879_v56, %v1787_v18  ;;  %v1944_v42 = vsel %vm954_vm1, %v5982_v17, 0.0 }
 0x79c   :  { %v6018_v41 = vadd.f32 %v1892_v46, %v1812_v24 }
 0x79d   :  { %v1810_v22 = vadd.f32 %v5879_v56, %v1788_v57  ;;  %v6008_v40 = vadd.f32 %v1889_v26, %v1809_v6  ;;  %v6016_v56 = vadd.f32 %v1891_v9, %v1811_v5 }
 0x79e   :  { %1945 = vadd.xlane.f32.xlu1 %v1944_v42  ;;  %1942 = vadd.xlane.f32.xlu0 %v1941_v61  ;;  %7428 = vst [vmem:[#allocation71_spill] sm:$0xff] %v6018_v41  ;;  %v1956_v33 = vsel %vm954_vm1, %v6018_v41, 0.0 }
 0x79f   :  { %7423 = vst [vmem:[#allocation54_spill] sm:$0xff] %v6008_v40  ;;  %v6010_v58 = vadd.f32 %v1890_v48, %v1810_v22  ;;  %7427 = vst [vmem:[#allocation64_spill] sm:$0xff] %v6016_v56  ;;  %v1947_v36 = vsel %vm954_vm1, %v6008_v40, 0.0  ;;  %v1953_v12 = vsel %vm954_vm1, %v6016_v56, 0.0 }
 0x7a1   :  { %7424 = vst [vmem:[#allocation51_spill] sm:$0xff] %v6010_v58  ;;  %v1950_v1 = vsel %vm954_vm1, %v6010_v58, 0.0 }
 0x7a2   :  { %1948 = vadd.xlane.f32.xlu0 %v1947_v36  ;;  %1951 = vadd.xlane.f32.xlu1 %v1950_v1 }
 0x7a6   :  { %1954 = vadd.xlane.f32.xlu0 %v1953_v12  ;;  %1957 = vadd.xlane.f32.xlu1 %v1956_v33 }
 0x815   :  { %v1913_v8 = vpop.xlane.xlu1 %1912 }
 0x816   :  { %v1959_v49 = vmul.f32 0.015625, %v1913_v8 }
 0x817   :  { %v1916_v3 = vpop.xlane.xlu0 %1915 }
 0x818   :  { %v6029_v50 = vsub.f32 %v5894_v43, %v1959_v49  ;;  %v1960_v4 = vmul.f32 0.015625, %v1916_v3 }
 0x819   :  { %v1922_v63 = vpop.xlane.xlu1 %1921 }
 0x81a   :  { %v6032_v59 = vsub.f32 %v5903_v55, %v1960_v4  ;;  %v1962_v37 = vmul.f32 0.015625, %v1922_v63  ;;  %v1991_v25 = vmul.f32 %v6029_v50, %v6029_v50 }
 0x81b   :  { %v1919_v7 = vpop.xlane.xlu0 %1918 }
 0x81c   :  { %v6037_v38 = vsub.f32 %v5899_v30, %v1962_v37  ;;  %v1961_v19 = vmul.f32 0.015625, %v1919_v7  ;;  %v2007_v60 = vsel %vm954_vm1, %v1991_v25, 0.0  ;;  %v1992_v10 = vmul.f32 %v6032_v59, %v6032_v59 }
 0x81d   :  { %2008 = vadd.xlane.f32.xlu0 %v2007_v60 }
 0x81e   :  { %v6043_v62 = vsub.f32 %v5910_v32, %v1961_v19  ;;  %v2010_v31 = vsel %vm954_vm1, %v1992_v10, 0.0  ;;  %v1994_v20 = vmul.f32 %v6037_v38, %v6037_v38 }
 0x81f   :  { %v1928_v34 = vpop.xlane.xlu1 %1927  ;;  %2011 = vadd.xlane.f32.xlu1 %v2010_v31  ;;  %v1925_v47 = vpop.xlane.xlu0 %1924 }
 0x820   :  { %v1964_v29 = vmul.f32 0.015625, %v1928_v34  ;;  %v1963_v53 = vmul.f32 0.015625, %v1925_v47  ;;  %v1993_v28 = vmul.f32 %v6043_v62, %v6043_v62  ;;  %v2016_v2 = vsel %vm954_vm1, %v1994_v20, 0.0 }
 0x822   :  { %v6051_v13 = vsub.f32 %v5939_v27, %v1964_v29  ;;  %v6054_v14 = vsub.f32 %v5927_v52, %v1963_v53  ;;  %v2013_v39 = vsel %vm954_vm1, %v1993_v28, 0.0 }
 0x823   :  { %v1934_v18 = vpop.xlane.xlu1 %1933  ;;  %2017 = vadd.xlane.f32.xlu1 %v2016_v2  ;;  %2014 = vadd.xlane.f32.xlu0 %v2013_v39  ;;  %v1931_v57 = vpop.xlane.xlu0 %1930 }
 0x824   :  { %v1966_v35 = vmul.f32 0.015625, %v1934_v18  ;;  %v1965_v26 = vmul.f32 0.015625, %v1931_v57  ;;  %v1996_v61 = vmul.f32 %v6051_v13, %v6051_v13  ;;  %v1995_v6 = vmul.f32 %v6054_v14, %v6054_v14 }
 0x826   :  { %v6063_v22 = vsub.f32 %v5942_v54, %v1966_v35  ;;  %v6066_v23 = vsub.f32 %v5944_v21, %v1965_v26  ;;  %v2022_v5 = vsel %vm954_vm1, %v1996_v61, 0.0  ;;  %v2019_v24 = vsel %vm954_vm1, %v1995_v6, 0.0 }
 0x827   :  { %v1940_v44 = vpop.xlane.xlu1 %1939  ;;  %2023 = vadd.xlane.f32.xlu1 %v2022_v5  ;;  %2020 = vadd.xlane.f32.xlu0 %v2019_v24  ;;  %v1937_v42 = vpop.xlane.xlu0 %1936 }
 0x828   :  { %v1968_v16 = vmul.f32 0.015625, %v1940_v44  ;;  %v1967_v48 = vmul.f32 0.015625, %v1937_v42  ;;  %v1998_v15 = vmul.f32 %v6063_v22, %v6063_v22  ;;  %v1997_v9 = vmul.f32 %v6066_v23, %v6066_v23 }
 0x82a   :  { %v6075_v0 = vsub.f32 %v5979_v11, %v1968_v16  ;;  %v6078_v46 = vsub.f32 %v5968_v51, %v1967_v48  ;;  %v2028_v36 = vsel %vm954_vm1, %v1998_v15, 0.0  ;;  %v2025_v1 = vsel %vm954_vm1, %v1997_v9, 0.0  ;;  %v4179_v15 = vld [vmem:[%s7215_s10] sm:$0xff]   ;;  %v4180_v9 = vld [vmem:[%s7215_s10 + $0x8] sm:$0xff]  }
 0x82b   :  { %v1946_v12 = vpop.xlane.xlu1 %1945  ;;  %2029 = vadd.xlane.f32.xlu1 %v2028_v36  ;;  %2026 = vadd.xlane.f32.xlu0 %v2025_v1  ;;  %v1943_v33 = vpop.xlane.xlu0 %1942  ;;  %v4181_v36 = vld [vmem:[%s7215_s10 + $0x10] sm:$0xff]   ;;  %v4182_v1 = vld [vmem:[%s7215_s10 + $0x18] sm:$0xff]  }
 0x82c   :  { %v1970_v8 = vmul.f32 0.015625, %v1946_v12  ;;  %v1969_v49 = vmul.f32 0.015625, %v1943_v33  ;;  %v2000_v3 = vmul.f32 %v6075_v0, %v6075_v0  ;;  %v1999_v4 = vmul.f32 %v6078_v46, %v6078_v46  ;;  %4107 = vmatprep.subr.bf16.mxu0 %v4179_v15 }
 0x82d   :  { %4108 = vmatpush3.bf16.msra.mxu0 %v4179_v15 }
 0x82e   :  { %v6087_v63 = vsub.f32 %v5982_v17, %v1970_v8  ;;  %v6090_v37 = vsub.f32 %v5984_v45, %v1969_v49  ;;  %v2034_v25 = vsel %vm954_vm1, %v2000_v3, 0.0  ;;  %v2031_v7 = vsel %vm954_vm1, %v1999_v4, 0.0  ;;  %4109 = vmatprep.subr.bf16.mxu0 %v4180_v9 }
 0x82f   :  { %v1952_v19 = vpop.xlane.xlu1 %1951  ;;  %2035 = vadd.xlane.f32.xlu1 %v2034_v25  ;;  %2032 = vadd.xlane.f32.xlu0 %v2031_v7  ;;  %v1949_v60 = vpop.xlane.xlu0 %1948 }
 0x830   :  { %v1972_v10 = vmul.f32 0.015625, %v1952_v19  ;;  %v1971_v31 = vmul.f32 0.015625, %v1949_v60  ;;  %v2002_v20 = vmul.f32 %v6087_v63, %v6087_v63  ;;  %v2001_v34 = vmul.f32 %v6090_v37, %v6090_v37 }
 0x831   :  { %4110 = vmatpush3.bf16.msra.mxu0 %v4180_v9 }
 0x832   :  { %v6099_v47 = vsub.f32 %v6010_v58, %v1972_v10  ;;  %v6102_v29 = vsub.f32 %v6008_v40, %v1971_v31  ;;  %v2040_v53 = vsel %vm954_vm1, %v2002_v20, 0.0  ;;  %v2037_v28 = vsel %vm954_vm1, %v2001_v34, 0.0  ;;  %4111 = vmatprep.subr.bf16.mxu0 %v4181_v36 }
 0x833   :  { %v1958_v2 = vpop.xlane.xlu1 %1957  ;;  %2041 = vadd.xlane.f32.xlu1 %v2040_v53  ;;  %2038 = vadd.xlane.f32.xlu0 %v2037_v28  ;;  %v1955_v39 = vpop.xlane.xlu0 %1954 }
 0x834   :  { %v1974_v18 = vmul.f32 0.015625, %v1958_v2  ;;  %v1973_v57 = vmul.f32 0.015625, %v1955_v39  ;;  %v2004_v35 = vmul.f32 %v6099_v47, %v6099_v47  ;;  %v2003_v26 = vmul.f32 %v6102_v29, %v6102_v29 }
 0x835   :  { %4112 = vmatpush3.bf16.msra.mxu0 %v4181_v36 }
 0x836   :  { %v6111_v61 = vsub.f32 %v6018_v41, %v1974_v18  ;;  %v6114_v6 = vsub.f32 %v6016_v56, %v1973_v57  ;;  %v2046_v5 = vsel %vm954_vm1, %v2004_v35, 0.0  ;;  %v2043_v24 = vsel %vm954_vm1, %v2003_v26, 0.0  ;;  %4113 = vmatprep.subr.bf16.mxu0 %v4182_v1  ;;  %v6139_v26 = vld [vmem:[%s7213_s8] ss:$0 sm:$0xff] }
 0x837   :  { %2047 = vadd.xlane.f32.xlu1 %v2046_v5  ;;  %2044 = vadd.xlane.f32.xlu0 %v2043_v24 }
 0x838   :  { %v2006_v44 = vmul.f32 %v6111_v61, %v6111_v61  ;;  %v2005_v42 = vmul.f32 %v6114_v6, %v6114_v6 }
 0x839   :  { %4114 = vmatpush3.bf16.msra.mxu0 %v4182_v1 }
 0x83a   :  { %v2052_v16 = vsel %vm954_vm1, %v2006_v44, 0.0  ;;  %v2049_v48 = vsel %vm954_vm1, %v2005_v42, 0.0 }
 0x83b   :  { %2053 = vadd.xlane.f32.xlu1 %v2052_v16  ;;  %2050 = vadd.xlane.f32.xlu0 %v2049_v48 }
 0x8aa   :  { %v2009_v12 = vpop.xlane.xlu0 %2008 }
 0x8ab   :  { %v2055_v33 = vmul.f32 0.015625, %v2009_v12  ;;  %v6144_v12 = vld [vmem:[#allocation8] ss:$0 sm:$0xff] }
 0x8ac   :  { %v2012_v8 = vpop.xlane.xlu1 %2011 }
 0x8ad   :  { %v2071_v49 = vadd.f32 1e-05, %v2055_v33  ;;  %v2056_v3 = vmul.f32 0.015625, %v2012_v8 }
 0x8af   :  { %4387 = vrsqrt.f32 %v2071_v49  ;;  %v2072_v4 = vadd.f32 1e-05, %v2056_v3 }
 0x8b0   :  { %v2018_v25 = vpop.xlane.xlu1 %2017  ;;  %v2015_v7 = vpop.xlane.xlu0 %2014 }
 0x8b1   :  { %4389 = vrsqrt.f32 %v2072_v4  ;;  %v2058_v19 = vmul.f32 0.015625, %v2018_v25  ;;  %v2057_v60 = vmul.f32 0.015625, %v2015_v7 }
 0x8b3   :  { %v2074_v10 = vadd.f32 1e-05, %v2058_v19  ;;  %v2073_v31 = vadd.f32 1e-05, %v2057_v60 }
 0x8b4   :  { %v2024_v20 = vpop.xlane.xlu1 %2023  ;;  %v2021_v34 = vpop.xlane.xlu0 %2020 }
 0x8b5   :  { %4391 = vrsqrt.f32 %v2074_v10  ;;  %v2060_v53 = vmul.f32 0.015625, %v2024_v20  ;;  %v2059_v28 = vmul.f32 0.015625, %v2021_v34 }
 0x8b6   :  { %4393 = vrsqrt.f32 %v2073_v31 }
 0x8b7   :  { %v2076_v2 = vadd.f32 1e-05, %v2060_v53  ;;  %v2075_v39 = vadd.f32 1e-05, %v2059_v28 }
 0x8b8   :  { %v2030_v18 = vpop.xlane.xlu1 %2029  ;;  %v2027_v57 = vpop.xlane.xlu0 %2026 }
 0x8b9   :  { %v4388_v35 = vpop.eup %4387  ;;  %4395 = vrsqrt.f32 %v2076_v2  ;;  %v2062_v5 = vmul.f32 0.015625, %v2030_v18  ;;  %v2061_v24 = vmul.f32 0.015625, %v2027_v57 }
 0x8ba   :  { %v2103_v44 = vmul.f32 %v4388_v35, %v6029_v50  ;;  %4397 = vrsqrt.f32 %v2075_v39 }
 0x8bb   :  { %v4390_v42 = vpop.eup %4389  ;;  %v2078_v16 = vadd.f32 1e-05, %v2062_v5  ;;  %v2077_v48 = vadd.f32 1e-05, %v2061_v24 }
 0x8bc   :  { %v2104_v15 = vmul.f32 %v4390_v42, %v6032_v59  ;;  %v2036_v9 = vpop.xlane.xlu1 %2035  ;;  %v2033_v36 = vpop.xlane.xlu0 %2032  ;;  %v2125_v1 = vmul.f32 %v6139_v26, %v2103_v44 }
 0x8bd   :  { %4399 = vrsqrt.f32 %v2078_v16  ;;  %v2064_v33 = vmul.f32 0.015625, %v2036_v9  ;;  %v2063_v8 = vmul.f32 0.015625, %v2033_v36 }
 0x8be   :  { %4401 = vrsqrt.f32 %v2077_v48  ;;  %v2126_v49 = vmul.f32 %v6139_v26, %v2104_v15  ;;  %v2147_v60 = vadd.f32 %v6144_v12, %v2125_v1 }
 0x8bf   :  { %v4392_v3 = vpop.eup %4391  ;;  %v2080_v50 = vadd.f32 1e-05, %v2064_v33  ;;  %v2079_v4 = vadd.f32 1e-05, %v2063_v8 }
 0x8c0   :  { %v4394_v25 = vpop.eup %4393  ;;  %v2106_v7 = vmul.f32 %v4392_v3, %v6037_v38  ;;  %v2042_v19 = vpop.xlane.xlu1 %2041  ;;  %v2148_v10 = vadd.f32 %v6144_v12, %v2126_v49 }
 0x8c1   :  { %v2039_v59 = vpop.xlane.xlu0 %2038  ;;  %v2105_v31 = vmul.f32 %v4394_v25, %v6043_v62  ;;  %4403 = vrsqrt.f32 %v2080_v50  ;;  %v2066_v20 = vmul.f32 0.015625, %v2042_v19 }
 0x8c2   :  { %v2065_v34 = vmul.f32 0.015625, %v2039_v59  ;;  %v2128_v53 = vmul.f32 %v6139_v26, %v2106_v7  ;;  %4405 = vrsqrt.f32 %v2079_v4  ;;  %v2163_v28 = vpack.c.bf16 %v2148_v10, %v2147_v60 }
 0x8c3   :  { %v4396_v2 = vpop.eup %4395  ;;  %v2127_v39 = vmul.f32 %v6139_v26, %v2105_v31  ;;  %v2082_v18 = vadd.f32 1e-05, %v2066_v20 }
 0x8c4   :  { %v2081_v38 = vadd.f32 1e-05, %v2065_v34  ;;  %v4398_v57 = vpop.eup %4397  ;;  %v2150_v35 = vadd.f32 %v6144_v12, %v2128_v53  ;;  %v2108_v5 = vmul.f32 %v4396_v2, %v6051_v13  ;;  %v2048_v24 = vpop.xlane.xlu1 %2047  ;;  %4115 = vmatprep.mubr.msk.bf16.mxu0 %vm954_vm1, %v2163_v28 }
 0x8c5   :  { %v2045_v62 = vpop.xlane.xlu0 %2044  ;;  %v2149_v44 = vadd.f32 %v6144_v12, %v2127_v39  ;;  %v2107_v42 = vmul.f32 %v4398_v57, %v6054_v14  ;;  %4407 = vrsqrt.f32 %v2082_v18  ;;  %v2068_v16 = vmul.f32 0.015625, %v2048_v24 }
 0x8c6   :  { %4409 = vrsqrt.f32 %v2081_v38  ;;  %v2067_v48 = vmul.f32 0.015625, %v2045_v62  ;;  %v2130_v15 = vmul.f32 %v6139_v26, %v2108_v5 }
 0x8c7   :  { %v4400_v9 = vpop.eup %4399  ;;  %v2084_v36 = vadd.f32 1e-05, %v2068_v16  ;;  %v2164_v1 = vpack.c.bf16 %v2150_v35, %v2149_v44  ;;  %v2129_v33 = vmul.f32 %v6139_v26, %v2107_v42 }
 0x8c8   :  { %v4402_v13 = vpop.eup %4401  ;;  %v2110_v8 = vmul.f32 %v4400_v9, %v6063_v22  ;;  %v2083_v49 = vadd.f32 1e-05, %v2067_v48  ;;  %v2054_v3 = vpop.xlane.xlu1 %2053  ;;  %v2152_v4 = vadd.f32 %v6144_v12, %v2130_v15 }
 0x8c9   :  { %v2051_v50 = vpop.xlane.xlu0 %2050  ;;  %v2109_v14 = vmul.f32 %v4402_v13, %v6066_v23  ;;  %4411 = vrsqrt.f32 %v2084_v36  ;;  %v2070_v25 = vmul.f32 0.015625, %v2054_v3  ;;  %4116 = vmatmul.mubr.msk.bf16.vlgmr.msra.gmra.mrb[20].mxu0 %vm954_vm1, %v2164_v1  ;;  %v2151_v19 = vadd.f32 %v6144_v12, %v2129_v33 }
 0x8ca   :  { %v2069_v7 = vmul.f32 0.015625, %v2051_v50  ;;  %4413 = vrsqrt.f32 %v2083_v49  ;;  %v2132_v59 = vmul.f32 %v6139_v26, %v2110_v8 }
 0x8cb   :  { %v4404_v60 = vpop.eup %4403  ;;  %v2086_v10 = vadd.f32 1e-05, %v2070_v25  ;;  %v2131_v31 = vmul.f32 %v6139_v26, %v2109_v14  ;;  %v2165_v53 = vpack.c.bf16 %v2152_v4, %v2151_v19  ;;  %v4184_v19 = vld [vmem:[%s7219_s14 + $0x8] sm:$0xff]  }
 0x8cc   :  { %v2085_v22 = vadd.f32 1e-05, %v2069_v7  ;;  %v4406_v20 = vpop.eup %4405  ;;  %v2112_v34 = vmul.f32 %v4404_v60, %v6075_v0  ;;  %v2154_v23 = vadd.f32 %v6144_v12, %v2132_v59  ;;  %v4187_v59 = vld [vmem:[%s7219_s14 + $0x20] sm:$0xff]   ;;  %v4188_v60 = vld [vmem:[%s7219_s14 + $0x28] sm:$0xff]  }
 0x8cd   :  { %v2111_v28 = vmul.f32 %v4406_v20, %v6078_v46  ;;  %4415 = vrsqrt.f32 %v2086_v10  ;;  %v2153_v2 = vadd.f32 %v6144_v12, %v2131_v31  ;;  %4119 = vmatprep.mubr.msk.bf16.mxu0 %vm954_vm1, %v2165_v53  ;;  %v4189_v10 = vld [vmem:[%s7219_s14 + $0x30] sm:$0xff]   ;;  %v4190_v31 = vld [vmem:[%s7219_s14 + $0x38] sm:$0xff]  }
 0x8ce   :  { %4417 = vrsqrt.f32 %v2085_v22  ;;  %v2134_v39 = vmul.f32 %v6139_v26, %v2112_v34  ;;  %v2331_v22 = vlaneseq }
 0x8cf   :  { %v4408_v18 = vpop.eup %4407  ;;  %v2166_v38 = vpack.c.bf16 %v2154_v23, %v2153_v2  ;;  %v2133_v57 = vmul.f32 %v6139_v26, %v2111_v28  ;;  %v2956_v28 = vld [vmem:[%s7217_s12] sm:$0xff] }
 0x8d0   :  { %v4410_v35 = vpop.eup %4409  ;;  %v2114_v0 = vmul.f32 %v4408_v18, %v6087_v63  ;;  %v2156_v5 = vadd.f32 %v6144_v12, %v2134_v39  ;;  %v6223_v20 = vshrl.u32 %v2331_v22, 7 }
 0x8d1   :  { %v2113_v24 = vmul.f32 %v4410_v35, %v6090_v37  ;;  %4120 = vmatmul.mubr.msk.bf16.gmra.mrb[24].mxu0 %vm954_vm1, %v2166_v38  ;;  %v2155_v46 = vadd.f32 %v6144_v12, %v2133_v57 }
 0x8d2   :  { %v2136_v62 = vmul.f32 %v6139_v26, %v2114_v0  ;;  %v2334_v34 = vadd.s32 16, %v6223_v20  ;;  %v3149_v53 = vsub.s32 1, %v6223_v20  ;;  %v2335_v23 = vadd.s32 24, %v6223_v20 }
 0x8d3   :  { %v4412_v44 = vpop.eup %4411  ;;  %v2167_v42 = vpack.c.bf16 %v2156_v5, %v2155_v46  ;;  %v2135_v16 = vmul.f32 %v6139_v26, %v2113_v24  ;;  %v3169_v2 = vsub.s32 4, %v6223_v20  ;;  %v3205_v39 = vsub.s32 7, %v6223_v20 }
 0x8d4   :  { %v4414_v48 = vpop.eup %4413  ;;  %v2116_v15 = vmul.f32 %v4412_v44, %v6099_v47  ;;  %v2158_v9 = vadd.f32 %v6144_v12, %v2136_v62  ;;  %v2558_v18 = vand.u32 7, %v2334_v34  ;;  %v2333_v38 = vadd.s32 8, %v6223_v20 }
 0x8d5   :  { %v2115_v63 = vmul.f32 %v4414_v48, %v6102_v29  ;;  %4123 = vmatprep.mubr.msk.bf16.mxu0 %vm954_vm1, %v2167_v42  ;;  %v2157_v37 = vadd.f32 %v6144_v12, %v2135_v16  ;;  %v6234_v57 = vrot.slane %v2956_v28, %v3149_v53  ;;  %v2993_v35 = vsub.s32 0, %v6223_v20 }
 0x8d6   :  { %v2138_v36 = vmul.f32 %v6139_v26, %v2116_v15  ;;  %v2565_v0 = vand.u32 7, %v2335_v23  ;;  %v4626_v5 = vmov 0.0   ;;  %v3274_v46 = vsub.s32 2, %v6223_v20 }
 0x8d7   :  { %v4416_v1 = vpop.eup %4415  ;;  %v2168_v33 = vpack.c.bf16 %v2158_v9, %v2157_v37  ;;  %v2137_v13 = vmul.f32 %v6139_v26, %v2115_v63  ;;  %v6238_v24 = vrot.slane %v4626_v5, 7  ;;  %v3045_v62 = vsub.s32 3, %v6223_v20 }
 0x8d8   :  { %v4418_v8 = vpop.eup %4417  ;;  %v2118_v49 = vmul.f32 %v4416_v1, %v6111_v61  ;;  %v2160_v3 = vadd.f32 %v6144_v12, %v2138_v36  ;;  %v2336_v44 = vadd.s32 32, %v6223_v20  ;;  %v6243_v42 = vrot.slane %v2956_v28, %v3169_v2 }
 0x8d9   :  { %v2117_v47 = vmul.f32 %v4418_v8, %v6114_v6  ;;  %4124 = vmatmul.mubr.msk.bf16.gmra.mrb[28].mxu0 %vm954_vm1, %v2168_v33  ;;  %v2159_v29 = vadd.f32 %v6144_v12, %v2137_v13  ;;  %v4183_v6 = vld [vmem:[%s7219_s14] sm:$0xff]   ;;  %v6245_v16 = vrot.slane %v2956_v28, %v3205_v39  ;;  %v3113_v48 = vsub.s32 6, %v6223_v20 }
 0x8da   :  { %v2140_v50 = vmul.f32 %v6139_v26, %v2118_v49  ;;  %4131 = vmatprep.subr.bf16.mxu1 %v4183_v6  ;;  %v3326_v15 = vsub.s32 5, %v6223_v20  ;;  %vm2734_vm2 = vcmp.ge.s32.totalorder %v2558_v18, 1  ;;  %v2544_v9 = vand.u32 7, %v6223_v20 }
 0x8db   :  { %v2169_v4 = vpack.c.bf16 %v2160_v3, %v2159_v29  ;;  %v2139_v14 = vmul.f32 %v6139_v26, %v2117_v47  ;;  %4132 = vmatpush3.bf16.msra.mxu1 %v4183_v6  ;;  %v4185_v26 = vld [vmem:[%s7219_s14 + $0x10] sm:$0xff]   ;;  %v2551_v63 = vand.u32 7, %v2333_v38  ;;  %v2337_v37 = vadd.s32 40, %v6223_v20 }
 0x8dc   :  { %v2162_v25 = vadd.f32 %v6144_v12, %v2140_v50  ;;  %4133 = vmatprep.subr.bf16.mxu1 %v4184_v19  ;;  %v6251_v36 = vrot.slane %v2956_v28, %v2993_v35  ;;  %v6254_v1 = vmul.f32 0.0, %v6234_v57  ;;  %v6257_v33 = vrot.slane %v4626_v5, 1 }
 0x8dd   :  { %4127 = vmatprep.mubr.msk.bf16.mxu0 %vm954_vm1, %v2169_v4  ;;  %v2161_v7 = vadd.f32 %v6144_v12, %v2139_v14  ;;  %v4186_v12 = vld [vmem:[%s7219_s14 + $0x18] sm:$0xff]   ;;  %vm2735_vm3 = vcmp.ge.s32.totalorder %v2565_v0, 1  ;;  %v6259_v13 = vrot.slane %v2956_v28, %v3274_v46  ;;  %v6261_v8 = vrot.slane %v2956_v28, %v3045_v62 }
 0x8de   :  { %v2572_v49 = vand.u32 7, %v2336_v44  ;;  %v2338_v3 = vadd.s32 48, %v6223_v20  ;;  %v6264_v47 = vrot.slane %v2956_v28, %v3113_v48  ;;  %v6266_v29 = vrot.slane %v2956_v28, %v3326_v15 }
 0x8df   :  { %v2170_v61 = vpack.c.bf16 %v2162_v25, %v2161_v7  ;;  %4134 = vmatpush3.bf16.msra.mxu1 %v4184_v19  ;;  %v6269_v50 = vsel %vm2734_vm2, 1.0, %v4626_v5  ;;  %v2339_v4 = vadd.s32 56, %v6223_v20  ;;  %v6273_v14 = vsel %vm2735_vm3, 1.0, %v4626_v5 }
 0x8e0   :  { %4135 = vmatprep.subr.bf16.mxu1 %v4185_v26  ;;  %vm2733_vm4 = vcmp.ge.s32.totalorder %v2551_v63, 1  ;;  %vm2780_vm5 = vcmp.le.s32.totalorder %v2544_v9, 6  ;;  %v2579_v25 = vand.u32 7, %v2337_v37  ;;  %v6276_v7 = vmul.f32 0.0, %v6245_v16 }
 0x8e1   :  { %4128 = vmatmul.mubr.msk.bf16.gmra.mrb[32].mxu0 %vm954_vm1, %v2170_v61  ;;  %vm2732_vm6 = vcmp.ge.s32.totalorder %v2544_v9, 1  ;;  %vm2781_vm7 = vcmp.le.s32.totalorder %v2551_v63, 6  ;;  %vm2782_vm8 = vcmp.le.s32.totalorder %v2558_v18, 6  ;;  %vm2783_vm9 = vcmp.le.s32.totalorder %v2565_v0, 6 }
 0x8e2   :  { %7429 = vst [vmem:[#allocation65_spill] sm:$0xff] %v6276_v7  ;;  %vm2736_vm10 = vcmp.ge.s32.totalorder %v2572_v49, 1  ;;  %v2586_v61 = vand.u32 7, %v2338_v3  ;;  %v2340_v6 = vadd.s32 64, %v6223_v20  ;;  %v6280_v19 = vsel %vm2733_vm4, 1.0, %v4626_v5 }
 0x8e3   :  { %4136 = vmatpush3.bf16.msra.mxu1 %v4185_v26  ;;  %7430 = vst [vmem:[#allocation60_spill] sm:$0xff] %v6280_v19  ;;  %v6283_v26 = vsel %vm2780_vm5, 1.0, %v4626_v5  ;;  %vm2737_vm11 = vcmp.ge.s32.totalorder %v2579_v25, 1  ;;  %v2343_v22 = vadd.s32 88, %v6223_v20  ;;  %v6295_v34 = vsel %vm2782_vm8, 1.0, %v4626_v5 }
 0x8e4   :  { %4137 = vmatprep.subr.bf16.mxu1 %v4186_v12  ;;  %7431 = vst [vmem:[#allocation62_spill] sm:$0xff] %v6283_v26  ;;  %7434 = vst [vmem:[#allocation59_spill] sm:$0xff] %v6295_v34  ;;  %v6298_v53 = vsel %vm2783_vm9, 1.0, %v4626_v5  ;;  %v6301_v23 = vsel %vm2736_vm10, 1.0, %v4626_v5  ;;  %vm2784_vm12 = vcmp.le.s32.totalorder %v2572_v49, 6  ;;  %vm2785_vm13 = vcmp.le.s32.totalorder %v2579_v25, 6 }
 0x8e5   :  { %7435 = vst [vmem:[#allocation22_spill] sm:$0xff] %v6298_v53  ;;  %7436 = vst [vmem:[#allocation20_spill] sm:$0xff] %v6301_v23  ;;  %vm2738_vm14 = vcmp.ge.s32.totalorder %v2586_v61, 1  ;;  %v2600_v28 = vand.u32 7, %v2340_v6  ;;  %v6304_v2 = vsel %vm2737_vm11, 1.0, %v4626_v5  ;;  %v2344_v18 = vadd.s32 96, %v6223_v20 }
 0x8e6   :  { %7437 = vst [vmem:[#allocation24_spill] sm:$0xff] %v6304_v2  ;;  %v2621_v35 = vand.u32 7, %v2343_v22  ;;  %v2345_v0 = vadd.s32 104, %v6223_v20  ;;  %v2347_v46 = vadd.s32 120, %v6223_v20  ;;  %v6310_v62 = vsel %vm2784_vm12, 1.0, %v4626_v5 }
 0x8e7   :  { %4138 = vmatpush3.bf16.msra.mxu1 %v4186_v12  ;;  %v2593_v12 = vand.u32 7, %v2339_v4  ;;  %7438 = vst [vmem:[#allocation25_spill] sm:$0xff] %v6310_v62  ;;  %v6313_v44 = vsel %vm2785_vm13, 1.0, %v4626_v5  ;;  %v6316_v48 = vsel %vm2738_vm14, 1.0, %v4626_v5  ;;  %v2346_v15 = vadd.s32 112, %v6223_v20 }
 0x8e8   :  { %4139 = vmatprep.subr.bf16.mxu1 %v4187_v59  ;;  %7439 = vst [vmem:[#allocation27_spill] sm:$0xff] %v6313_v44  ;;  %7440 = vst [vmem:[#allocation29_spill] sm:$0xff] %v6316_v48  ;;  %vm2786_vm0 = vcmp.le.s32.totalorder %v2586_v61, 6  ;;  %vm2740_vm3 = vcmp.ge.s32.totalorder %v2600_v28, 1  ;;  %vm2974_vm4 = vcmp.lt.s32.totalorder %v6223_v20, 1  ;;  %v2628_v37 = vand.u32 7, %v2344_v18 }
 0x8e9   :  { %vm2739_vm15 = vcmp.ge.s32.totalorder %v2593_v12, 1  ;;  %vm2787_vm2 = vcmp.le.s32.totalorder %v2593_v12, 6  ;;  %vm2743_vm9 = vcmp.ge.s32.totalorder %v2621_v35, 1  ;;  %v2635_v49 = vand.u32 7, %v2345_v0 }
 0x8ea   :  { %v6320_v9 = vsel %vm2739_vm15, 1.0, %v4626_v5  ;;  %v2649_v3 = vand.u32 7, %v2347_v46  ;;  %vm3255_vm10 = vcmp.lt.s32.totalorder %v6223_v20, 7  ;;  %v6329_v4 = vsel %vm2786_vm0, 1.0, %v4626_v5 }
 0x8eb   :  { %4140 = vmatpush3.bf16.msra.mxu1 %v4187_v59  ;;  %v2341_v59 = vadd.s32 72, %v6223_v20  ;;  %7441 = vst [vmem:[#allocation31_spill] sm:$0xff] %v6320_v9  ;;  %7444 = vst [vmem:[#allocation33_spill] sm:$0xff] %v6329_v4  ;;  %v6332_v25 = vsel %vm2787_vm2, 1.0, %v4626_v5  ;;  %v6335_v61 = vsel %vm2740_vm3, 1.0, %v4626_v5  ;;  %v2642_v6 = vand.u32 7, %v2346_v15 }
 0x8ec   :  { %4141 = vmatprep.subr.bf16.mxu1 %v4188_v60  ;;  %7445 = vst [vmem:[#allocation19_spill] sm:$0xff] %v6332_v25  ;;  %7446 = vst [vmem:[#allocation21_spill] sm:$0xff] %v6335_v61  ;;  %vm2791_vm12 = vcmp.le.s32.totalorder %v2621_v35, 6  ;;  %vm2744_vm13 = vcmp.ge.s32.totalorder %v2628_v37, 1  ;;  %vm2745_vm14 = vcmp.ge.s32.totalorder %v2635_v49, 1  ;;  %vm2792_vm15 = vcmp.le.s32.totalorder %v2628_v37, 6 }
 0x8ed   :  { %v2607_v39 = vand.u32 7, %v2341_v59  ;;  %vm2793_vm0 = vcmp.le.s32.totalorder %v2635_v49, 6  ;;  %vm2795_vm2 = vcmp.le.s32.totalorder %v2649_v3, 6  ;;  %v6360_v0 = vsel %vm2791_vm12, 1.0, %v4626_v5 }
 0x8ee   :  { %7453 = vst [vmem:[#allocation35_spill] sm:$0xff] %v6360_v0  ;;  %vm2746_vm3 = vcmp.ge.s32.totalorder %v2642_v6, 1  ;;  %v6367_v41 = vsel %vm2744_vm13, 1.0, %v4626_v5  ;;  %v6370_v49 = vsel %vm2745_vm14, 1.0, %v4626_v5  ;;  %v6373_v56 = vsel %vm2792_vm15, 1.0, %v4626_v5 }
 0x8ef   :  { %4142 = vmatpush3.bf16.msra.mxu1 %v4188_v60  ;;  %v6287_v60 = vsel %vm2781_vm7, 1.0, %v4626_v5  ;;  %vm2741_vm5 = vcmp.ge.s32.totalorder %v2607_v39, 1  ;;  %vm6323_vm7 = vcmp.le.s32.totalorder %v2607_v39, 6  ;;  %v6354_v39 = vsel %vm2743_vm9, 1.0, %v4626_v5  ;;  %7454 = vst [vmem:[#allocation36_spill] sm:$0xff] %v6367_v41  ;;  %7455 = vst [vmem:[#allocation38_spill] sm:$0xff] %v6370_v49 }
 0x8f0   :  { %4143 = vmatprep.subr.bf16.mxu1 %v4189_v10  ;;  %7432 = vst [vmem:[#allocation66_spill] sm:$0xff] %v6287_v60  ;;  %v6338_v12 = vsel %vm2741_vm5, 1.0, %v4626_v5  ;;  %v6348_v22 = vsel %vm6323_vm7, 1.0, %v4626_v5  ;;  %7451 = vst [vmem:[#allocation30_spill] sm:$0xff] %v6354_v39  ;;  %vm2747_vm5 = vcmp.ge.s32.totalorder %v2649_v3, 1  ;;  %v6376_v58 = vsel %vm2793_vm0, 1.0, %v4626_v5 }
 0x8f1   :  { %7447 = vst [vmem:[#allocation23_spill] sm:$0xff] %v6338_v12  ;;  %7449 = vst [vmem:[#allocation26_spill] sm:$0xff] %v6348_v22  ;;  %v6379_v3 = vsel %vm2795_vm2, 1.0, %v4626_v5  ;;  %v6385_v40 = vsel %vm2746_vm3, 1.0, %v4626_v5 }
 0x8f2   :  { %7456 = vst [vmem:[#allocation37_spill] sm:$0xff] %v6373_v56  ;;  %7457 = vst [vmem:[#allocation39_spill] sm:$0xff] %v6376_v58 }
 0x8f3   :  { %4144 = vmatpush3.bf16.msra.mxu1 %v4189_v10  ;;  %v2342_v10 = vadd.s32 80, %v6223_v20  ;;  %7458 = vst [vmem:[#allocation40_spill] sm:$0xff] %v6379_v3  ;;  %7459 = vst [vmem:[#allocation42_spill] sm:$0xff] %v6385_v40 }
 0x8f4   :  { %4145 = vmatprep.subr.bf16.mxu1 %v4190_v31 }
 0x8f5   :  { %v2614_v38 = vand.u32 7, %v2342_v10  ;;  %v6343_v10 = vld [vmem:[#allocation10] ss:$0 sm:$0xff] }
 0x8f7   :  { %4146 = vmatpush3.bf16.msra.mxu1 %v4190_v31  ;;  %v6292_v31 = vsel %vm2732_vm6, 1.0, %v4626_v5  ;;  %vm2788_vm6 = vcmp.le.s32.totalorder %v2600_v28, 6  ;;  %vm2742_vm8 = vcmp.ge.s32.totalorder %v2614_v38, 1  ;;  %vm2790_vm11 = vcmp.le.s32.totalorder %v2614_v38, 6 }
 0x8f8   :  { %7433 = vst [vmem:[#allocation63_spill] sm:$0xff] %v6292_v31  ;;  %v6341_v59 = vsel %vm2788_vm6, 1.0, %v4626_v5  ;;  %v6351_v28 = vsel %vm2742_vm8, 1.0, %v4626_v5  ;;  %v6357_v35 = vsel %vm2790_vm11, 1.0, %v4626_v5  ;;  %vm2794_vm6 = vcmp.le.s32.totalorder %v2642_v6, 6 }
 0x8f9   :  { %7448 = vst [vmem:[#allocation28_spill] sm:$0xff] %v6341_v59  ;;  %7450 = vst [vmem:[#allocation32_spill] sm:$0xff] %v6351_v28  ;;  %v6388_v6 = vsel %vm2747_vm5, 1.0, %v4626_v5  ;;  %v6397_v51 = vsel %vm2794_vm6, 1.0, %v4626_v5 }
 0x8fa   :  { %7452 = vst [vmem:[#allocation34_spill] sm:$0xff] %v6357_v35  ;;  %7460 = vst [vmem:[#allocation41_spill] sm:$0xff] %v6388_v6 }
 0x8fb   :  { %7461 = vst [vmem:[#allocation43_spill] sm:$0xff] %v6397_v51 }
 0x99c   :  { %v4117_v18 = vpop.f32.mrb[20].mxu0 }
 0x99d   :  { %v2268_v38 = vpop.f32.mrb[21].mxu0  ;;  %v6363_v46 = vadd.f32 %v4117_v18, %v6343_v10 }
 0x99e   :  { %v2269_v15 = vadd.f32 %v6343_v10, %v2268_v38  ;;  %v4118_v63 = vpop.f32.mrb[22].mxu0 }
 0x99f   :  { %v2271_v37 = vpop.f32.mrb[23].mxu0  ;;  %v6393_v45 = vadd.f32 %v4118_v63, %v6343_v10  ;;  %v2960_v54 = vrot.slane %v6363_v46, 7  ;;  %v3154_v21 = vmul.f32 %v6234_v57, %v6363_v46  ;;  %v3173_v27 = vmul.f32 %v6243_v42, %v6363_v46 }
 0x9a0   :  { %v6381_v18 = vrot.slane %v2269_v15, 7  ;;  %v3171_v38 = vmul.f32 %v6243_v42, %v2269_v15  ;;  %v6390_v17 = vrot.slane %v2269_v15, 1  ;;  %v2272_v11 = vadd.f32 %v6343_v10, %v2271_v37 }
 0x9a1   :  { %v6410_v63 = vmul.f32 %v6245_v16, %v6363_v46  ;;  %v3241_v5 = vrot.slane %v6363_v46, 1  ;;  %v3152_v37 = vmul.f32 %v6234_v57, %v2269_v15  ;;  %v7294_v30 = vrot.slane %v6393_v45, 7 }
 0x9a2   :  { %v2990_v52 = vsel %vm2974_vm4, %v6238_v24, %v6381_v18  ;;  %v3187_v32 = vadd.f32 %v3171_v38, %v6254_v1  ;;  %v3271_v55 = vsel %vm3255_vm10, %v6257_v33, %v6390_v17  ;;  %v3174_v43 = vmul.f32 %v6243_v42, %v6393_v45 }
 0x9a3   :  { %v6424_v6 = vmul.f32 %v6251_v36, %v2990_v52  ;;  %v2987_v46 = vsel %vm2974_vm4, %v2960_v54, %v7294_v30  ;;  %v6432_v15 = vmul.f32 %v6234_v57, %v6393_v45  ;;  %v2959_v38 = vrot.slane %v2272_v11, 7 }
 0x9a4   :  { %v4121_v51 = vpop.f32.mrb[24].mxu0  ;;  %v3050_v56 = vmul.f32 %v6261_v8, %v2987_v46  ;;  %v6435_v58 = vadd.f32 %v3174_v43, %v3154_v21  ;;  %v3153_v3 = vmul.f32 %v6234_v57, %v2272_v11  ;;  %v3172_v52 = vmul.f32 %v6243_v42, %v2272_v11 }
 0x9a5   :  { %v2284_v40 = vpop.f32.mrb[25].mxu0  ;;  %v6440_v41 = vmul.f32 %v6259_v13, %v3271_v55  ;;  %v7462_v30 = vrot.slane %v6393_v45, 1  ;;  %v2988_v35 = vsel %vm2974_vm4, %v2959_v38, %v2960_v54  ;;  %v2989_v43 = vsel %vm2974_vm4, %v6381_v18, %v2959_v38 }
 0x9a6   :  { %v4122_v49 = vpop.f32.mrb[26].mxu0  ;;  %v6454_v39 = vmul.f32 %v6251_v36, %v2987_v46  ;;  %v3209_v55 = vmul.f32 %v6245_v16, %v6393_v45  ;;  %v2997_v28 = vmul.f32 %v6251_v36, %v2989_v43  ;;  %v2998_v22 = vmul.f32 %v6251_v36, %v2988_v35 }
 0x9a7   :  { %v6446_v0 = vsel %vm3255_vm10, %v3241_v5, %v7462_v30  ;;  %v2287_v21 = vpop.f32.mrb[27].mxu0  ;;  %v3117_v30 = vmul.f32 %v6264_v47, %v2987_v46  ;;  %v3049_v59 = vmul.f32 %v6261_v8, %v2988_v35  ;;  %v3109_v12 = vsel %vm2974_vm4, %v6238_v24, %v2959_v38 }
 0x9a8   :  { %7463 = vst [vmem:[#allocation44_spill] sm:$0xff] %v6446_v0  ;;  %7464 = vst [vmem:[#allocation45_spill] sm:$0xff] %v6454_v39  ;;  %v6463_v54 = vmul.f32 %v6259_v13, %v6446_v0  ;;  %v3066_v61 = vadd.f32 %v3050_v56, %v2998_v22  ;;  %v6469_v25 = vadd.f32 %v3172_v52, %v3152_v37  ;;  %v3240_v62 = vrot.slane %v2272_v11, 1 }
 0x9a9   :  { %v3189_v4 = vadd.f32 %v3173_v27, %v3153_v3  ;;  %v3207_v9 = vmul.f32 %v6245_v16, %v2272_v11  ;;  %v3330_v48 = vmul.f32 %v6266_v29, %v6446_v0  ;;  %v6475_v46 = vmul.f32 %v6261_v8, %v2989_v43 }
 0x9aa   :  { %v3065_v44 = vadd.f32 %v3049_v59, %v2997_v28  ;;  %v2293_v60 = vadd.f32 %v4121_v51, %v6343_v10  ;;  %v6481_v56 = vadd.f32 %v6343_v10, %v2284_v40  ;;  %v6486_v27 = vmul.f32 %v6264_v47, %v3109_v12 }
 0x9ab   :  { %v6477_v2 = vadd.f32 %v3207_v9, %v3187_v32  ;;  %v3225_v23 = vadd.f32 %v3209_v55, %v3189_v4  ;;  %v6490_v37 = vsel %vm3255_vm10, %v3240_v62, %v3241_v5  ;;  %v3270_v32 = vsel %vm3255_vm10, %v6390_v17, %v3240_v62 }
 0x9ac   :  { %v6483_v22 = vpop.f32.mrb[28].mxu0  ;;  %v3133_v3 = vadd.f32 %v3117_v30, %v3065_v44  ;;  %7466 = vst [vmem:[#allocation47_spill] sm:$0xff] %v6490_v37  ;;  %v6498_v51 = vmul.f32 %v6264_v47, %v2988_v35  ;;  %v3278_v40 = vmul.f32 %v6259_v13, %v6490_v37  ;;  %v2296_v9 = vadd.f32 %v4122_v49, %v6343_v10 }
 0x9ad   :  { %7465 = vst [vmem:[#allocation46_spill] sm:$0xff] %v6477_v2  ;;  %v6495_v11 = vpop.f32.mrb[29].mxu0  ;;  %v6504_v44 = vadd.f32 %v6343_v10, %v2287_v21  ;;  %v6509_v12 = vmul.f32 %v6259_v13, %v3270_v32  ;;  %v6512_v59 = vmul.f32 %v6266_v29, %v3270_v32  ;;  %v6517_v28 = vsel %vm3255_vm10, %v6257_v33, %v3240_v62 }
 0x9ae   :  { %v6506_v4 = vpop.f32.mrb[30].mxu0  ;;  %7469 = vst [vmem:[#allocation50_spill] sm:$0xff] %v6517_v28  ;;  %v3430_v35 = vmul.f32 %v6269_v50, %v3133_v3  ;;  %v6524_v49 = vmul.f32 %v6266_v29, %v6490_v37  ;;  %v3346_v38 = vadd.f32 %v3330_v48, %v3278_v40  ;;  %v2964_v52 = vrot.slane %v2293_v60, 7 }
 0x9af   :  { %7467 = vst [vmem:[#allocation48_spill] sm:$0xff] %v6509_v12  ;;  %7468 = vst [vmem:[#allocation49_spill] sm:$0xff] %v6512_v59  ;;  %v6520_v5 = vpop.f32.mrb[31].mxu0  ;;  %v2962_v43 = vrot.slane %v6481_v56, 7  ;;  %v6529_v55 = vrot.slane %v2293_v60, 1  ;;  %v3175_v62 = vmul.f32 %v6243_v42, %v6481_v56  ;;  %v3210_v50 = vmul.f32 %v6245_v16, %v6481_v56 }
 0x9b0   :  { %7470 = vst [vmem:[#allocation73_spill] sm:$0xff] %v6524_v49  ;;  %v6527_v21 = vadd.f32 %v3430_v35, %v3225_v23  ;;  %v3177_v30 = vmul.f32 %v6243_v42, %v2293_v60  ;;  %v7472_v3 = vrot.slane %v6393_v45, 7  ;;  %v3243_v32 = vrot.slane %v6481_v56, 1 }
 0x9b1   :  { %v6541_v40 = vrot.slane %v2296_v9, 7  ;;  %v6544_v23 = vmul.f32 %v6245_v16, %v2293_v60  ;;  %v3156_v28 = vmul.f32 %v6234_v57, %v6481_v56  ;;  %v3191_v26 = vadd.f32 %v3175_v62, %v6432_v15 }
 0x9b2   :  { %7471 = vst [vmem:[#allocation74_spill] sm:$0xff] %v6527_v21  ;;  %v2986_v48 = vsel %vm2974_vm4, %v7472_v3, %v2962_v43  ;;  %v2983_v21 = vsel %vm2974_vm4, %v2964_v52, %v6238_v24  ;;  %v6556_v3 = vld [vmem:[%s7217_s12 + $0x8] ss:$0 sm:$0xff]  ;;  %v3226_v2 = vadd.f32 %v3210_v50, %v6435_v58  ;;  %v3264_v62 = vsel %vm3255_vm10, %v6529_v55, %v6257_v33 }
 0x9b3   :  { %7473 = vst [vmem:[#allocation75_spill] sm:$0xff] %v6544_v23  ;;  %v3118_v35 = vmul.f32 %v6264_v47, %v2986_v48  ;;  %v7474_v23 = vrot.slane %v6393_v45, 1  ;;  %v3035_v15 = vsel %vm2974_vm4, %v2964_v52, %v6541_v40  ;;  %v6577_v50 = vmul.f32 %v6251_v36, %v2986_v48 }
 0x9b4   :  { %v6566_v56 = vpop.f32.mrb[32].mxu0  ;;  %v3102_v19 = vsel %vm2974_vm4, %v6541_v40, %v6238_v24  ;;  %v3158_v31 = vmul.f32 %v6234_v57, %v2293_v60  ;;  %v2963_v12 = vrot.slane %v6504_v44, 7  ;;  %v3157_v60 = vmul.f32 %v6234_v57, %v6504_v44 }
 0x9b5   :  { %v3267_v39 = vsel %vm3255_vm10, %v7474_v23, %v3243_v32  ;;  %v3134_v53 = vadd.f32 %v3118_v35, %v3066_v61  ;;  %v6574_v45 = vpop.f32.mrb[33].mxu0  ;;  %7475 = vst [vmem:[#allocation76_spill] sm:$0xff] %v6577_v50  ;;  %v6580_v23 = vmul.f32 %v6261_v8, %v2986_v48  ;;  %v3178_v50 = vmul.f32 %v6243_v42, %v2296_v9 }
 0x9b6   :  { %v3331_v34 = vmul.f32 %v6266_v29, %v3267_v39  ;;  %v3398_v58 = vmul.f32 %v6556_v3, %v3267_v39  ;;  %v6587_v61 = vpop.f32.mrb[34].mxu0  ;;  %v6597_v48 = vmul.f32 %v6259_v13, %v3267_v39 }
 0x9b7   :  { %7476 = vst [vmem:[#allocation77_spill] sm:$0xff] %v6580_v23  ;;  %v3431_v37 = vmul.f32 %v6273_v14, %v3134_v53  ;;  %v6594_v49 = vpop.f32.mrb[35].mxu0  ;;  %v3299_v23 = vrot.slane %v2296_v9, 1  ;;  %v3211_v14 = vmul.f32 %v6245_v16, %v6504_v44 }
 0x9b8   :  { %v3347_v35 = vadd.f32 %v3331_v34, %v6463_v54  ;;  %v6590_v0 = vadd.f32 %v3398_v58, %v3346_v38  ;;  %7477 = vst [vmem:[#allocation78_spill] sm:$0xff] %v6597_v48  ;;  %v3194_v34 = vadd.f32 %v3178_v50, %v3158_v31  ;;  %v3176_v54 = vmul.f32 %v6243_v42, %v6504_v44 }
 0x9b9   :  { %v6602_v59 = vadd.f32 %v3431_v37, %v3226_v2  ;;  %v3316_v53 = vsel %vm3255_vm10, %v6529_v55, %v3299_v23  ;;  %v3383_v39 = vsel %vm3255_vm10, %v3299_v23, %v6257_v33  ;;  %v2984_v38 = vsel %vm2974_vm4, %v2963_v12, %v2964_v52 }
 0x9ba   :  { %v2985_v31 = vsel %vm2974_vm4, %v2962_v43, %v2963_v12  ;;  %v6619_v2 = vmul.f32 %v6261_v8, %v3035_v15  ;;  %v6622_v37 = vmul.f32 %v6264_v47, %v3035_v15  ;;  %v6625_v58 = vmul.f32 %v6264_v47, %v3102_v19 }
 0x9bb   :  { %v6628_v50 = vmul.f32 %v6245_v16, %v2296_v9  ;;  %v6631_v48 = vadd.f32 %v6276_v7, %v3194_v34  ;;  %v6634_v52 = vmul.f32 %v6266_v29, %v3316_v53  ;;  %v6637_v12 = vmul.f32 %v6556_v3, %v3316_v53 }
 0x9bc   :  { %7478 = vst [vmem:[#allocation79_spill] sm:$0xff] %v6619_v2  ;;  %7479 = vst [vmem:[#allocation80_spill] sm:$0xff] %v6622_v37  ;;  %v6640_v43 = vmul.f32 %v6556_v3, %v3383_v39  ;;  %v6643_v15 = vmul.f32 %v6251_v36, %v2985_v31  ;;  %v6646_v19 = vmul.f32 %v6251_v36, %v2984_v38  ;;  %v3244_v53 = vrot.slane %v6504_v44, 1 }
 0x9bd   :  { %7480 = vst [vmem:[#allocation81_spill] sm:$0xff] %v6625_v58  ;;  %7481 = vst [vmem:[#allocation82_spill] sm:$0xff] %v6628_v50  ;;  %v6648_v9 = vadd.f32 %v3176_v54, %v3156_v28  ;;  %v6650_v58 = vadd.f32 %v3177_v30, %v3157_v60  ;;  %v6653_v34 = vmul.f32 %v6261_v8, %v2985_v31 }
 0x9be   :  { %7482 = vst [vmem:[#allocation83_spill] sm:$0xff] %v6631_v48  ;;  %7483 = vst [vmem:[#allocation84_spill] sm:$0xff] %v6634_v52  ;;  %v6655_v7 = vadd.f32 %v3211_v14, %v3191_v26  ;;  %v6660_v39 = vadd.f32 %v6483_v22, %v6343_v10  ;;  %v6663_v48 = vmul.f32 %v6261_v8, %v2984_v38 }
 0x9bf   :  { %7484 = vst [vmem:[#allocation85_spill] sm:$0xff] %v6637_v12  ;;  %7485 = vst [vmem:[#allocation86_spill] sm:$0xff] %v6640_v43  ;;  %v6666_v43 = vmul.f32 %v6264_v47, %v2985_v31  ;;  %v6669_v28 = vmul.f32 %v6264_v47, %v2984_v38  ;;  %v2301_v30 = vadd.f32 %v6343_v10, %v6495_v11 }
 0x9c0   :  { %7486 = vst [vmem:[#allocation87_spill] sm:$0xff] %v6643_v15  ;;  %7487 = vst [vmem:[#allocation88_spill] sm:$0xff] %v6646_v19  ;;  %v6676_v26 = vsel %vm3255_vm10, %v3244_v53, %v6529_v55  ;;  %v3266_v22 = vsel %vm3255_vm10, %v3243_v32, %v3244_v53  ;;  %v3003_v44 = vmul.f32 %v6251_v36, %v2983_v21  ;;  %v2968_v54 = vrot.slane %v6660_v39, 7 }
 0x9c1   :  { %7488 = vst [vmem:[#allocation89_spill] sm:$0xff] %v6650_v58  ;;  %7489 = vst [vmem:[#allocation90_spill] sm:$0xff] %v6655_v7  ;;  %v6683_v60 = vadd.f32 %v6506_v4, %v6343_v10  ;;  %v3162_v14 = vmul.f32 %v6234_v57, %v6660_v39  ;;  %v3283_v11 = vmul.f32 %v6259_v13, %v3264_v62  ;;  %v3247_v53 = vrot.slane %v2301_v30, 1 }
 0x9c2   :  { %7490 = vst [vmem:[#allocation91_spill] sm:$0xff] %v6663_v48  ;;  %7491 = vst [vmem:[#allocation92_spill] sm:$0xff] %v6676_v26  ;;  %v2304_v55 = vadd.f32 %v6343_v10, %v6520_v5  ;;  %v6692_v38 = vmul.f32 %v6259_v13, %v3266_v22  ;;  %v6696_v21 = vmul.f32 %v6259_v13, %v6676_v26  ;;  %v2966_v5 = vrot.slane %v2301_v30, 7 }
 0x9c3   :  { %v6699_v4 = vmul.f32 %v6266_v29, %v3266_v22  ;;  %v3399_v32 = vmul.f32 %v6556_v3, %v3266_v22  ;;  %v6704_v31 = vmul.f32 %v6266_v29, %v6676_v26  ;;  %v3181_v62 = vmul.f32 %v6243_v42, %v6660_v39 }
 0x9c4   :  { %7492 = vst [vmem:[#allocation93_spill] sm:$0xff] %v6696_v21  ;;  %v3179_v50 = vmul.f32 %v6243_v42, %v2301_v30  ;;  %v3182_v58 = vmul.f32 %v6243_v42, %v6683_v60  ;;  %v6716_v22 = vmul.f32 %v6245_v16, %v6660_v39  ;;  %v2982_v37 = vsel %vm2974_vm4, %v6238_v24, %v2966_v5 }
 0x9c5   :  { %7493 = vst [vmem:[#allocation94_spill] sm:$0xff] %v6704_v31  ;;  %v6708_v52 = vadd.f32 %v3399_v32, %v3347_v35  ;;  %v3034_v35 = vsel %vm2974_vm4, %v6541_v40, %v2966_v5  ;;  %v3263_v32 = vsel %vm3255_vm10, %v6257_v33, %v3247_v53  ;;  %v3249_v21 = vrot.slane %v6660_v39, 1 }
 0x9c6   :  { %7494 = vst [vmem:[#allocation95_spill] sm:$0xff] %v6716_v22  ;;  %v3055_v2 = vmul.f32 %v6261_v8, %v3034_v35  ;;  %v3160_v19 = vmul.f32 %v6234_v57, %v2301_v30  ;;  %v3315_v22 = vsel %vm3255_vm10, %v3299_v23, %v3247_v53  ;;  %v7495_v48 = vrot.slane %v6683_v60, 7 }
 0x9c7   :  { %v3335_v7 = vmul.f32 %v6266_v29, %v3315_v22  ;;  %v3163_v15 = vmul.f32 %v6234_v57, %v6683_v60  ;;  %v3198_v12 = vadd.f32 %v3182_v58, %v3162_v14  ;;  %v6740_v39 = vmul.f32 %v6251_v36, %v2982_v37 }
 0x9c8   :  { %v2979_v40 = vsel %vm2974_vm4, %v2968_v54, %v7495_v48  ;;  %v6742_v35 = vadd.f32 %v3055_v2, %v3003_v44  ;;  %v3195_v30 = vadd.f32 %v3179_v50, %v6254_v1  ;;  %v6746_v23 = vmul.f32 %v6259_v13, %v3263_v32 }
 0x9c9   :  { %v6748_v22 = vadd.f32 %v3335_v7, %v3283_v11  ;;  %v6752_v26 = vmul.f32 %v6245_v16, %v6683_v60  ;;  %v3250_v48 = vrot.slane %v6683_v60, 1  ;;  %v2967_v31 = vrot.slane %v2304_v55, 7 }
 0x9ca   :  { %7496 = vst [vmem:[#allocation96_spill] sm:$0xff] %v6746_v23  ;;  %v3161_v58 = vmul.f32 %v6234_v57, %v2304_v55  ;;  %v3180_v37 = vmul.f32 %v6243_v42, %v2304_v55  ;;  %v3215_v2 = vmul.f32 %v6245_v16, %v2304_v55  ;;  %v3248_v44 = vrot.slane %v2304_v55, 1 }
 0x9cb   :  { %7497 = vst [vmem:[#allocation97_spill] sm:$0xff] %v6752_v26  ;;  %v6759_v1 = vmul.f32 %v6251_v36, %v2979_v40  ;;  %v6763_v7 = vsel %vm3255_vm10, %v3249_v21, %v3250_v48  ;;  %v2980_v50 = vsel %vm2974_vm4, %v2967_v31, %v2968_v54  ;;  %v2981_v14 = vsel %vm2974_vm4, %v2966_v5, %v2967_v31 }
 0x9cc   :  { %7499 = vst [vmem:[#allocation99_spill] sm:$0xff] %v6763_v7  ;;  %v6770_v11 = vmul.f32 %v6261_v8, %v2979_v40  ;;  %v6773_v32 = vmul.f32 %v6264_v47, %v2979_v40  ;;  %v3101_v55 = vsel %vm2974_vm4, %v6238_v24, %v2967_v31  ;;  %v6782_v26 = vmul.f32 %v6259_v13, %v6763_v7 }
 0x9cd   :  { %7498 = vst [vmem:[#allocation98_spill] sm:$0xff] %v6759_v1  ;;  %v2325_v1 = vadd.f32 %v6566_v56, %v6343_v10  ;;  %v6786_v54 = vmul.f32 %v6266_v29, %v6763_v7  ;;  %v6789_v5 = vmul.f32 %v6251_v36, %v2981_v14  ;;  %v6792_v40 = vmul.f32 %v6251_v36, %v2980_v50 }
 0x9ce   :  { %7500 = vst [vmem:[#allocation100_spill] sm:$0xff] %v6770_v11  ;;  %7501 = vst [vmem:[#allocation101_spill] sm:$0xff] %v6773_v32  ;;  %v6794_v32 = vadd.f32 %v3180_v37, %v3160_v19  ;;  %v6796_v31 = vadd.f32 %v3181_v62, %v3161_v58  ;;  %v6798_v11 = vadd.f32 %v3215_v2, %v3195_v30 }
 0x9cf   :  { %7502 = vst [vmem:[#allocation102_spill] sm:$0xff] %v6782_v26  ;;  %7503 = vst [vmem:[#allocation103_spill] sm:$0xff] %v6786_v54  ;;  %v6802_v56 = vsel %vm3255_vm10, %v3248_v44, %v3249_v21  ;;  %v6805_v26 = vmul.f32 %v6261_v8, %v2981_v14  ;;  %v6808_v54 = vmul.f32 %v6261_v8, %v2980_v50  ;;  %v2972_v58 = vrot.slane %v2325_v1, 7 }
 0x9d0   :  { %7504 = vst [vmem:[#allocation104_spill] sm:$0xff] %v6789_v5  ;;  %7505 = vst [vmem:[#allocation105_spill] sm:$0xff] %v6792_v40  ;;  %v6811_v5 = vmul.f32 %v6264_v47, %v3101_v55  ;;  %v3262_v19 = vsel %vm3255_vm10, %v3247_v53, %v3248_v44  ;;  %v6816_v62 = vmul.f32 %v6264_v47, %v2980_v50 }
 0x9d1   :  { %7506 = vst [vmem:[#allocation106_spill] sm:$0xff] %v6796_v31  ;;  %7507 = vst [vmem:[#allocation107_spill] sm:$0xff] %v6798_v11  ;;  %v6820_v30 = vmul.f32 %v6259_v13, %v6802_v56  ;;  %v6824_v21 = vmul.f32 %v6266_v29, %v6802_v56  ;;  %v6827_v37 = vmul.f32 %v6259_v13, %v3262_v19 }
 0x9d2   :  { %7508 = vst [vmem:[#allocation108_spill] sm:$0xff] %v6802_v56  ;;  %7509 = vst [vmem:[#allocation109_spill] sm:$0xff] %v6808_v54  ;;  %v6832_v2 = vsel %vm3255_vm10, %v6257_v33, %v3248_v44  ;;  %v6836_v53 = vadd.f32 %v6343_v10, %v6574_v45  ;;  %v2328_v50 = vadd.f32 %v6587_v61, %v6343_v10 }
 0x9d3   :  { %7510 = vst [vmem:[#allocation110_spill] sm:$0xff] %v6820_v30  ;;  %7511 = vst [vmem:[#allocation111_spill] sm:$0xff] %v6824_v21  ;;  %v6841_v14 = vmul.f32 %v6266_v29, %v3262_v19  ;;  %v3185_v55 = vmul.f32 %v6243_v42, %v2325_v1  ;;  %v3253_v30 = vrot.slane %v2325_v1, 1  ;;  %v6846_v31 = vadd.f32 %v6475_v46, %v6424_v6 }
 0x9d4   :  { %7512 = vst [vmem:[#allocation112_spill] sm:$0xff] %v6827_v37  ;;  %v2975_v44 = vsel %vm2974_vm4, %v2972_v58, %v6238_v24  ;;  %v6852_v45 = vmul.f32 %v6245_v16, %v2325_v1  ;;  %v2970_v40 = vrot.slane %v6836_v53, 7  ;;  %v3183_v61 = vmul.f32 %v6243_v42, %v6836_v53 }
 0x9d5   :  { %7513 = vst [vmem:[#allocation113_spill] sm:$0xff] %v6841_v14  ;;  %v3218_v19 = vmul.f32 %v6245_v16, %v6836_v53  ;;  %v3251_v54 = vrot.slane %v6836_v53, 1  ;;  %v3026_v11 = vrot.slane %v2328_v50, 7  ;;  %v3166_v6 = vmul.f32 %v6234_v57, %v2325_v1 }
 0x9d6   :  { %7514 = vst [vmem:[#allocation114_spill] sm:$0xff] %v6852_v45  ;;  %v7515_v46 = vrot.slane %v6683_v60, 7  ;;  %v3199_v56 = vadd.f32 %v3183_v61, %v3163_v15  ;;  %v3186_v45 = vmul.f32 %v6243_v42, %v2328_v50  ;;  %v2320_v21 = vadd.f32 %v6343_v10, %v6594_v49 }
 0x9d7   :  { %v3256_v37 = vsel %vm3255_vm10, %v3253_v30, %v6257_v33  ;;  %v3164_v14 = vmul.f32 %v6234_v57, %v6836_v53  ;;  %v6873_v23 = vadd.f32 %v3218_v19, %v3198_v12  ;;  %v2995_v60 = vmul.f32 %v6251_v36, %v2975_v44 }
 0x9d8   :  { %v2978_v7 = vsel %vm2974_vm4, %v7515_v46, %v2970_v40  ;;  %v6878_v1 = vsel %vm3255_vm10, %v3250_v48, %v3251_v54  ;;  %v3027_v15 = vsel %vm2974_vm4, %v2972_v58, %v3026_v11  ;;  %v3042_v10 = vsel %vm2974_vm4, %v3026_v11, %v6381_v18 }
 0x9d9   :  { %7516 = vst [vmem:[#allocation115_spill] sm:$0xff] %v6873_v23  ;;  %7517 = vst [vmem:[#allocation116_spill] sm:$0xff] %v6878_v1  ;;  %v6886_v49 = vmul.f32 %v6245_v16, %v2328_v50  ;;  %v6889_v53 = vmul.f32 %v6251_v36, %v2978_v7  ;;  %v6892_v12 = vmul.f32 %v6261_v8, %v2978_v7 }
 0x9da   :  { %v6895_v44 = vmul.f32 %v6264_v47, %v2978_v7  ;;  %v3047_v48 = vmul.f32 %v6261_v8, %v3042_v10  ;;  %v6900_v61 = vmul.f32 %v6259_v13, %v6878_v1  ;;  %v6904_v18 = vmul.f32 %v6266_v29, %v6878_v1 }
 0x9db   :  { %7518 = vst [vmem:[#allocation117_spill] sm:$0xff] %v6886_v49  ;;  %7519 = vst [vmem:[#allocation118_spill] sm:$0xff] %v6889_v53  ;;  %v3110_v19 = vsel %vm2974_vm4, %v3026_v11, %v6238_v24  ;;  %v6909_v46 = vadd.f32 %v3186_v45, %v3166_v6  ;;  %v6912_v49 = vmul.f32 %v6261_v8, %v3027_v15  ;;  %v3307_v53 = vrot.slane %v2328_v50, 1 }
 0x9dc   :  { %7520 = vst [vmem:[#allocation119_spill] sm:$0xff] %v6892_v12  ;;  %7521 = vst [vmem:[#allocation120_spill] sm:$0xff] %v6895_v44  ;;  %v3063_v7 = vadd.f32 %v3047_v48, %v2995_v60  ;;  %v2971_v10 = vrot.slane %v2320_v21, 7  ;;  %v3165_v23 = vmul.f32 %v6234_v57, %v2320_v21  ;;  %v3219_v12 = vmul.f32 %v6245_v16, %v2320_v21 }
 0x9dd   :  { %7522 = vst [vmem:[#allocation121_spill] sm:$0xff] %v6900_v61  ;;  %7523 = vst [vmem:[#allocation122_spill] sm:$0xff] %v6909_v46  ;;  %v3184_v61 = vmul.f32 %v6243_v42, %v2320_v21  ;;  %v3252_v1 = vrot.slane %v2320_v21, 1  ;;  %v3308_v44 = vsel %vm3255_vm10, %v3253_v30, %v3307_v53  ;;  %v3323_v24 = vsel %vm3255_vm10, %v3307_v53, %v6390_v17  ;;  %v7538_v46 = vld [vmem:[#allocation46_spill] sm:$0xff] }
 0x9de   :  { %v3391_v11 = vsel %vm3255_vm10, %v3307_v53, %v6257_v33  ;;  %v2976_v50 = vsel %vm2974_vm4, %v2971_v10, %v2972_v58  ;;  %v6928_v57 = vmul.f32 %v6264_v47, %v3027_v15  ;;  %v6931_v42 = vmul.f32 %v6264_v47, %v3110_v19 }
 0x9df   :  { %v3291_v16 = vmul.f32 %v6259_v13, %v3256_v37  ;;  %v3343_v21 = vmul.f32 %v6266_v29, %v3323_v24  ;;  %v6936_v45 = vmul.f32 %v6266_v29, %v3308_v44  ;;  %v6939_v17 = vmul.f32 %v6556_v3, %v3308_v44 }
 0x9e0   :  { %v6942_v33 = vmul.f32 %v6556_v3, %v3391_v11  ;;  %v2977_v58 = vsel %vm2974_vm4, %v2970_v40, %v2971_v10  ;;  %v6949_v60 = vmul.f32 %v6251_v36, %v2976_v50  ;;  %v6952_v37 = vmul.f32 %v6261_v8, %v2976_v50 }
 0x9e1   :  { %v6946_v6 = vadd.f32 %v3343_v21, %v3291_v16  ;;  %v6955_v15 = vmul.f32 %v6264_v47, %v2976_v50  ;;  %v6957_v53 = vadd.f32 %v3184_v61, %v3164_v14  ;;  %v6959_v44 = vadd.f32 %v3185_v55, %v3165_v23  ;;  %v7528_v55 = vld [vmem:[#allocation73_spill] sm:$0xff]  ;;  %v7532_v50 = vld [vmem:[#allocation60_spill] sm:$0xff] }
 0x9e2   :  { %7524 = vst [vmem:[#allocation123_spill] sm:$0xff] %v6942_v33  ;;  %v6961_v48 = vadd.f32 %v3219_v12, %v3199_v56  ;;  %v6965_v40 = vsel %vm3255_vm10, %v3252_v1, %v3253_v30  ;;  %v6968_v19 = vmul.f32 %v6251_v36, %v2977_v58  ;;  %v6971_v10 = vmul.f32 %v6261_v8, %v2977_v58  ;;  %v7526_v30 = vld [vmem:[#allocation49_spill] sm:$0xff]  ;;  %v7530_v12 = vld [vmem:[#allocation44_spill] sm:$0xff] }
 0x9e3   :  { %7525 = vst [vmem:[#allocation124_spill] sm:$0xff] %v6946_v6  ;;  %v6975_v24 = vsel %vm3255_vm10, %v3251_v54, %v3252_v1  ;;  %v3131_v14 = vadd.f32 %v6486_v27, %v3063_v7  ;;  %v6979_v23 = vmul.f32 %v6264_v47, %v2977_v58  ;;  %v6983_v56 = vmul.f32 %v6266_v29, %v6965_v40  ;;  %v7527_v54 = vld [vmem:[#allocation48_spill] sm:$0xff]  ;;  %v7529_v27 = vld [vmem:[#allocation47_spill] sm:$0xff]  ;;  %v7535_v58 = vld [vmem:[#allocation45_spill] sm:$0xff] }
 0x9e4   :  { %v3132_v36 = vadd.f32 %v6498_v51, %v6846_v31  ;;  %v3224_v8 = vadd.f32 %v6410_v63, %v6469_v25  ;;  %v3344_v20 = vadd.f32 %v7526_v30, %v6440_v41  ;;  %v3345_v1 = vadd.f32 %v7528_v55, %v7527_v54  ;;  %v7531_v7 = vld [vmem:[#allocation63_spill] sm:$0xff]  ;;  %v7534_v25 = vld [vmem:[#allocation22_spill] sm:$0xff]  ;;  %v7536_v30 = vld [vmem:[#allocation77_spill] sm:$0xff] }
 0x9e5   :  { %v3396_v47 = vmul.f32 %v6556_v3, %v7529_v27  ;;  %v3397_v61 = vmul.f32 %v6556_v3, %v7530_v12  ;;  %v3428_v11 = vmul.f32 %v7531_v7, %v3131_v14  ;;  %v7533_v51 = vld [vmem:[#allocation59_spill] sm:$0xff]  ;;  %v3463_v63 = vmul.f32 %v7534_v25, %v6708_v52  ;;  %v7537_v55 = vld [vmem:[#allocation76_spill] sm:$0xff]  ;;  %v7539_v14 = vld [vmem:[#allocation74_spill] sm:$0xff] }
 0x9e6   :  { %v3429_v16 = vmul.f32 %v7532_v50, %v3132_v36  ;;  %v3462_v31 = vmul.f32 %v7533_v51, %v6590_v0  ;;  %v3067_v54 = vadd.f32 %v7536_v30, %v7535_v58  ;;  %v3068_v27 = vadd.f32 %v6653_v34, %v7537_v55  ;;  %v7540_v50 = vld [vmem:[#allocation62_spill] sm:$0xff]  ;;  %v7546_v58 = vld [vmem:[#allocation85_spill] sm:$0xff]  ;;  %v7547_v30 = vld [vmem:[#allocation20_spill] sm:$0xff] }
 0x9e7   :  { %v3412_v41 = vadd.f32 %v3396_v47, %v3344_v20  ;;  %v3413_v21 = vadd.f32 %v3397_v61, %v3345_v1  ;;  %v3444_v12 = vadd.f32 %v3428_v11, %v7538_v46  ;;  %v3479_v36 = vadd.f32 %v3463_v63, %v6602_v59  ;;  %v7541_v51 = vld [vmem:[#allocation66_spill] sm:$0xff]  ;;  %v7542_v46 = vld [vmem:[#allocation75_spill] sm:$0xff]  ;;  %v7545_v63 = vld [vmem:[#allocation92_spill] sm:$0xff] }
 0x9e8   :  { %v3445_v6 = vadd.f32 %v3429_v16, %v3224_v8  ;;  %v3478_v7 = vadd.f32 %v3462_v31, %v7539_v14  ;;  %v7012_v52 = vld [vmem:[#allocation11] ss:$0 sm:$0xff]  ;;  %v3135_v20 = vadd.f32 %v6666_v43, %v3067_v54  ;;  %v3136_v1 = vadd.f32 %v6669_v28, %v3068_v27  ;;  %v7548_v55 = vld [vmem:[#allocation24_spill] sm:$0xff]  ;;  %v7550_v14 = vld [vmem:[#allocation91_spill] sm:$0xff] }
 0x9e9   :  { %v3460_v0 = vmul.f32 %v7540_v50, %v3412_v41  ;;  %v3461_v33 = vmul.f32 %v7541_v51, %v3413_v21  ;;  %v3502_v34 = vadd.f32 %v7012_v52, %v3479_v36  ;;  %v3228_v8 = vadd.f32 %v7542_v46, %v6648_v9  ;;  %v7543_v61 = vld [vmem:[#allocation78_spill] sm:$0xff] }
 0x9ea   :  { %v3501_v47 = vadd.f32 %v7012_v52, %v3478_v7  ;;  %v3348_v59 = vadd.f32 %v6699_v4, %v7543_v61  ;;  %v7544_v31 = vld [vmem:[#allocation94_spill] sm:$0xff]  ;;  %v3400_v43 = vmul.f32 %v6556_v3, %v7545_v63  ;;  %v7028_v28 = vmul.f32 %v6259_v13, %v6975_v24 }
 0x9eb   :  { %v3476_v11 = vadd.f32 %v3460_v0, %v3444_v12  ;;  %v3477_v16 = vadd.f32 %v3461_v33, %v3445_v6  ;;  %v3349_v25 = vadd.f32 %v7544_v31, %v6692_v38  ;;  %v7032_v41 = vmul.f32 %v6266_v29, %v6975_v24  ;;  %v7549_v12 = vld [vmem:[#allocation87_spill] sm:$0xff]  ;;  %v7551_v51 = vld [vmem:[#allocation90_spill] sm:$0xff] }
 0x9ec   :  { %v3533_v9 = vmul.f32 0.70710677, %v3501_v47  ;;  %v3534_v21 = vmul.f32 0.70710677, %v3502_v34  ;;  %v3416_v6 = vadd.f32 %v3400_v43, %v3348_v59  ;;  %v3432_v54 = vmul.f32 %v7547_v30, %v3135_v20  ;;  %v7555_v20 = vld [vmem:[#allocation79_spill] sm:$0xff]  ;;  %v7558_v30 = vld [vmem:[#allocation82_spill] sm:$0xff] }
 0x9ed   :  { %v3499_v4 = vadd.f32 %v7012_v52, %v3476_v11  ;;  %v3500_v33 = vadd.f32 %v7012_v52, %v3477_v16  ;;  %v3417_v38 = vadd.f32 %v7546_v58, %v3349_v25  ;;  %v3433_v27 = vmul.f32 %v7548_v55, %v3136_v1  ;;  %v7552_v11 = vld [vmem:[#allocation25_spill] sm:$0xff]  ;;  %v7553_v16 = vld [vmem:[#allocation27_spill] sm:$0xff]  ;;  %v7554_v25 = vld [vmem:[#allocation88_spill] sm:$0xff] }
 0x9ee   :  { %4419 = verf.f32 %v3533_v9  ;;  %v3069_v7 = vadd.f32 %v7550_v14, %v7549_v12  ;;  %v3517_v50 = vmul.f32 0.5, %v3501_v47  ;;  %v3518_v0 = vmul.f32 0.5, %v3502_v34  ;;  %v7556_v1 = vld [vmem:[#allocation80_spill] sm:$0xff]  ;;  %v7557_v58 = vld [vmem:[#allocation89_spill] sm:$0xff] }
 0x9ef   :  { %v3531_v36 = vmul.f32 0.70710677, %v3499_v4  ;;  %v3532_v29 = vmul.f32 0.70710677, %v3500_v33  ;;  %4421 = verf.f32 %v3534_v21  ;;  %v3448_v46 = vadd.f32 %v3432_v54, %v7551_v51  ;;  %v7559_v34 = vld [vmem:[#allocation93_spill] sm:$0xff]  ;;  %v7560_v21 = vld [vmem:[#allocation84_spill] sm:$0xff] }
 0x9f0   :  { %v3449_v61 = vadd.f32 %v3433_v27, %v3228_v8  ;;  %v3464_v59 = vmul.f32 %v7552_v11, %v3416_v6  ;;  %v3465_v31 = vmul.f32 %v7553_v16, %v3417_v38  ;;  %v3070_v63 = vadd.f32 %v7555_v20, %v7554_v25  ;;  %v7561_v8 = vld [vmem:[#allocation81_spill] sm:$0xff]  ;;  %v7564_v11 = vld [vmem:[#allocation31_spill] sm:$0xff] }
 0x9f1   :  { %4423 = verf.f32 %v3531_v36  ;;  %v3137_v43 = vadd.f32 %v7556_v1, %v3069_v7  ;;  %v3229_v47 = vadd.f32 %v7558_v30, %v7557_v58  ;;  %v3350_v55 = vadd.f32 %v7560_v21, %v7559_v34  ;;  %v7562_v38 = vld [vmem:[#allocation29_spill] sm:$0xff]  ;;  %v7563_v36 = vld [vmem:[#allocation86_spill] sm:$0xff]  ;;  %v7569_v34 = vld [vmem:[#allocation96_spill] sm:$0xff] }
 0x9f2   :  { %4425 = verf.f32 %v3532_v29  ;;  %v3480_v9 = vadd.f32 %v3464_v59, %v3448_v46  ;;  %v3481_v54 = vadd.f32 %v3465_v31, %v3449_v61  ;;  %v3138_v27 = vadd.f32 %v7561_v8, %v3070_v63  ;;  %v7565_v25 = vld [vmem:[#allocation33_spill] sm:$0xff] }
 0x9f3   :  { %v3403_v6 = vmul.f32 %v6556_v3, %v6832_v2  ;;  %v3434_v12 = vmul.f32 %v7562_v38, %v3137_v43  ;;  %v3418_v7 = vadd.f32 %v7563_v36, %v3350_v55  ;;  %v3072_v29 = vadd.f32 %v6805_v26, %v6740_v39  ;;  %v7567_v39 = vld [vmem:[#allocation19_spill] sm:$0xff]  ;;  %v7573_v38 = vld [vmem:[#allocation108_spill] sm:$0xff]  ;;  %v7574_v36 = vld [vmem:[#allocation21_spill] sm:$0xff] }
 0x9f4   :  { %v3503_v14 = vadd.f32 %v7012_v52, %v3480_v9  ;;  %v3139_v51 = vadd.f32 %v6811_v5, %v6742_v35  ;;  %v3504_v46 = vadd.f32 %v7012_v52, %v3481_v54  ;;  %v3435_v59 = vmul.f32 %v7564_v11, %v3138_v27  ;;  %v7566_v9 = vld [vmem:[#allocation83_spill] sm:$0xff]  ;;  %v7571_v54 = vld [vmem:[#allocation112_spill] sm:$0xff] }
 0x9f5   :  { %v3419_v61 = vadd.f32 %v3403_v6, %v6748_v22  ;;  %v3450_v16 = vadd.f32 %v3434_v12, %v3229_v47  ;;  %v3515_v2 = vmul.f32 0.5, %v3499_v4  ;;  %v3466_v20 = vmul.f32 %v7565_v25, %v3418_v7  ;;  %v7568_v22 = vld [vmem:[#allocation95_spill] sm:$0xff]  ;;  %v7570_v47 = vld [vmem:[#allocation113_spill] sm:$0xff] }
 0x9f6   :  { %v3535_v31 = vmul.f32 0.70710677, %v3503_v14  ;;  %v3140_v63 = vadd.f32 %v6816_v62, %v3072_v29  ;;  %v3516_v1 = vmul.f32 0.5, %v3500_v33  ;;  %v3536_v43 = vmul.f32 0.70710677, %v3504_v46  ;;  %v7572_v62 = vld [vmem:[#allocation111_spill] sm:$0xff] }
 0x9f7   :  { %v3451_v26 = vadd.f32 %v3435_v59, %v7566_v9  ;;  %v3467_v58 = vmul.f32 %v7567_v39, %v3419_v61  ;;  %v3482_v5 = vadd.f32 %v3466_v20, %v3450_v16  ;;  %v3232_v30 = vadd.f32 %v7568_v22, %v6794_v32  ;;  %v7575_v59 = vld [vmem:[#allocation23_spill] sm:$0xff] }
 0x9f8   :  { %v4420_v35 = vpop.eup %4419  ;;  %4427 = verf.f32 %v3535_v31  ;;  %v3352_v4 = vadd.f32 %v7570_v47, %v7569_v34  ;;  %v3353_v33 = vadd.f32 %v7572_v62, %v7571_v54  ;;  %v3519_v27 = vmul.f32 0.5, %v3503_v14  ;;  %v7577_v22 = vld [vmem:[#allocation107_spill] sm:$0xff]  ;;  %v7579_v62 = vld [vmem:[#allocation26_spill] sm:$0xff] }
 0x9f9   :  { %v3565_v21 = vadd.f32 1.0, %v4420_v35  ;;  %4429 = verf.f32 %v3536_v43  ;;  %v3483_v55 = vadd.f32 %v3467_v58, %v3451_v26  ;;  %v4422_v8 = vpop.eup %4421  ;;  %v3505_v6 = vadd.f32 %v7012_v52, %v3482_v5  ;;  %v7576_v43 = vld [vmem:[#allocation99_spill] sm:$0xff] }
 0x9fa   :  { %v3404_v12 = vmul.f32 %v6556_v3, %v7573_v38  ;;  %v3436_v7 = vmul.f32 %v7574_v36, %v3139_v51  ;;  %v3566_v32 = vadd.f32 1.0, %v4422_v8  ;;  %v3520_v61 = vmul.f32 0.5, %v3504_v46  ;;  %v7580_v38 = vld [vmem:[#allocation104_spill] sm:$0xff]  ;;  %v7581_v36 = vld [vmem:[#allocation109_spill] sm:$0xff] }
 0x9fb   :  { %v4424_v29 = vpop.eup %4423  ;;  %v3506_v11 = vadd.f32 %v7012_v52, %v3483_v55  ;;  %v3437_v16 = vmul.f32 %v7575_v59, %v3140_v63  ;;  %v3537_v20 = vmul.f32 0.70710677, %v3505_v6  ;;  %v3405_v14 = vmul.f32 %v6556_v3, %v7576_v43  ;;  %v7578_v55 = vld [vmem:[#allocation28_spill] sm:$0xff]  ;;  %v7588_v59 = vld [vmem:[#allocation102_spill] sm:$0xff] }
 0x9fc   :  { %v4426_v31 = vpop.eup %4425  ;;  %v3563_v25 = vadd.f32 1.0, %v4424_v29  ;;  %v3420_v9 = vadd.f32 %v3404_v12, %v3352_v4  ;;  %v3581_v39 = vmul.f32 %v3565_v21, %v3517_v50  ;;  %v3582_v58 = vmul.f32 %v3566_v32, %v3518_v0  ;;  %v7582_v12 = vld [vmem:[#allocation105_spill] sm:$0xff]  ;;  %v7583_v50 = vld [vmem:[#allocation100_spill] sm:$0xff]  ;;  %v7586_v32 = vld [vmem:[#allocation110_spill] sm:$0xff] }
 0x9fd   :  { %v3564_v26 = vadd.f32 1.0, %v4426_v31  ;;  %v3538_v35 = vmul.f32 0.70710677, %v3506_v11  ;;  %4431 = verf.f32 %v3537_v20  ;;  %v3421_v51 = vadd.f32 %v3405_v14, %v3353_v33  ;;  %v7585_v29 = vld [vmem:[#allocation97_spill] sm:$0xff]  ;;  %v7590_v14 = vld [vmem:[#allocation120_spill] sm:$0xff] }
 0x9fe   :  { %v3579_v5 = vmul.f32 %v3563_v25, %v3515_v2  ;;  %v3452_v46 = vadd.f32 %v3436_v7, %v7577_v22  ;;  %v3596_v47 = vpack.c.bf16 %v3582_v58, %v3581_v39  ;;  %v3453_v63 = vadd.f32 %v3437_v16, %v3232_v30  ;;  %v7584_v2 = vld [vmem:[#allocation106_spill] sm:$0xff]  ;;  %v7587_v7 = vld [vmem:[#allocation103_spill] sm:$0xff]  ;;  %v7589_v20 = vld [vmem:[#allocation101_spill] sm:$0xff] }
 0x9ff   :  { %v3580_v34 = vmul.f32 %v3564_v26, %v3516_v1  ;;  %4433 = verf.f32 %v3538_v35  ;;  %v3468_v54 = vmul.f32 %v7578_v55, %v3420_v9  ;;  %v3469_v8 = vmul.f32 %v7579_v62, %v3421_v51  ;;  %v7591_v58 = vld [vmem:[#allocation116_spill] sm:$0xff]  ;;  %v7592_v51 = vld [vmem:[#allocation98_spill] sm:$0xff]  ;;  %v7593_v22 = vld [vmem:[#allocation119_spill] sm:$0xff] }
 0xa00   :  { %v3073_v4 = vadd.f32 %v7581_v36, %v7580_v38  ;;  %v3074_v0 = vadd.f32 %v7583_v50, %v7582_v12  ;;  %v3233_v33 = vadd.f32 %v7585_v29, %v7584_v2  ;;  %v3354_v1 = vadd.f32 %v7587_v7, %v7586_v32  ;;  %v7594_v55 = vld [vmem:[#allocation32_spill] sm:$0xff]  ;;  %v7595_v36 = vld [vmem:[#allocation30_spill] sm:$0xff]  ;;  %v7596_v29 = vld [vmem:[#allocation115_spill] sm:$0xff] }
 0xa01   :  { %v3595_v21 = vpack.c.bf16 %v3580_v34, %v3579_v5  ;;  %v3355_v30 = vadd.f32 %v6904_v18, %v7588_v59  ;;  %v3484_v31 = vadd.f32 %v3468_v54, %v3452_v46  ;;  %v3485_v25 = vadd.f32 %v3469_v8, %v3453_v63  ;;  %v7597_v32 = vld [vmem:[#allocation34_spill] sm:$0xff] }
 0xa02   :  { %v4428_v16 = vpop.eup %4427  ;;  %v3141_v43 = vadd.f32 %v7589_v20, %v3073_v4  ;;  %v3142_v9 = vadd.f32 %v7590_v14, %v3074_v0  ;;  %v3406_v35 = vmul.f32 %v6556_v3, %v7591_v58  ;;  %v3407_v5 = vmul.f32 %v6556_v3, %v6975_v24  ;;  %v7600_v14 = vld [vmem:[#allocation114_spill] sm:$0xff]  ;;  %v7601_v58 = vld [vmem:[#allocation121_spill] sm:$0xff] }
 0xa03   :  { %v4430_v26 = vpop.eup %4429  ;;  %4147 = vmatprep.mubr.bf16.mxu1 %v3595_v21  ;;  %v3567_v39 = vadd.f32 1.0, %v4428_v16  ;;  %v3075_v34 = vadd.f32 %v7593_v22, %v7592_v51  ;;  %v3507_v46 = vadd.f32 %v7012_v52, %v3484_v31  ;;  %v3508_v63 = vadd.f32 %v7012_v52, %v3485_v25  ;;  %v7598_v31 = vld [vmem:[#allocation35_spill] sm:$0xff]  ;;  %v7602_v22 = vld [vmem:[#allocation36_spill] sm:$0xff] }
 0xa04   :  { %4148 = vmatmul.mubr.bf16.vlgmr.msra.gmra.mrb[20].mxu1 %v3596_v47  ;;  %v3568_v18 = vadd.f32 1.0, %v4430_v26  ;;  %v3438_v54 = vmul.f32 %v7594_v55, %v3141_v43  ;;  %v3521_v62 = vmul.f32 0.5, %v3505_v6  ;;  %v3422_v8 = vadd.f32 %v3406_v35, %v3354_v1  ;;  %v7599_v6 = vld [vmem:[#allocation118_spill] sm:$0xff] }
 0xa05   :  { %v3423_v38 = vadd.f32 %v3407_v5, %v3355_v30  ;;  %v3439_v4 = vmul.f32 %v7595_v36, %v3142_v9  ;;  %v3583_v12 = vmul.f32 %v3567_v39, %v3519_v27  ;;  %v3522_v0 = vmul.f32 0.5, %v3506_v11  ;;  %v7603_v55 = vld [vmem:[#allocation38_spill] sm:$0xff]  ;;  %v7604_v36 = vld [vmem:[#allocation39_spill] sm:$0xff] }
 0xa06   :  { %v3584_v50 = vmul.f32 %v3568_v18, %v3520_v61  ;;  %v3539_v24 = vmul.f32 0.70710677, %v3507_v46  ;;  %v3540_v21 = vmul.f32 0.70710677, %v3508_v63  ;;  %v3454_v2 = vadd.f32 %v3438_v54, %v3233_v33 }
 0xa07   :  { %v3455_v47 = vadd.f32 %v3439_v4, %v7596_v29  ;;  %v3470_v7 = vmul.f32 %v7597_v32, %v3422_v8  ;;  %v4432_v59 = vpop.eup %4431  ;;  %v3471_v25 = vmul.f32 %v7598_v31, %v3423_v38  ;;  %v3076_v1 = vadd.f32 %v6971_v10, %v7599_v6  ;;  %v7611_v6 = vld [vmem:[#allocation41_spill] sm:$0xff] }
 0xa08   :  { %v3597_v16 = vpack.c.bf16 %v3584_v50, %v3583_v12  ;;  %4435 = verf.f32 %v3539_v24  ;;  %v3569_v20 = vadd.f32 1.0, %v4432_v59  ;;  %v3143_v61 = vadd.f32 %v6979_v23, %v3075_v34  ;;  %v7605_v12 = vld [vmem:[#allocation37_spill] sm:$0xff] }
 0xa09   :  { %v4434_v30 = vpop.eup %4433  ;;  %4437 = verf.f32 %v3540_v21  ;;  %v3486_v27 = vadd.f32 %v3470_v7, %v3454_v2  ;;  %v3487_v33 = vadd.f32 %v3471_v25, %v3455_v47  ;;  %v3144_v43 = vadd.f32 %v6955_v15, %v3076_v1  ;;  %v7610_v25 = vld [vmem:[#allocation42_spill] sm:$0xff] }
 0xa0a   :  { %4151 = vmatprep.mubr.bf16.mxu1 %v3597_v16  ;;  %v3570_v11 = vadd.f32 1.0, %v4434_v30  ;;  %v3236_v9 = vadd.f32 %v7600_v14, %v6957_v53  ;;  %v3585_v26 = vmul.f32 %v3569_v20, %v3521_v62  ;;  %v3356_v10 = vadd.f32 %v7032_v41, %v7601_v58  ;;  %v7609_v16 = vld [vmem:[#allocation124_spill] sm:$0xff]  ;;  %v7612_v1 = vld [vmem:[#allocation122_spill] sm:$0xff]  ;;  %v7613_v30 = vld [vmem:[#allocation65_spill] sm:$0xff] }
 0xa0b   :  { %v3509_v39 = vadd.f32 %v7012_v52, %v3486_v27  ;;  %v3357_v35 = vadd.f32 %v6983_v56, %v7028_v28  ;;  %v3510_v23 = vadd.f32 %v7012_v52, %v3487_v33  ;;  %v3408_v51 = vmul.f32 %v6556_v3, %v6965_v40  ;;  %v7614_v33 = vld [vmem:[#allocation43_spill] sm:$0xff] }
 0xa0c   :  { %v3586_v5 = vmul.f32 %v3570_v11, %v3522_v0  ;;  %v3440_v15 = vmul.f32 %v7602_v22, %v3143_v61  ;;  %v3290_v53 = vmul.f32 %v6259_v13, %v6965_v40  ;;  %v3441_v54 = vmul.f32 %v7603_v55, %v3144_v43 }
 0xa0d   :  { %v3541_v34 = vmul.f32 0.70710677, %v3509_v39  ;;  %v3425_v18 = vadd.f32 %v6939_v17, %v3357_v35  ;;  %v3523_v62 = vmul.f32 0.5, %v3507_v46  ;;  %v3542_v8 = vmul.f32 0.70710677, %v3510_v23  ;;  %v7606_v46 = vld [vmem:[#allocation117_spill] sm:$0xff] }
 0xa0e   :  { %v3598_v41 = vpack.c.bf16 %v3586_v5, %v3585_v26  ;;  %v3424_v56 = vadd.f32 %v3408_v51, %v3356_v10  ;;  %v3456_v28 = vadd.f32 %v3440_v15, %v6961_v48  ;;  %v3457_v38 = vadd.f32 %v3441_v54, %v3236_v9  ;;  %v7607_v48 = vld [vmem:[#allocation50_spill] sm:$0xff]  ;;  %v7615_v9 = vld [vmem:[#allocation40_spill] sm:$0xff] }
 0xa0f   :  { %4439 = verf.f32 %v3541_v34  ;;  %v3473_v4 = vmul.f32 %v7604_v36, %v3425_v18  ;;  %v3077_v13 = vadd.f32 %v6952_v37, %v6968_v19  ;;  %v3078_v17 = vadd.f32 %v6912_v49, %v6949_v60  ;;  %v7608_v60 = vld [vmem:[#allocation123_spill] sm:$0xff] }
 0xa10   :  { %4152 = vmatmul.mubr.bf16.gmra.mrb[24].mxu1 %v3598_v41  ;;  %4441 = verf.f32 %v3542_v8  ;;  %v3472_v50 = vmul.f32 %v7605_v12, %v3424_v56  ;;  %v3237_v0 = vadd.f32 %v7606_v46, %v6959_v44  ;;  %v3358_v24 = vadd.f32 %v6936_v45, %v3290_v53 }
 0xa11   :  { %v3489_v40 = vadd.f32 %v3473_v4, %v3457_v38  ;;  %v3411_v21 = vmul.f32 %v6556_v3, %v7607_v48  ;;  %v3524_v29 = vmul.f32 0.5, %v3508_v63  ;;  %v3145_v32 = vadd.f32 %v6928_v57, %v3077_v13 }
 0xa12   :  { %v4436_v2 = vpop.eup %4435  ;;  %v3488_v47 = vadd.f32 %v3472_v50, %v3456_v28  ;;  %v3146_v7 = vadd.f32 %v6931_v42, %v3078_v17  ;;  %v3426_v59 = vadd.f32 %v7608_v60, %v3358_v24  ;;  %v3238_v57 = vadd.f32 %v7613_v30, %v7612_v1 }
 0xa13   :  { %v4438_v37 = vpop.eup %4437  ;;  %v3571_v19 = vadd.f32 1.0, %v4436_v2  ;;  %v3512_v49 = vadd.f32 %v7012_v52, %v3489_v40  ;;  %v3427_v44 = vadd.f32 %v3411_v21, %v7609_v16  ;;  %v3442_v3 = vmul.f32 %v7610_v25, %v3145_v32 }
 0xa14   :  { %v3572_v31 = vadd.f32 1.0, %v4438_v37  ;;  %v3511_v45 = vadd.f32 %v7012_v52, %v3488_v47  ;;  %v3443_v63 = vmul.f32 %v7611_v6, %v3146_v7  ;;  %v3474_v43 = vmul.f32 %v7614_v33, %v3426_v59 }
 0xa15   :  { %v3587_v20 = vmul.f32 %v3571_v19, %v3523_v62  ;;  %v3544_v42 = vmul.f32 0.70710677, %v3512_v49  ;;  %v3458_v11 = vadd.f32 %v3442_v3, %v3237_v0  ;;  %v3475_v26 = vmul.f32 %v7615_v9, %v3427_v44  ;;  %v7617_v44 = vld [vmem:[#allocation72_spill] sm:$0xff]  ;;  %v7622_v9 = vld [vmem:[#allocation55_spill] sm:$0xff] }
 0xa16   :  { %v3588_v27 = vmul.f32 %v3572_v31, %v3524_v29  ;;  %v3543_v61 = vmul.f32 0.70710677, %v3511_v45  ;;  %v3459_v14 = vadd.f32 %v3443_v63, %v3238_v57  ;;  %v3525_v53 = vmul.f32 0.5, %v3509_v39  ;;  %v3968_v29 = vld [vmem:[%s7220_s15] ss:$0 sm:$0xff]  ;;  %v7619_v57 = vld [vmem:[#allocation58_spill] sm:$0xff] }
 0xa17   :  { %4443 = verf.f32 %v3544_v42  ;;  %v3490_v10 = vadd.f32 %v3474_v43, %v3458_v11  ;;  %v3526_v34 = vmul.f32 0.5, %v3510_v23  ;;  %v3528_v36 = vmul.f32 0.5, %v3512_v49  ;;  %v7616_v49 = vld [vmem:[#allocation61_spill] sm:$0xff]  ;;  %v7621_v43 = vld [vmem:[#allocation70_spill] sm:$0xff]  ;;  %s4627_s15 = smov [#allocation13]  }
 0xa18   :  { %v3599_v58 = vpack.c.bf16 %v3588_v27, %v3587_v20  ;;  %4445 = verf.f32 %v3543_v61  ;;  %v3491_v5 = vadd.f32 %v3475_v26, %v3459_v14  ;;  %v3527_v12 = vmul.f32 0.5, %v3511_v45  ;;  %v7618_v45 = vld [vmem:[#allocation68_spill] sm:$0xff]  ;;  %v7620_v27 = vld [vmem:[#allocation69_spill] sm:$0xff]  ;;  %s3873_s4 = sshll.u32 %s4627_s15, 4  ;;  %s3874_s4 = int_to_ptr.vmem [resolvable:$true] %s3873_s4 }
 0xa19   :  { %v4440_v35 = vpop.eup %4439  ;;  %v3513_v15 = vadd.f32 %v7012_v52, %v3490_v10  ;;  %s4583_s23 = scalar_lea.vmem %s3874_s4, 2048  ;;  %p4588_p7 = scmp.lt.s32.totalorder %s3874_s4, %s3874_s4 }
 0xa1a   :  { %v4442_v51 = vpop.eup %4441  ;;  %4155 = vmatprep.mubr.bf16.mxu1 %v3599_v58  ;;  %v3573_v22 = vadd.f32 1.0, %v4440_v35  ;;  %v3514_v55 = vadd.f32 %v7012_v52, %v3491_v5  ;;  %p4584_p6 = scmp.ne.s32.totalorder %s3874_s4, %s4583_s23  ;;  %p4589_p8 = scmp.lt.s32.totalorder %s4583_s23, %s4583_s23 }
 0xa1b   :  { %v3574_v18 = vadd.f32 1.0, %v4442_v51  ;;  %v3545_v54 = vmul.f32 0.70710677, %v3513_v15  ;;  %v3529_v52 = vmul.f32 0.5, %v3513_v15 }
 0xa1c   :  { %v3589_v41 = vmul.f32 %v3573_v22, %v3525_v53  ;;  %v3546_v8 = vmul.f32 0.70710677, %v3514_v55  ;;  %v3530_v0 = vmul.f32 0.5, %v3514_v55  ;;  %v7623_v22 = vld [vmem:[#allocation67_spill] sm:$0xff]  ;;  %p4590_p9 = por %p4589_p8, %p4588_p7 }
 0xa1d   :  { %v3590_v62 = vmul.f32 %v3574_v18, %v3526_v34  ;;  %4447 = verf.f32 %v3545_v54  ;;  %v7624_v34 = vld [vmem:[#allocation56_spill] sm:$0xff] }
 0xa1e   :  { %4449 = verf.f32 %v3546_v8  ;;  %v7626_v8 = vld [vmem:[#allocation53_spill] sm:$0xff]  ;;  %p4591_p10 = pnand %p4590_p9, %p4584_p6 }
 0xa1f   :  { %v3600_v56 = vpack.c.bf16 %v3590_v62, %v3589_v41  ;;  %v7625_v41 = vld [vmem:[#allocation52_spill] sm:$0xff] }
 0xa21   :  { %v4444_v28 = vpop.eup %4443  ;;  %4156 = vmatmul.mubr.bf16.gmra.mrb[28].mxu1 %v3600_v56 }
 0xa22   :  { %v4446_v38 = vpop.eup %4445  ;;  %v3576_v4 = vadd.f32 1.0, %v4444_v28 }
 0xa23   :  { %v3575_v50 = vadd.f32 1.0, %v4446_v38 }
 0xa24   :  { %v3592_v13 = vmul.f32 %v3576_v4, %v3528_v36  ;;  %v7627_v36 = vld [vmem:[#allocation57_spill] sm:$0xff] }
 0xa25   :  { %v3591_v39 = vmul.f32 %v3575_v50, %v3527_v12 }
 0xa27   :  { %v3601_v23 = vpack.c.bf16 %v3592_v13, %v3591_v39  ;;  %v4448_v17 = vpop.eup %4447 }
 0xa28   :  { %v4450_v40 = vpop.eup %4449  ;;  %v3577_v46 = vadd.f32 1.0, %v4448_v17 }
 0xa29   :  { %4159 = vmatprep.mubr.bf16.mxu1 %v3601_v23  ;;  %v3578_v24 = vadd.f32 1.0, %v4450_v40  ;;  %v7628_v23 = vld [vmem:[#allocation54_spill] sm:$0xff] }
 0xa2a   :  { %v3593_v48 = vmul.f32 %v3577_v46, %v3529_v52  ;;  %v7629_v46 = vld [vmem:[#allocation51_spill] sm:$0xff] }
 0xa2b   :  { %v3594_v21 = vmul.f32 %v3578_v24, %v3530_v0  ;;  %v7630_v24 = vld [vmem:[#allocation64_spill] sm:$0xff] }
 0xa2d   :  { %v3602_v2 = vpack.c.bf16 %v3594_v21, %v3593_v48 }
 0xa2f   :  { %4160 = vmatmul.mubr.bf16.gmra.mrb[32].mxu1 %v3602_v2  ;;  %v7631_v2 = vld [vmem:[#allocation71_spill] sm:$0xff] }
 0xad7   :  { %v4149_v47 = vpop.f32.mrb[20].mxu1 }
 0xad8   :  { %v3708_v32 = vpop.f32.mrb[21].mxu1  ;;  %v3717_v16 = vadd.f32 %v4149_v47, %v3968_v29 }
 0xad9   :  { %v3709_v7 = vadd.f32 %v3968_v29, %v3708_v32  ;;  %v4150_v37 = vpop.f32.mrb[22].mxu1 }
 0xada   :  { %v3711_v19 = vpop.f32.mrb[23].mxu1  ;;  %v3773_v25 = vadd.f32 %v3717_v16, %v7618_v45  ;;  %v3720_v3 = vadd.f32 %v4150_v37, %v3968_v29 }
 0xadb   :  { %v3771_v60 = vadd.f32 %v3709_v7, %v7616_v49  ;;  %v3712_v59 = vadd.f32 %v3968_v29, %v3711_v19 }
 0xadc   :  { %v3774_v20 = vadd.f32 %v3720_v3, %v7619_v57 }
 0xadd   :  { %3787 = vxpose.xlu0.b32.start [1/8] (short) (narrow) %v3771_v60, 64  ;;  %v3772_v31 = vadd.f32 %v3712_v59, %v7617_v44 }
 0xae1   :  { %3788 = vxpose.xlu0.b32.cont [2/8] (short) (narrow) %v3772_v31, 64 }
 0xae3   :  { %v4153_v6 = vpop.f32.mrb[24].mxu1 }
 0xae4   :  { %v3724_v63 = vpop.f32.mrb[25].mxu1  ;;  %v3733_v33 = vadd.f32 %v4153_v6, %v3968_v29 }
 0xae5   :  { %v4154_v1 = vpop.f32.mrb[26].mxu1  ;;  %3789 = vxpose.xlu0.b32.cont [3/8] (short) (narrow) %v3773_v25, 64  ;;  %v3725_v42 = vadd.f32 %v3968_v29, %v3724_v63 }
 0xae6   :  { %v3727_v30 = vpop.f32.mrb[27].mxu1  ;;  %v3777_v26 = vadd.f32 %v3733_v33, %v7622_v9  ;;  %v3736_v58 = vadd.f32 %v4154_v1, %v3968_v29 }
 0xae7   :  { %v3775_v61 = vadd.f32 %v3725_v42, %v7620_v27  ;;  %v3728_v11 = vadd.f32 %v3968_v29, %v3727_v30 }
 0xae8   :  { %v3778_v15 = vadd.f32 %v3736_v58, %v7623_v22 }
 0xae9   :  { %3790 = vxpose.xlu0.b32.cont [4/8] (short) (narrow) %v3774_v20, 64  ;;  %v3776_v14 = vadd.f32 %v3728_v11, %v7621_v43 }
 0xaed   :  { %3791 = vxpose.xlu0.b32.cont [5/8] (short) (narrow) %v3775_v61, 64 }
 0xaf1   :  { %3792 = vxpose.xlu0.b32.cont [6/8] (short) (narrow) %v3776_v14, 64 }
 0xaf4   :  { %v4157_v10 = vpop.f32.mrb[28].mxu1 }
 0xaf5   :  { %v3740_v35 = vpop.f32.mrb[29].mxu1  ;;  %3793 = vxpose.xlu0.b32.cont [7/8] (short) (narrow) %v3777_v26, 64  ;;  %v3749_v54 = vadd.f32 %v4157_v10, %v3968_v29 }
 0xaf6   :  { %v3741_v5 = vadd.f32 %v3968_v29, %v3740_v35  ;;  %v4158_v51 = vpop.f32.mrb[30].mxu1 }
 0xaf7   :  { %v3743_v53 = vpop.f32.mrb[31].mxu1  ;;  %v3781_v56 = vadd.f32 %v3749_v54, %v7626_v8  ;;  %v3752_v28 = vadd.f32 %v4158_v51, %v3968_v29 }
 0xaf8   :  { %v3779_v18 = vadd.f32 %v3741_v5, %v7624_v34  ;;  %v3744_v55 = vadd.f32 %v3968_v29, %v3743_v53 }
 0xaf9   :  { %3794 = vxpose.xlu0.b32.end [8/8] (short) (narrow) %v3778_v15, 64  ;;  %v3782_v4 = vadd.f32 %v3752_v28, %v7627_v36 }
 0xafa   :  { %3827 = vxpose.xlu1.b32.start [1/8] (short) (narrow) %v3779_v18, 64  ;;  %v3780_v62 = vadd.f32 %v3744_v55, %v7625_v41 }
 0xafe   :  { %3828 = vxpose.xlu1.b32.cont [2/8] (short) (narrow) %v3780_v62, 64 }
 0xb02   :  { %3829 = vxpose.xlu1.b32.cont [3/8] (short) (narrow) %v3781_v56, 64  ;;  %v4161_v38 = vpop.f32.mrb[32].mxu1 }
 0xb03   :  { %v3756_v12 = vpop.f32.mrb[33].mxu1  ;;  %v3765_v52 = vadd.f32 %v4161_v38, %v3968_v29 }
 0xb04   :  { %v3757_v50 = vadd.f32 %v3968_v29, %v3756_v12  ;;  %v4162_v13 = vpop.f32.mrb[34].mxu1 }
 0xb05   :  { %v3759_v39 = vpop.f32.mrb[35].mxu1  ;;  %v3785_v48 = vadd.f32 %v3765_v52, %v7630_v24  ;;  %v3768_v21 = vadd.f32 %v4162_v13, %v3968_v29 }
 0xb06   :  { %3830 = vxpose.xlu1.b32.cont [4/8] (short) (narrow) %v3782_v4, 64  ;;  %v3783_v17 = vadd.f32 %v3757_v50, %v7628_v23  ;;  %v3760_v40 = vadd.f32 %v3968_v29, %v3759_v39 }
 0xb07   :  { %v3786_v47 = vadd.f32 %v3768_v21, %v7631_v2 }
 0xb08   :  { %v3784_v0 = vadd.f32 %v3760_v40, %v7629_v46 }
 0xb0a   :  { %3831 = vxpose.xlu1.b32.cont [5/8] (short) (narrow) %v3783_v17, 64 }
 0xb0e   :  { %3832 = vxpose.xlu1.b32.cont [6/8] (short) (narrow) %v3784_v0, 64 }
 0xb12   :  { %3833 = vxpose.xlu1.b32.cont [7/8] (short) (narrow) %v3785_v48, 64 }
 0xb16   :  { %3834 = vxpose.xlu1.b32.end [8/8] (short) (narrow) %v3786_v47, 64 }
 0xb5d   :  { %v3803_v32 = vpop.trf.xlu0 }
 0xb5e   :  { %3819 = vst.msk [vmem:[#allocation13] sm:$0xff] %vm954_vm1, %v3803_v32 }
 0xb61   :  { %v3804_v7 = vpop.trf.xlu0 }
 0xb62   :  { %3820 = vst.msk [vmem:[#allocation13 + $0x8] sm:$0xff] %vm954_vm1, %v3804_v7 }
 0xb65   :  { %v3805_v37 = vpop.trf.xlu0 }
 0xb66   :  { %3821 = vst.msk [vmem:[#allocation13 + $0x10] sm:$0xff] %vm954_vm1, %v3805_v37 }
 0xb69   :  { %v3806_v19 = vpop.trf.xlu0 }
 0xb6a   :  { %3822 = vst.msk [vmem:[#allocation13 + $0x18] sm:$0xff] %vm954_vm1, %v3806_v19 }
 0xb6d   :  { %v3807_v49 = vpop.trf.xlu0 }
 0xb6e   :  { %3823 = vst.msk [vmem:[#allocation13 + $0x20] sm:$0xff] %vm954_vm1, %v3807_v49 }
 0xb71   :  { %v3808_v29 = vpop.trf.xlu0 }
 0xb72   :  { %3824 = vst.msk [vmem:[#allocation13 + $0x28] sm:$0xff] %vm954_vm1, %v3808_v29 }
 0xb75   :  { %v3809_v60 = vpop.trf.xlu0 }
 0xb76   :  { %3825 = vst.msk [vmem:[#allocation13 + $0x30] sm:$0xff] %vm954_vm1, %v3809_v60 }
 0xb79   :  { %v3810_v59 = vpop.trf.xlu0 }
 0xb7a   :  { %v3843_v16 = vpop.trf.xlu1  ;;  %3826 = vst.msk [vmem:[#allocation13 + $0x38] sm:$0xff] %vm954_vm1, %v3810_v59 }
 0xb7b   :  { %3860 = vst.msk [vmem:[#allocation13 + $0x40] sm:$0xff] %vm954_vm1, %v3843_v16 }
 0xb7e   :  { %v3844_v44 = vpop.trf.xlu1 }
 0xb7f   :  { %3861 = vst.msk [vmem:[#allocation13 + $0x48] sm:$0xff] %vm954_vm1, %v3844_v44 }
 0xb82   :  { %v3845_v31 = vpop.trf.xlu1 }
 0xb83   :  { %3862 = vst.msk [vmem:[#allocation13 + $0x50] sm:$0xff] %vm954_vm1, %v3845_v31 }
 0xb86   :  { %v3846_v45 = vpop.trf.xlu1 }
 0xb87   :  { %3863 = vst.msk [vmem:[#allocation13 + $0x58] sm:$0xff] %vm954_vm1, %v3846_v45 }
 0xb8a   :  { %v3847_v25 = vpop.trf.xlu1 }
 0xb8b   :  { %3864 = vst.msk [vmem:[#allocation13 + $0x60] sm:$0xff] %vm954_vm1, %v3847_v25 }
 0xb8e   :  { %v3848_v3 = vpop.trf.xlu1 }
 0xb8f   :  { %3865 = vst.msk [vmem:[#allocation13 + $0x68] sm:$0xff] %vm954_vm1, %v3848_v3 }
 0xb92   :  { %v3849_v6 = vpop.trf.xlu1 }
 0xb93   :  { %3866 = vst.msk [vmem:[#allocation13 + $0x70] sm:$0xff] %vm954_vm1, %v3849_v6 }
 0xb96   :  { %v3850_v63 = vpop.trf.xlu1 }
 0xb97   :  { %3867 = vst.msk [vmem:[#allocation13 + $0x78] sm:$0xff] %vm954_vm1, %v3850_v63 }
 0xb98   :  { %4594 = shalt.err (!%p4591_p10)
}
 0xb99   :  { %s7632_s10 = sld [smem:[#allocation126_spill]] }
 0xb9f   :  { %s4595_s24 = scalar_lea.hbm %s7632_s10, 2048 }
 0xba0   :  { %p4596_p11 = scmp.ne.s32.totalorder %s7632_s10, %s4595_s24  ;;  %p4599_p12 = scmp.lt.u32.totalorder %s4595_s24, %s7632_s10 }
 0xba2   :  { %p4601_p13 = pnand %p4599_p12, %p4596_p11 }
 0xba4   :  { %4604 = shalt.err (!%p4601_p13)
}
 0xba5   :  { %3879 = dma.vmem_to_hbm [thread:$0]  %s3874_s4, 2048, %s7632_s10, [#allocation4], %s4620_s9, %s4620_s9, %s4621_s21  }
 0xba6   :  { %4613 = dma.done.wait [#allocation4], 2048  }
 0xba7   :  { %4614 = vsyncadd [#allocation4], 4294965248 }
 0xba8   :  { %3883 = vsyncpa [#allocation3], 1 }
 0xba9   :  { %3884 = vsyncpa [#allocation6], 1 }
 0xbaa   :  { %3885 = vsyncpa [#allocation9], 1 }
 0xbab   :  { %3886 = vsyncpa [#allocation12], 1 }
 0xbac   :  { %3887 = vsyncpa [#allocation4], 1 }

</bundles_post_ra>
